<compile_context>
chip_gen: v7x
topology: tpu7x:2x2x1
jax: 0.10.0
libtpu: 0.0.40
codegen_flags: <defaults>
</compile_context>

<pallas_src>
import functools
import numpy as np
import jax
import jax.numpy as jnp
from jax import lax
from jax.experimental import pallas as pl
from jax.experimental.pallas import tpu as pltpu

LANE = 128


def _round_up(n, m):
    return ((n + m - 1) // m) * m


# ---------------------------------------------------------------------------
# Bottleneck block kernel
# ---------------------------------------------------------------------------
def bottleneck_kernel(x_ref, w1_ref, w2_ref, w3_ref,
                      b1_ref, b2_ref, b3_ref, o_ref, pad_ref, *, H, W):
    """One batch element per grid step; channel dims are pre-padded to 128."""
    HW = H * W
    P = w1_ref.shape[1]                                    # padded planes

    x = x_ref[0]                                           # (HW, C) float32

    # ---- conv1 (1x1, BN scale folded into weights) + bias + relu -----------
    o1 = jnp.dot(x.astype(jnp.bfloat16), w1_ref[...],
                 preferred_element_type=jnp.float32)
    o1 = jnp.maximum(o1 + b1_ref[...], 0.0)                # (HW, P) f32

    # ---- conv2 (3x3, stride=1, pad=1) as ONE im2col matmul with K = 9*P ----
    # Zero only the 1-element border of the scratch; the interior is fully
    # overwritten every step, so re-zeroing it would be wasted stores.
    pad_ref[pl.ds(0, 1), :, :] = jnp.zeros((1, W + 2, P), jnp.float32)
    pad_ref[pl.ds(H + 1, 1), :, :] = jnp.zeros((1, W + 2, P), jnp.float32)
    pad_ref[:, pl.ds(0, 1), :] = jnp.zeros((H + 2, 1, P), jnp.float32)
    pad_ref[:, pl.ds(W + 1, 1), :] = jnp.zeros((H + 2, 1, P), jnp.float32)
    pad_ref[pl.ds(1, H), pl.ds(1, W), :] = o1.reshape(H, W, P)

    # 9 shifted windows, cast to bf16 before the lane-axis concat (half the
    # copy bytes; the MXU input has to be bf16 anyway).
    taps = [pad_ref[pl.ds(dy, H), pl.ds(dx, W), :].astype(jnp.bfloat16)
            for dy in range(3) for dx in range(3)]
    tap9 = jnp.concatenate(taps, axis=-1).reshape(HW, 9 * P)   # (HW, 9P) bf16
    o2 = jnp.dot(tap9, w2_ref[...], preferred_element_type=jnp.float32)
    o2 = jnp.maximum(o2 + b2_ref[...], 0.0)                # (HW, P) f32

    # ---- conv3 (1x1, BN scale folded) + bias --------------------------------
    o3 = jnp.dot(o2.astype(jnp.bfloat16), w3_ref[...],
                 preferred_element_type=jnp.float32)
    o3 = o3 + b3_ref[...]                                  # (HW, C) f32

    # ---- residual add (downsample=None) + relu, kept in f32 -----------------
    o_ref[0] = jnp.maximum(o3 + x, 0.0)


def bottleneck_forward(x_nchw, kparams):
    """x_nchw: (N, Cin, H, W) float32, PyTorch layout."""
    # TODO(synk): keep the surrounding model in NHWC to avoid these transposes.
    x = jnp.transpose(x_nchw, (0, 2, 3, 1))                # -> NHWC
    N, H, W, Cin = x.shape
    HW = H * W
    Cpad, Ppad = kparams["w1"].shape
    Cout = kparams["cout"]

    xf = x.reshape(N, HW, Cin)
    if Cpad > Cin:
        xf = jnp.pad(xf, ((0, 0), (0, 0), (0, Cpad - Cin)))

    kernel = functools.partial(bottleneck_kernel, H=H, W=W)
    out_flat = pl.pallas_call(
        kernel,
        out_shape=jax.ShapeDtypeStruct((N, HW, Cpad), jnp.float32),
        grid_spec=pltpu.PrefetchScalarGridSpec(
            num_scalar_prefetch=0,
            grid=(N,),
            in_specs=[
                pl.BlockSpec((1, HW, Cpad), lambda n: (n, 0, 0)),   # x (per batch)
                pl.BlockSpec((Cpad, Ppad), lambda n: (0, 0)),       # w1 (bf16)
                pl.BlockSpec((9 * Ppad, Ppad), lambda n: (0, 0)),   # w2 im2col (bf16)
                pl.BlockSpec((Ppad, Cpad), lambda n: (0, 0)),       # w3 (bf16)
                pl.BlockSpec((1, Ppad), lambda n: (0, 0)),          # b1 (f32)
                pl.BlockSpec((1, Ppad), lambda n: (0, 0)),          # b2 (f32)
                pl.BlockSpec((1, Cpad), lambda n: (0, 0)),          # b3 (f32)
            ],
            out_specs=pl.BlockSpec((1, HW, Cpad), lambda n: (n, 0, 0)),
            scratch_shapes=[pltpu.VMEM((H + 2, W + 2, Ppad), jnp.float32)],
        ),
        compiler_params=pltpu.CompilerParams(
            dimension_semantics=("parallel",)),
    )(xf, kparams["w1"], kparams["w2"], kparams["w3"],
      kparams["b1"], kparams["b2"], kparams["b3"])

    out = out_flat[:, :, :Cout].reshape(N, H, W, Cout)
    return jnp.transpose(out, (0, 3, 1, 2))                # back to NCHW


# ---------------------------------------------------------------------------
# Classifier head kernel: fc (Linear) + softmax
# ---------------------------------------------------------------------------
def head_kernel(x_ref, w_ref, b_ref, logits_ref, probas_ref):
    logits = jnp.dot(x_ref[...].astype(jnp.bfloat16), w_ref[...],
                     preferred_element_type=jnp.float32) + b_ref[...]
    logits_ref[...] = logits
    m = jnp.max(logits, axis=-1, keepdims=True)
    e = jnp.exp(logits - m)                                # padded lanes -> 0
    denom = jnp.sum(e, axis=-1, keepdims=True)
    probas_ref[...] = e * pl.reciprocal(denom, approx=True)


def head_forward(feats, w_fc, b_fc):
    """feats: (N, F) f32; w_fc: (F, C) f32; b_fc: (C,) f32 -> (logits, probas)."""
    N, F = feats.shape
    C = w_fc.shape[1]
    Fp = max(_round_up(F, LANE), LANE)
    Cp = max(_round_up(C, LANE), LANE)

    xf = feats if Fp == F else jnp.pad(feats, ((0, 0), (0, Fp - F)))
    wp = jnp.zeros((Fp, Cp), jnp.float32).at[:F, :C].set(w_fc).astype(jnp.bfloat16)
    # Padded classes get a large negative bias -> exp() == 0 -> exact softmax.
    bp = jnp.full((1, Cp), -1e30, jnp.float32).at[0, :C].set(b_fc)

    logits_p, probas_p = pl.pallas_call(
        head_kernel,
        out_shape=(jax.ShapeDtypeStruct((N, Cp), jnp.float32),
                   jax.ShapeDtypeStruct((N, Cp), jnp.float32)),
        grid=(1,),
        in_specs=[
            pl.BlockSpec((N, Fp), lambda i: (0, 0)),
            pl.BlockSpec((Fp, Cp), lambda i: (0, 0)),
            pl.BlockSpec((1, Cp), lambda i: (0, 0)),
        ],
        out_specs=(pl.BlockSpec((N, Cp), lambda i: (0, 0)),
                   pl.BlockSpec((N, Cp), lambda i: (0, 0))),
    )(xf, wp, bp)

    return logits_p[:, :C], probas_p[:, :C]


# ---------------------------------------------------------------------------
# Parameter construction (synthetic, deterministic)
# ---------------------------------------------------------------------------
def init_params(key, inplanes, planes, eps=1e-5):
    """Deterministic synthetic conv weights + eval-mode BN params (f32)."""
    expansion = 4
    outplanes = planes * expansion
    keys = jax.random.split(key, 15)

    # Conv weights generated in PyTorch layout (out, in, kh, kw), then converted.
    w1_t = jax.random.normal(keys[0], (planes, inplanes, 1, 1), jnp.float32) * 0.1
    w2_t = jax.random.normal(keys[1], (planes, planes, 3, 3), jnp.float32) * 0.1
    w3_t = jax.random.normal(keys[2], (outplanes, planes, 1, 1), jnp.float32) * 0.1

    def bn_fold(kg, kb, km, kv, c):
        gamma = 1.0 + 0.1 * jax.random.normal(kg, (c,), jnp.float32)
        beta = 0.1 * jax.random.normal(kb, (c,), jnp.float32)
        mean = 0.1 * jax.random.normal(km, (c,), jnp.float32)
        var = jnp.abs(jax.random.normal(kv, (c,), jnp.float32)) + 0.5
        scale = gamma / jnp.sqrt(var + eps)
        bias = beta - mean * scale
        return scale, bias

    s1, b1 = bn_fold(keys[3], keys[4], keys[5], keys[6], planes)
    s2, b2 = bn_fold(keys[7], keys[8], keys[9], keys[10], planes)
    s3, b3 = bn_fold(keys[11], keys[12], keys[13], keys[14], outplanes)

    return dict(
        w1=jnp.transpose(w1_t[:, :, 0, 0], (1, 0)),        # (Cin, P)
        w2=jnp.transpose(w2_t, (2, 3, 1, 0)),              # (3, 3, Pin, Pout) HWIO
        w3=jnp.transpose(w3_t[:, :, 0, 0], (1, 0)),        # (P, Cout)
        s1=s1, b1=b1, s2=s2, b2=b2, s3=s3, b3=b3,
    )


def prepare_kernel_params(params):
    """Fold BN scales into conv weights, pad channels to 128, cast to bf16."""
    cin, p = params["w1"].shape
    cout = params["w3"].shape[1]
    assert cin == cout, "downsample=None path requires inplanes == planes*expansion"
    cpad = max(_round_up(cin, LANE), LANE)
    ppad = max(_round_up(p, LANE), LANE)

    w1 = params["w1"] * params["s1"][None, :]                    # (Cin, P)
    w2 = params["w2"] * params["s2"][None, None, None, :]        # (3,3,P,P)
    w3 = params["w3"] * params["s3"][None, :]                    # (P, Cout)

    w1p = jnp.zeros((cpad, ppad), jnp.float32).at[:cin, :p].set(w1)
    w2p = jnp.zeros((3, 3, ppad, ppad), jnp.float32).at[:, :, :p, :p].set(w2)
    w3p = jnp.zeros((ppad, cpad), jnp.float32).at[:p, :cout].set(w3)

    b1p = jnp.zeros((1, ppad), jnp.float32).at[0, :p].set(params["b1"])
    b2p = jnp.zeros((1, ppad), jnp.float32).at[0, :p].set(params["b2"])
    b3p = jnp.zeros((1, cpad), jnp.float32).at[0, :cout].set(params["b3"])

    return dict(
        w1=w1p.astype(jnp.bfloat16),
        w2=w2p.reshape(9 * ppad, ppad).astype(jnp.bfloat16),     # (9P, P), (ky,kx,cin) major
        w3=w3p.astype(jnp.bfloat16),
        b1=b1p, b2=b2p, b3=b3p,
        cout=cout,
    )


# ---------------------------------------------------------------------------
# Pure-JAX references
# ---------------------------------------------------------------------------
def reference_forward(x_nchw, params):
    """Pure-JAX f32 reference for the Bottleneck block."""
    x = jnp.transpose(x_nchw, (0, 2, 3, 1))
    dn = ("NHWC", "HWIO", "NHWC")
    w1 = params["w1"][None, None]                          # (1,1,Cin,P)
    w2 = params["w2"]                                      # (3,3,P,P)
    w3 = params["w3"][None, None]                          # (1,1,P,Cout)

    def conv(y, w):
        return lax.conv_general_dilated(y, w, (1, 1), "SAME", dimension_numbers=dn)

    o = jnp.maximum(conv(x, w1) * params["s1"] + params["b1"], 0.0)
    o = jnp.maximum(conv(o, w2) * params["s2"] + params["b2"], 0.0)
    o = conv(o, w3) * params["s3"] + params["b3"]
    o = jnp.maximum(o + x, 0.0)
    return jnp.transpose(o, (0, 3, 1, 2))


def reference_head(feats, w_fc, b_fc):
    logits = feats @ w_fc + b_fc
    return logits, jax.nn.softmax(logits, axis=-1)


if __name__ == "__main__":
    key = jax.random.PRNGKey(0)
    kx, kp, kf, kw, kb = jax.random.split(key, 5)

    # --- Bottleneck block -----------------------------------------------------
    # inplanes == planes * expansion -> downsample=None, stride=1 (module defaults)
    inplanes, planes = 16, 4
    N, H, W = 2, 16, 16

    x = jax.random.normal(kx, (N, inplanes, H, W), jnp.float32)
    params = init_params(kp, inplanes, planes)
    kparams = prepare_kernel_params(params)

    out = jax.block_until_ready(bottleneck_forward(x, kparams))
    ref = reference_forward(x, params)
    # bf16 MXU inputs -> loosened tolerance vs. the f32 reference.
    np.testing.assert_allclose(np.asarray(out), np.asarray(ref), rtol=2e-2, atol=2e-2)

    # --- Classifier head (fc + softmax) ----------------------------------------
    # TODO(synk): AvgPool2d(7, stride=1, padding=2) + flatten that would feed this
    # fc is not implemented as a Pallas kernel; synthetic pooled features are used.
    num_classes, feat = 10, 512
    feats = jax.random.normal(kf, (N, feat), jnp.float32)
    w_fc = jax.random.normal(kw, (feat, num_classes), jnp.float32) * 0.05
    b_fc = jax.random.normal(kb, (num_classes,), jnp.float32) * 0.1

    logits, probas = head_forward(feats, w_fc, b_fc)
    jax.block_until_ready(probas)
    ref_logits, ref_probas = reference_head(feats, w_fc, b_fc)
    np.testing.assert_allclose(np.asarray(logits), np.asarray(ref_logits),
                               rtol=2e-2, atol=2e-2)
    np.testing.assert_allclose(np.asarray(probas), np.asarray(ref_probas),
                               rtol=2e-2, atol=2e-2)

    print("KERNEL_OK")
</pallas_src>

<mosaic_0001>
module attributes {stable_mosaic.version = 11 : i64} {
  func.func @bottleneck_kernel(%arg0: i32, %arg1: memref<1x256x128xf32, #tpu.memory_space<vmem>>, %arg2: memref<128x128xbf16, #tpu.memory_space<vmem>>, %arg3: memref<1152x128xbf16, #tpu.memory_space<vmem>>, %arg4: memref<128x128xbf16, #tpu.memory_space<vmem>>, %arg5: memref<1x128xf32, #tpu.memory_space<vmem>>, %arg6: memref<1x128xf32, #tpu.memory_space<vmem>>, %arg7: memref<1x128xf32, #tpu.memory_space<vmem>>, %arg8: memref<1x256x128xf32, #tpu.memory_space<vmem>>, %arg9: memref<18x18x128xf32, #tpu.memory_space<vmem>>) attributes {dimension_semantics = [#tpu.dimension_semantics<parallel>], iteration_bounds = array<i64: 2>, scalar_prefetch = 0 : i64, scratch_operands = 1 : i64, tpu.core_type = #tpu.core_type<tc>, window_params = [{transform_indices = @transform_0, window_bounds = array<i64: 1, 256, 128>}, {pipeline_mode = #tpu.pipeline_mode<synchronous>, transform_indices = @transform_1, window_bounds = array<i64: 128, 128>}, {pipeline_mode = #tpu.pipeline_mode<synchronous>, transform_indices = @transform_2, window_bounds = array<i64: 1152, 128>}, {pipeline_mode = #tpu.pipeline_mode<synchronous>, transform_indices = @transform_3, window_bounds = array<i64: 128, 128>}, {pipeline_mode = #tpu.pipeline_mode<synchronous>, transform_indices = @transform_4, window_bounds = array<i64: 1, 128>}, {pipeline_mode = #tpu.pipeline_mode<synchronous>, transform_indices = @transform_5, window_bounds = array<i64: 1, 128>}, {pipeline_mode = #tpu.pipeline_mode<synchronous>, transform_indices = @transform_6, window_bounds = array<i64: 1, 128>}, {transform_indices = @transform_7, window_bounds = array<i64: 1, 256, 128>}]} {
    %c0 = arith.constant 0 : index
    %c0_0 = arith.constant 0 : index
    %c0_1 = arith.constant 0 : index
    %0 = vector.load %arg1[%c0, %c0_0, %c0_1] : memref<1x256x128xf32, #tpu.memory_space<vmem>>, vector<1x256x128xf32>
    %1 = vector.shape_cast %0 : vector<1x256x128xf32> to vector<256x128xf32>
    %2 = arith.truncf %1 : vector<256x128xf32> to vector<256x128xbf16>
    %c0_2 = arith.constant 0 : index
    %c0_3 = arith.constant 0 : index
    %3 = vector.load %arg2[%c0_2, %c0_3] : memref<128x128xbf16, #tpu.memory_space<vmem>>, vector<128x128xbf16>
    %cst = arith.constant dense<0.000000e+00> : vector<256x128xf32>
    %4 = tpu.matmul %2, %3, %cst {dimension_numbers = #tpu.dot_dimension_numbers<[1], [0], [0], [1], [0, 0, 1, 1], [], []>} : vector<256x128xbf16>, vector<128x128xbf16>, vector<256x128xf32> -> vector<256x128xf32>
    %c0_4 = arith.constant 0 : index
    %c0_5 = arith.constant 0 : index
    %5 = vector.load %arg5[%c0_4, %c0_5] : memref<1x128xf32, #tpu.memory_space<vmem>>, vector<1x128xf32>
    %6 = vector.broadcast %5 : vector<1x128xf32> to vector<256x128xf32>
    %7 = arith.addf %4, %6 : vector<256x128xf32>
    %cst_6 = arith.constant 0.000000e+00 : f32
    %8 = vector.broadcast %cst_6 : f32 to vector<256x128xf32>
    %9 = arith.maximumf %7, %8 : vector<256x128xf32>
    %cst_7 = arith.constant 0.000000e+00 : f32
    %10 = vector.broadcast %cst_7 : f32 to vector<1x18x128xf32>
    %c0_8 = arith.constant 0 : index
    %c0_9 = arith.constant 0 : index
    %c0_10 = arith.constant 0 : index
    %11 = vector.load %arg9[%c0_8, %c0_9, %c0_10] : memref<18x18x128xf32, #tpu.memory_space<vmem>>, vector<1x18x128xf32>
    tpu.vector_store %arg9[%c0_8, %c0_9, %c0_10], %10 {strides = array<i32>} : memref<18x18x128xf32, #tpu.memory_space<vmem>>, vector<1x18x128xf32>,
    %cst_11 = arith.constant 0.000000e+00 : f32
    %12 = vector.broadcast %cst_11 : f32 to vector<1x18x128xf32>
    %c17 = arith.constant 17 : index
    %c0_12 = arith.constant 0 : index
    %c0_13 = arith.constant 0 : index
    %13 = vector.load %arg9[%c17, %c0_12, %c0_13] : memref<18x18x128xf32, #tpu.memory_space<vmem>>, vector<1x18x128xf32>
    tpu.vector_store %arg9[%c17, %c0_12, %c0_13], %12 {strides = array<i32>} : memref<18x18x128xf32, #tpu.memory_space<vmem>>, vector<1x18x128xf32>,
    %cst_14 = arith.constant 0.000000e+00 : f32
    %14 = vector.broadcast %cst_14 : f32 to vector<18x1x128xf32>
    %c0_15 = arith.constant 0 : index
    %c0_16 = arith.constant 0 : index
    %c0_17 = arith.constant 0 : index
    %15 = vector.load %arg9[%c0_15, %c0_16, %c0_17] : memref<18x18x128xf32, #tpu.memory_space<vmem>>, vector<18x1x128xf32>
    tpu.vector_store %arg9[%c0_15, %c0_16, %c0_17], %14 {strides = array<i32>} : memref<18x18x128xf32, #tpu.memory_space<vmem>>, vector<18x1x128xf32>,
    %cst_18 = arith.constant 0.000000e+00 : f32
    %16 = vector.broadcast %cst_18 : f32 to vector<18x1x128xf32>
    %c0_19 = arith.constant 0 : index
    %c17_20 = arith.constant 17 : index
    %c0_21 = arith.constant 0 : index
    %17 = vector.load %arg9[%c0_19, %c17_20, %c0_21] : memref<18x18x128xf32, #tpu.memory_space<vmem>>, vector<18x1x128xf32>
    tpu.vector_store %arg9[%c0_19, %c17_20, %c0_21], %16 {strides = array<i32>} : memref<18x18x128xf32, #tpu.memory_space<vmem>>, vector<18x1x128xf32>,
    %18 = vector.shape_cast %9 : vector<256x128xf32> to vector<16x16x128xf32>
    %c1 = arith.constant 1 : index
    %c1_22 = arith.constant 1 : index
    %c0_23 = arith.constant 0 : index
    %19 = vector.load %arg9[%c1, %c1_22, %c0_23] : memref<18x18x128xf32, #tpu.memory_space<vmem>>, vector<16x16x128xf32>
    tpu.vector_store %arg9[%c1, %c1_22, %c0_23], %18 {strides = array<i32>} : memref<18x18x128xf32, #tpu.memory_space<vmem>>, vector<16x16x128xf32>,
    %c0_24 = arith.constant 0 : index
    %c0_25 = arith.constant 0 : index
    %c0_26 = arith.constant 0 : index
    %20 = vector.load %arg9[%c0_24, %c0_25, %c0_26] : memref<18x18x128xf32, #tpu.memory_space<vmem>>, vector<16x16x128xf32>
    %21 = arith.truncf %20 : vector<16x16x128xf32> to vector<16x16x128xbf16>
    %c0_27 = arith.constant 0 : index
    %c1_28 = arith.constant 1 : index
    %c0_29 = arith.constant 0 : index
    %22 = vector.load %arg9[%c0_27, %c1_28, %c0_29] : memref<18x18x128xf32, #tpu.memory_space<vmem>>, vector<16x16x128xf32>
    %23 = arith.truncf %22 : vector<16x16x128xf32> to vector<16x16x128xbf16>
    %c0_30 = arith.constant 0 : index
    %c2 = arith.constant 2 : index
    %c0_31 = arith.constant 0 : index
    %24 = vector.load %arg9[%c0_30, %c2, %c0_31] : memref<18x18x128xf32, #tpu.memory_space<vmem>>, vector<16x16x128xf32>
    %25 = arith.truncf %24 : vector<16x16x128xf32> to vector<16x16x128xbf16>
    %c1_32 = arith.constant 1 : index
    %c0_33 = arith.constant 0 : index
    %c0_34 = arith.constant 0 : index
    %26 = vector.load %arg9[%c1_32, %c0_33, %c0_34] : memref<18x18x128xf32, #tpu.memory_space<vmem>>, vector<16x16x128xf32>
    %27 = arith.truncf %26 : vector<16x16x128xf32> to vector<16x16x128xbf16>
    %c1_35 = arith.constant 1 : index
    %c1_36 = arith.constant 1 : index
    %c0_37 = arith.constant 0 : index
    %28 = vector.load %arg9[%c1_35, %c1_36, %c0_37] : memref<18x18x128xf32, #tpu.memory_space<vmem>>, vector<16x16x128xf32>
    %29 = arith.truncf %28 : vector<16x16x128xf32> to vector<16x16x128xbf16>
    %c1_38 = arith.constant 1 : index
    %c2_39 = arith.constant 2 : index
    %c0_40 = arith.constant 0 : index
    %30 = vector.load %arg9[%c1_38, %c2_39, %c0_40] : memref<18x18x128xf32, #tpu.memory_space<vmem>>, vector<16x16x128xf32>
    %31 = arith.truncf %30 : vector<16x16x128xf32> to vector<16x16x128xbf16>
    %c2_41 = arith.constant 2 : index
    %c0_42 = arith.constant 0 : index
    %c0_43 = arith.constant 0 : index
    %32 = vector.load %arg9[%c2_41, %c0_42, %c0_43] : memref<18x18x128xf32, #tpu.memory_space<vmem>>, vector<16x16x128xf32>
    %33 = arith.truncf %32 : vector<16x16x128xf32> to vector<16x16x128xbf16>
    %c2_44 = arith.constant 2 : index
    %c1_45 = arith.constant 1 : index
    %c0_46 = arith.constant 0 : index
    %34 = vector.load %arg9[%c2_44, %c1_45, %c0_46] : memref<18x18x128xf32, #tpu.memory_space<vmem>>, vector<16x16x128xf32>
    %35 = arith.truncf %34 : vector<16x16x128xf32> to vector<16x16x128xbf16>
    %c2_47 = arith.constant 2 : index
    %c2_48 = arith.constant 2 : index
    %c0_49 = arith.constant 0 : index
    %36 = vector.load %arg9[%c2_47, %c2_48, %c0_49] : memref<18x18x128xf32, #tpu.memory_space<vmem>>, vector<16x16x128xf32>
    %37 = arith.truncf %36 : vector<16x16x128xf32> to vector<16x16x128xbf16>
    %38 = tpu.concatenate %21, %23, %25, %27, %29, %31, %33, %35, %37 in 2 : vector<16x16x128xbf16>, vector<16x16x128xbf16>, vector<16x16x128xbf16>, vector<16x16x128xbf16>, vector<16x16x128xbf16>, vector<16x16x128xbf16>, vector<16x16x128xbf16>, vector<16x16x128xbf16>, vector<16x16x128xbf16> -> vector<16x16x1152xbf16>
    %39 = vector.shape_cast %38 : vector<16x16x1152xbf16> to vector<256x1152xbf16>
    %c0_50 = arith.constant 0 : index
    %c0_51 = arith.constant 0 : index
    %40 = vector.load %arg3[%c0_50, %c0_51] : memref<1152x128xbf16, #tpu.memory_space<vmem>>, vector<1152x128xbf16>
    %cst_52 = arith.constant dense<0.000000e+00> : vector<256x128xf32>
    %41 = tpu.matmul %39, %40, %cst_52 {dimension_numbers = #tpu.dot_dimension_numbers<[1], [0], [0], [1], [0, 0, 1, 1], [], []>} : vector<256x1152xbf16>, vector<1152x128xbf16>, vector<256x128xf32> -> vector<256x128xf32>
    %c0_53 = arith.constant 0 : index
    %c0_54 = arith.constant 0 : index
    %42 = vector.load %arg6[%c0_53, %c0_54] : memref<1x128xf32, #tpu.memory_space<vmem>>, vector<1x128xf32>
    %43 = vector.broadcast %42 : vector<1x128xf32> to vector<256x128xf32>
    %44 = arith.addf %41, %43 : vector<256x128xf32>
    %cst_55 = arith.constant 0.000000e+00 : f32
    %45 = vector.broadcast %cst_55 : f32 to vector<256x128xf32>
    %46 = arith.maximumf %44, %45 : vector<256x128xf32>
    %47 = arith.truncf %46 : vector<256x128xf32> to vector<256x128xbf16>
    %c0_56 = arith.constant 0 : index
    %c0_57 = arith.constant 0 : index
    %48 = vector.load %arg4[%c0_56, %c0_57] : memref<128x128xbf16, #tpu.memory_space<vmem>>, vector<128x128xbf16>
    %cst_58 = arith.constant dense<0.000000e+00> : vector<256x128xf32>
    %49 = tpu.matmul %47, %48, %cst_58 {dimension_numbers = #tpu.dot_dimension_numbers<[1], [0], [0], [1], [0, 0, 1, 1], [], []>} : vector<256x128xbf16>, vector<128x128xbf16>, vector<256x128xf32> -> vector<256x128xf32>
    %c0_59 = arith.constant 0 : index
    %c0_60 = arith.constant 0 : index
    %50 = vector.load %arg7[%c0_59, %c0_60] : memref<1x128xf32, #tpu.memory_space<vmem>>, vector<1x128xf32>
    %51 = vector.broadcast %50 : vector<1x128xf32> to vector<256x128xf32>
    %52 = arith.addf %49, %51 : vector<256x128xf32>
    %53 = arith.addf %52, %1 : vector<256x128xf32>
    %cst_61 = arith.constant 0.000000e+00 : f32
    %54 = vector.broadcast %cst_61 : f32 to vector<256x128xf32>
    %55 = arith.maximumf %53, %54 : vector<256x128xf32>
    %c0_62 = arith.constant 0 : index
    %c0_63 = arith.constant 0 : index
    %c0_64 = arith.constant 0 : index
    %56 = vector.load %arg8[%c0_62, %c0_63, %c0_64] : memref<1x256x128xf32, #tpu.memory_space<vmem>>, vector<1x256x128xf32>
    %57 = vector.shape_cast %56 : vector<1x256x128xf32> to vector<256x128xf32>
    %58 = vector.shape_cast %55 : vector<256x128xf32> to vector<1x256x128xf32>
    tpu.vector_store %arg8[%c0_62, %c0_63, %c0_64], %58 {strides = array<i32>} : memref<1x256x128xf32, #tpu.memory_space<vmem>>, vector<1x256x128xf32>,
    return
  }
  func.func @transform_0(%arg0: i32) -> (i32, i32, i32) {
    %c0_i32 = arith.constant 0 : i32
    %c0_i32_0 = arith.constant 0 : i32
    %c0_i32_1 = arith.constant 0 : i32
    return %arg0, %c0_i32, %c0_i32_0 : i32, i32, i32
  }
  func.func @transform_1(%arg0: i32) -> (i32, i32) {
    %c0_i32 = arith.constant 0 : i32
    %c0_i32_0 = arith.constant 0 : i32
    %c0_i32_1 = arith.constant 0 : i32
    return %c0_i32, %c0_i32_0 : i32, i32
  }
  func.func @transform_2(%arg0: i32) -> (i32, i32) {
    %c0_i32 = arith.constant 0 : i32
    %c0_i32_0 = arith.constant 0 : i32
    %c0_i32_1 = arith.constant 0 : i32
    return %c0_i32, %c0_i32_0 : i32, i32
  }
  func.func @transform_3(%arg0: i32) -> (i32, i32) {
    %c0_i32 = arith.constant 0 : i32
    %c0_i32_0 = arith.constant 0 : i32
    %c0_i32_1 = arith.constant 0 : i32
    return %c0_i32, %c0_i32_0 : i32, i32
  }
  func.func @transform_4(%arg0: i32) -> (i32, i32) {
    %c0_i32 = arith.constant 0 : i32
    %c0_i32_0 = arith.constant 0 : i32
    %c0_i32_1 = arith.constant 0 : i32
    return %c0_i32, %c0_i32_0 : i32, i32
  }
  func.func @transform_5(%arg0: i32) -> (i32, i32) {
    %c0_i32 = arith.constant 0 : i32
    %c0_i32_0 = arith.constant 0 : i32
    %c0_i32_1 = arith.constant 0 : i32
    return %c0_i32, %c0_i32_0 : i32, i32
  }
  func.func @transform_6(%arg0: i32) -> (i32, i32) {
    %c0_i32 = arith.constant 0 : i32
    %c0_i32_0 = arith.constant 0 : i32
    %c0_i32_1 = arith.constant 0 : i32
    return %c0_i32, %c0_i32_0 : i32, i32
  }
  func.func @transform_7(%arg0: i32) -> (i32, i32, i32) {
    %c0_i32 = arith.constant 0 : i32
    %c0_i32_0 = arith.constant 0 : i32
    %c0_i32_1 = arith.constant 0 : i32
    return %arg0, %c0_i32, %c0_i32_0 : i32, i32, i32
  }
}

</mosaic_0001>

<bundles_post_ra>
// kernel: tpu_custom_call.1
= control target key start
LH: loop header
LB: loop body
LE: loop exit
PB: predicated region body
PF: predicated region fallthrough
CT: control target
= control target key end

     0   :  { %12 = vsyncpa [#allocation4], 0  ;;  %s5184_s0 = inlined_call_operand.hbm [shape: f32[2,256,128], index: 0, kind: input, shape index: {}]   ;;  %s5185_s1 = inlined_call_operand.hbm [shape: bf16[128,128], index: 1, kind: input, shape index: {}]   ;;  %s5186_s2 = inlined_call_operand.hbm [shape: bf16[1152,128], index: 2, kind: input, shape index: {}]   ;;  %s5187_s3 = inlined_call_operand.hbm [shape: bf16[128,128], index: 3, kind: input, shape index: {}]   ;;  %s5188_s4 = inlined_call_operand.vmem [shape: f32[1,128], index: 4, kind: input, shape index: {}]   ;;  %s5189_s5 = inlined_call_operand.vmem [shape: f32[1,128], index: 5, kind: input, shape index: {}]   ;;  %s5190_s6 = inlined_call_operand.vmem [shape: f32[1,128], index: 6, kind: input, shape index: {}]   ;;  %s5191_s7 = inlined_call_operand.hbm [shape: f32[2,256,128], index: 7, kind: output, shape index: {}]  }
   0x1   :  { %14 = vsyncpa [#allocation4 + $0x1], 0 }
   0x2   :  { %15 = vsyncpa [#allocation7], 0 }
   0x3   :  { %16 = vsyncpa [#allocation10], 0 }
   0x4   :  { %17 = vsyncpa [#allocation5], 0 }
   0x5   :  { %19 = vsyncpa [#allocation5 + $0x1], 0  ;;  %s4283_s24 = smov 0   ;;  %s4285_s25 = smov 0  }
   0x6   :  { %s4287_s26 = smov 0   ;;  %s4289_s27 = smov 0  }
   0x7 LB: > { %s4304_s28 = sadd.s32 4294967295, %s4229_s27   ;;  %s3043_s29 = sadd.s32 4294967294, %s4229_s27   ;;  %s4229_s27 = sphi %s4289_s27, %s5217_s27   ;;  %s4225_s26 = sphi %s4287_s26, %s5216_s26   ;;  %s4221_s25 = sphi %s4285_s25, %s5215_s25   ;;  %s4217_s24 = sphi %s4283_s24, %s5214_s24  }
   0x8   : > { %p45_p0 = scmp.ne.s32.totalorder %s4221_s25, %s4217_s24  ;;  %p5192_p1 = scmp.eq.s32.totalorder %s4304_s28, 0 }
   0x9   : > { %p201_p3 = scmp.eq.s32.totalorder %s3043_s29, 1  ;;  %p3044_p5 = scmp.ge.s32.totalorder %s4229_s27, 1 }
   0xa   : > { %p4313_p4 = por %p5192_p1, %p45_p0  ;;  %p208_p7 = scmp.lt.s32.totalorder %s4229_s27, 3 }
   0xb   : > { %p4318_p6 = por %p201_p3, %p45_p0  ;;  %s4231_s10 = smov [#allocation6]  }
   0xc   : > { %s5196_s30 = scalar_select %p4313_p4, 1, 0 }
   0xd   : > { %s5197_s8 = scalar_select %p4318_p6, 1, 0 }
   0xe   : > { %p4323_p8 = pnand %p3044_p5, %p208_p7  ;;  %s220_s11 = sshll.u32 %s4231_s10, 4  ;;  %s4327_s11 = int_to_ptr.vmem [resolvable:$true] %s220_s11 }
   0xf   : > { %5198 = sst [smem:[#allocation16_spill]] %s5197_s8  ;;  %s4232_s13 = smov [#allocation8]  }
  0x10   : > { %s5199_s9 = scalar_select %p4323_p8, 1, 0 }
  0x11   : > { %p3852_p9 = pneg %p4323_p8  ;;  %s233_s14 = sshll.u32 %s4232_s13, 4  ;;  %s4338_s14 = int_to_ptr.vmem [resolvable:$true] %s233_s14 }
  0x12   : > { %s4233_s15 = smov [#allocation9]   ;;  %s4041_s19 = scalar_lea.hbm %s5185_s1, 1024 }
  0x13   : > { %p4334_p11 = pnand %p3852_p9, %p5192_p1  ;;  %s4340_s16 = sshll.u32 %s4233_s15, 4  ;;  %s247_s16 = int_to_ptr.vmem [resolvable:$true] %s4340_s16 }
  0x14   : > { %p4042_p12 = scmp.ne.s32.totalorder %s5185_s1, %s4041_s19  ;;  %p4048_p5 = scmp.lt.u32.totalorder %s4041_s19, %s5185_s1 }
  0x15   : > { %p4350_p13 = pneg %p4334_p11 }
  0x17   : > { %p4044_p0 = pnand %p4350_p13, %p4042_p12 }
  0x19   : > { %p4045_p3 = pneg %p4044_p0 }
  0x1b   : > { %p4050_p7 = pnand %p4048_p5, %p4045_p3 }
  0x1d   : > { %4053 = shalt.err (!%p4050_p7)
}
  0x1e   : > { %s4054_s10 = scalar_lea.vmem %s4327_s11, 1024  ;;  %p4062_p2 = scmp.lt.s32.totalorder %s4327_s11, %s4327_s11 }
  0x1f   : > { %p4055_p9 = scmp.ne.s32.totalorder %s4327_s11, %s4054_s10  ;;  %p4063_p6 = scmp.lt.s32.totalorder %s4054_s10, %s4054_s10 }
  0x21   : > { %p4057_p10 = pnand %p4055_p9, %p4350_p13  ;;  %p4064_p12 = por %p4063_p6, %p4062_p2 }
  0x23   : > { %p4058_p1 = pneg %p4057_p10 }
  0x25   : > { %p4065_p0 = pnand %p4064_p12, %p4058_p1 }
  0x27   : > { %4068 = shalt.err (!%p4065_p0)
}
  0x28   : > { %s4234_s13 = smov 64   ;;  %s4235_s15 = smov 4  }
  0x29   : > { %3855 = dma.hbm_to_vmem [thread:$0]  (!%p4334_p11), %s5185_s1, 1024, %s4327_s11, [#allocation7], %s4234_s13, %s4234_s13, %s4235_s15  }
  0x2a   : > { %s4069_s21 = scalar_lea.hbm %s5186_s2, 9216 }
  0x2b   : > { %p4070_p1 = scmp.ne.s32.totalorder %s5186_s2, %s4069_s21  ;;  %p4076_p10 = scmp.lt.u32.totalorder %s4069_s21, %s5186_s2 }
  0x2d   : > { %p4072_p2 = pnand %p4070_p1, %p4350_p13 }
  0x2f   : > { %p4073_p6 = pneg %p4072_p2 }
  0x31   : > { %p4078_p3 = pnand %p4076_p10, %p4073_p6 }
  0x33   : > { %4081 = shalt.err (!%p4078_p3)
}
  0x34   : > { %s4082_s11 = scalar_lea.vmem %s4338_s14, 9216  ;;  %p4090_p12 = scmp.lt.s32.totalorder %s4338_s14, %s4338_s14 }
  0x35   : > { %p4083_p5 = scmp.ne.s32.totalorder %s4338_s14, %s4082_s11  ;;  %p4091_p0 = scmp.lt.s32.totalorder %s4082_s11, %s4082_s11 }
  0x37   : > { %p4085_p7 = pnand %p4083_p5, %p4350_p13  ;;  %p4092_p1 = por %p4091_p0, %p4090_p12 }
  0x39   : > { %p4086_p9 = pneg %p4085_p7 }
  0x3b   : > { %p4093_p2 = pnand %p4092_p1, %p4086_p9 }
  0x3d   : > { %4096 = shalt.err (!%p4093_p2)
}
  0x3e   : > { %3858 = dma.hbm_to_vmem [thread:$0]  (!%p4334_p11), %s5186_s2, 9216, %s4338_s14, [#allocation7], %s4234_s13, %s4234_s13, %s4235_s15  }
  0x3f   : > { %s4097_s20 = scalar_lea.hbm %s5187_s3, 1024 }
  0x40   : > { %p4098_p6 = scmp.ne.s32.totalorder %s5187_s3, %s4097_s20  ;;  %p4104_p5 = scmp.lt.u32.totalorder %s4097_s20, %s5187_s3 }
  0x42   : > { %p4100_p10 = pnand %p4098_p6, %p4350_p13 }
  0x44   : > { %p4101_p3 = pneg %p4100_p10 }
  0x46   : > { %p4106_p7 = pnand %p4104_p5, %p4101_p3 }
  0x48   : > { %4109 = shalt.err (!%p4106_p7)
}
  0x49   : > { %s4110_s11 = scalar_lea.vmem %s247_s16, 1024  ;;  %p4118_p1 = scmp.lt.s32.totalorder %s247_s16, %s247_s16 }
  0x4a   : > { %p4111_p9 = scmp.ne.s32.totalorder %s247_s16, %s4110_s11  ;;  %p4119_p2 = scmp.lt.s32.totalorder %s4110_s11, %s4110_s11 }
  0x4c   : > { %p4113_p12 = pnand %p4111_p9, %p4350_p13  ;;  %p4120_p4 = por %p4119_p2, %p4118_p1 }
  0x4e   : > { %p4114_p0 = pneg %p4113_p12 }
  0x50   : > { %p4121_p8 = pnand %p4120_p4, %p4114_p0 }
  0x52   : > { %4124 = shalt.err (!%p4121_p8)
}
  0x53   : > { %3861 = dma.hbm_to_vmem [thread:$0]  (!%p4334_p11), %s5187_s3, 1024, %s247_s16, [#allocation10], %s4234_s13, %s4234_s13, %s4235_s15  }
  0x54   : > { %s4423_s22 = sadd.s32 1, %s4229_s27   ;;  %s32_s17 = sadd.s32 1, %s4225_s26 }
  0x55   : > { %s29_s12 = ssub.s32 %s4229_s27, %s4423_s22  ;;  %p39_p8 = scmp.ne.s32.totalorder %s4225_s26, %s4221_s25 }
  0x56   : > { %p30_p4 = scmp.eq.s32.totalorder %s29_s12, 0  ;;  %p40_p13 = scmp.eq.s32.totalorder %s4229_s27, 0 }
  0x57   : > { %p3873_p6 = scmp.lt.s32.totalorder %s4229_s27, 2  ;;  %p5202_p3 = scmp.eq.s32.totalorder %s4304_s28, 1 }
  0x58   : > { %s4433_s18 = scalar_select %p30_p4, %s4225_s26, %s32_s17  }
  0x59   : > { %p41_p10 = por %p40_p13, %p39_p8  ;;  %p4437_p5 = por %p5202_p3, %p39_p8 }
  0x5a   : > { %s269_s20 = sand.u32 1, %s4225_s26   ;;  %s3154_s21 = sshll.u32 %s4229_s27, 12 }
  0x5b   : > { %s3049_s16 = sshll.u32 %s269_s20, 8  ;;  %s4446_s23 = scalar_lea.hbm %s5184_s0, %s3154_s21 }
  0x5c   : > { %s273_s29 = scalar_lea.vmem [#allocation3], %s3049_s16  ;;  %p4448_p11 = pnand %p3873_p6, %p41_p10 }
  0x5d   : > { %s280_s10 = sshll.u32 %s273_s29, 4  ;;  %s4454_s14 = scalar_lea.sflag [#allocation4], %s269_s20  ;;  %s4452_s10 = int_to_ptr.vmem [resolvable:$true] %s280_s10 }
  0x5e   : > { %s4125_s8 = scalar_lea.hbm %s4446_s23, 4096  ;;  %p4127_p9 = pneg %p4448_p11 }
  0x5f   : > { %p4126_p7 = scmp.ne.s32.totalorder %s4446_s23, %s4125_s8  ;;  %s4130_s21 = scalar_lea.hbm %s5184_s0, 8192 }
  0x60   : > { %p4131_p1 = scmp.lt.u32.totalorder %s4446_s23, %s5184_s0  ;;  %p4132_p2 = scmp.lt.u32.totalorder %s4130_s21, %s4125_s8 }
  0x61   : > { %p4128_p12 = pnand %p4127_p9, %p4126_p7  ;;  %p4134_p8 = scmp.lt.u32.totalorder %s4125_s8, %s4446_s23 }
  0x62   : > { %p4133_p4 = por %p4132_p2, %p4131_p1 }
  0x63   : > { %p4129_p0 = pneg %p4128_p12 }
  0x64   : > { %p4135_p13 = por %p4134_p8, %p4133_p4 }
  0x66   : > { %p4136_p6 = pnand %p4135_p13, %p4129_p0 }
  0x68   : > { %4139 = shalt.err (!%p4136_p6)
}
  0x69   : > { %s4140_s20 = scalar_lea.vmem %s4452_s10, 4096  ;;  %s4236_s15 = smov [#allocation3]  }
  0x6a   : > { %p4141_p10 = scmp.ne.s32.totalorder %s4452_s10, %s4140_s20  ;;  %s4145_s29 = sshll.u32 %s4236_s15, 4  ;;  %s4146_s29 = int_to_ptr.vmem [resolvable:$false] %s4145_s29 }
  0x6b   : > { %s4147_s12 = scalar_lea.vmem %s4146_s29, 8192  ;;  %p4148_p12 = scmp.lt.s32.totalorder %s4452_s10, %s4146_s29 }
  0x6c   : > { %p4143_p3 = pnand %p4141_p10, %p4127_p9  ;;  %p4149_p1 = scmp.lt.s32.totalorder %s4147_s12, %s4140_s20 }
  0x6e   : > { %p4144_p7 = pneg %p4143_p3  ;;  %p4150_p2 = por %p4149_p1, %p4148_p12 }
  0x70   : > { %p4151_p4 = pnand %p4150_p2, %p4144_p7 }
  0x72   : > { %4154 = shalt.err (!%p4151_p4)
}
  0x73   : > { %s4237_s8 = smov 128   ;;  %s4238_s17 = smov 8  }
  0x74   : > { %3865 = dma.hbm_to_vmem [thread:$0]  (!%p4448_p11), %s4446_s23, 4096, %s4452_s10, %s4454_s14, %s4237_s8, %s4237_s8, %s4238_s17  }
  0x75   : > { %p5205_p9 = scmp.ne.s32.totalorder %s5199_s9, 0 }
  0x76   : > { %s4485_s21 = sand.u32 (!%p5205_p9), 1, %s4221_s25   ;;  %p5206_p0 = scmp.ne.s32.totalorder (!%p5205_p9), %s5196_s30, 0 }
  0x77   : > { %292 = sbr.rel (%p5205_p9) target bundleno = 1158 (0x486), region = 48  ;;  %s3053_s16 = sshll.u32 (!%p5205_p9), %s4485_s21, 8 }
  0x78   : > { %s295_s13 = scalar_lea.sflag (!%p5205_p9), [#allocation4], %s4485_s21  ;;  %s4491_s20 = scalar_lea.vmem (!%p5205_p9), [#allocation3], %s3053_s16 }
  0x7e   : > { %4200 = dma.done.wait (%p5206_p0), %s295_s13, 4096  }
  0x7f   : > { %4202 = vsyncadd (%p5206_p0), %s295_s13, 4294963200  ;;  %p5207_p11 = scmp.eq.s32.totalorder %s4304_s28, 0 }
  0x81   : > { %4204 = dma.done.wait (%p5207_p11), [#allocation7], 10240   ;;  %p5208_p8 = pmov %p5207_p11 }
  0x83   : > { %4206 = vsyncadd (%p5208_p8), [#allocation7], 4294957056  ;;  %p5209_p13 = pmov %p5208_p8 }
  0x84   : > { %p5210_p6 = pmov %p5208_p8 }
  0x85   : > { %4208 = dma.done.wait (%p5209_p13), [#allocation10], 1024  }
  0x86   : > { %4210 = vsyncadd (%p5210_p6), [#allocation10], 4294966272  ;;  %v3920_v0 = vld [vmem:[#allocation6] sm:$0xff]   ;;  %v3921_v1 = vld [vmem:[#allocation6 + $0x8] sm:$0xff]   ;;  %s5043_s15 = scalar_lea.vmem [#allocation11], %s3053_s16  ;;  %s3155_s29 = sshll.u32 %s4304_s28, 12 }
  0x87   : > { %3676 = vmatprep.subr.bf16.mxu0 %v3920_v0  ;;  %3820 = vmatprep.subr.bf16.mxu1 %v3920_v0  ;;  %v3922_v2 = vld [vmem:[#allocation6 + $0x10] sm:$0xff]   ;;  %v3923_v3 = vld [vmem:[#allocation6 + $0x18] sm:$0xff]   ;;  %v342_v4 = vld [vmem:[%s4491_s20] sm:$0xff]  ;;  %s2941_s12 = sshll.u32 %s5043_s15, 4  ;;  %s5135_s16 = scalar_lea.hbm %s5191_s7, %s3155_s29  ;;  %s5137_s12 = int_to_ptr.vmem [resolvable:$true] %s2941_s12 }
  0x88   : > { %3677 = vmatpush3.bf16.msra.mxu0 %v3920_v0  ;;  %3828 = vmatpush3.bf16.msra.mxu1 %v3920_v0  ;;  %v343_v5 = vld [vmem:[%s4491_s20 + $0x8] sm:$0xff]  ;;  %v3924_v7 = vld [vmem:[#allocation6 + $0x20] sm:$0xff]   ;;  %v3926_v12 = vld [vmem:[#allocation6 + $0x30] sm:$0xff]   ;;  %s2928_s28 = scalar_lea.sflag [#allocation5], %s4485_s21  ;;  %s4155_s13 = scalar_lea.vmem %s5137_s12, 4096 }
  0x89   : > { %3678 = vmatprep.subr.bf16.mxu0 %v3921_v1  ;;  %3821 = vmatprep.subr.bf16.mxu1 %v3921_v1  ;;  %v374_v6 = vpack.c.bf16 %v343_v5, %v342_v4  ;;  %v358_v8 = vld [vmem:[%s4491_s20 + $0x80] sm:$0xff]  ;;  %v359_v9 = vld [vmem:[%s4491_s20 + $0x88] sm:$0xff]  ;;  %v3927_v13 = vld [vmem:[#allocation6 + $0x38] sm:$0xff]   ;;  %p4156_p10 = scmp.ne.s32.totalorder %s5137_s12, %s4155_s13 }
  0x8a   : > { %v382_v10 = vpack.c.bf16 %v359_v9, %v358_v8  ;;  %v3925_v11 = vld [vmem:[#allocation6 + $0x28] sm:$0xff]   ;;  %v344_v14 = vld [vmem:[%s4491_s20 + $0x10] sm:$0xff]  ;;  %v345_v15 = vld [vmem:[%s4491_s20 + $0x18] sm:$0xff] }
  0x8b   : > { %3692 = vmatprep.mubr.bf16.mxu0 %v374_v6  ;;  %v346_v16 = vld [vmem:[%s4491_s20 + $0x20] sm:$0xff]  ;;  %v347_v17 = vld [vmem:[%s4491_s20 + $0x28] sm:$0xff]  ;;  %v360_v18 = vld [vmem:[%s4491_s20 + $0x90] sm:$0xff]  ;;  %v375_v24 = vpack.c.bf16 %v345_v15, %v344_v14  ;;  %p4157_p3 = pnand %p4156_p10, %p4437_p5 }
  0x8c   : > { %3679 = vmatpush3.bf16.msra.mxu0 %v3921_v1  ;;  %3829 = vmatpush3.bf16.msra.mxu1 %v3921_v1  ;;  %v361_v19 = vld [vmem:[%s4491_s20 + $0x98] sm:$0xff]  ;;  %v362_v20 = vld [vmem:[%s4491_s20 + $0xa0] sm:$0xff]  ;;  %v363_v21 = vld [vmem:[%s4491_s20 + $0xa8] sm:$0xff]  ;;  %v376_v25 = vpack.c.bf16 %v347_v17, %v346_v16 }
  0x8d   : > { %3680 = vmatprep.subr.bf16.mxu0 %v3922_v2  ;;  %3822 = vmatprep.subr.bf16.mxu1 %v3922_v2  ;;  %v3934_v22 = vld [vmem:[#allocation8 + $0xc0] sm:$0xff]   ;;  %v383_v26 = vpack.c.bf16 %v361_v19, %v360_v18  ;;  %v384_v28 = vpack.c.bf16 %v363_v21, %v362_v20  ;;  %v3930_v29 = vld [vmem:[#allocation8 + $0x48] sm:$0xff]   ;;  %v348_v30 = vld [vmem:[%s4491_s20 + $0x30] sm:$0xff]  ;;  %p4158_p7 = pneg %p4157_p3 }
  0x8e   : > { %3708 = vmatprep.mubr.bf16.mxu1 %v382_v10  ;;  %v3928_v23 = vld [vmem:[#allocation8 + $0x40] sm:$0xff]   ;;  %v349_v31 = vld [vmem:[%s4491_s20 + $0x38] sm:$0xff]  ;;  %v351_v34 = vld [vmem:[%s4491_s20 + $0x48] sm:$0xff] }
  0x8f   : > { %v3929_v27 = vld [vmem:[#allocation8] sm:$0xff]   ;;  %v364_v35 = vld [vmem:[%s4491_s20 + $0xb0] sm:$0xff]  ;;  %v365_v36 = vld [vmem:[%s4491_s20 + $0xb8] sm:$0xff]  ;;  %v377_v44 = vpack.c.bf16 %v349_v31, %v348_v30 }
  0x90   : > { %3681 = vmatpush3.bf16.msra.mxu0 %v3922_v2  ;;  %3830 = vmatpush3.bf16.msra.mxu1 %v3922_v2  ;;  %v3936_v32 = vld [vmem:[#allocation8 + $0x80] sm:$0xff]   ;;  %v3931_v37 = vld [vmem:[#allocation8 + $0x8] sm:$0xff]   ;;  %v3932_v41 = vld [vmem:[#allocation8 + $0x50] sm:$0xff]   ;;  %v385_v47 = vpack.c.bf16 %v365_v36, %v364_v35 }
  0x91   : > { %3682 = vmatprep.subr.bf16.mxu0 %v3923_v3  ;;  %3823 = vmatprep.subr.bf16.mxu1 %v3923_v3  ;;  %v350_v33 = vld [vmem:[%s4491_s20 + $0x40] sm:$0xff]  ;;  %v3938_v38 = vld [vmem:[#allocation8 + $0xc8] sm:$0xff]   ;;  %v3942_v43 = vld [vmem:[#allocation8 + $0xd0] sm:$0xff]  }
  0x92   : > { %v366_v39 = vld [vmem:[%s4491_s20 + $0xc0] sm:$0xff]  ;;  %v367_v40 = vld [vmem:[%s4491_s20 + $0xc8] sm:$0xff]  ;;  %v3933_v45 = vld [vmem:[#allocation8 + $0x10] sm:$0xff]   ;;  %v378_v46 = vpack.c.bf16 %v351_v34, %v350_v33 }
  0x93   : > { %v3940_v42 = vld [vmem:[#allocation8 + $0x88] sm:$0xff]   ;;  %v3935_v48 = vld [vmem:[#allocation8 + $0x58] sm:$0xff]   ;;  %v3944_v49 = vld [vmem:[#allocation8 + $0x90] sm:$0xff]   ;;  %v386_v50 = vpack.c.bf16 %v367_v40, %v366_v39 }
  0x94   : > { %3683 = vmatpush3.bf16.msra.mxu0 %v3923_v3  ;;  %3831 = vmatpush3.bf16.msra.mxu1 %v3923_v3  ;;  %v3946_v51 = vld [vmem:[#allocation8 + $0xd8] sm:$0xff]   ;;  %v352_v52 = vld [vmem:[%s4491_s20 + $0x50] sm:$0xff]  ;;  %v354_v54 = vld [vmem:[%s4491_s20 + $0x60] sm:$0xff] }
  0x95   : > { %3684 = vmatprep.subr.bf16.mxu0 %v3924_v7  ;;  %3824 = vmatprep.subr.bf16.mxu1 %v3924_v7  ;;  %v353_v53 = vld [vmem:[%s4491_s20 + $0x58] sm:$0xff]  ;;  %v355_v55 = vld [vmem:[%s4491_s20 + $0x68] sm:$0xff]  ;;  %v368_v56 = vld [vmem:[%s4491_s20 + $0xd0] sm:$0xff] }
  0x96   : > { %v369_v57 = vld [vmem:[%s4491_s20 + $0xd8] sm:$0xff]  ;;  %v370_v59 = vld [vmem:[%s4491_s20 + $0xe0] sm:$0xff]  ;;  %v371_v60 = vld [vmem:[%s4491_s20 + $0xe8] sm:$0xff]  ;;  %v379_v62 = vpack.c.bf16 %v353_v53, %v352_v52  ;;  %v380_v0 = vpack.c.bf16 %v355_v55, %v354_v54 }
  0x97   : > { %v3937_v58 = vld [vmem:[#allocation8 + $0x18] sm:$0xff]   ;;  %v3939_v61 = vld [vmem:[#allocation8 + $0x60] sm:$0xff]   ;;  %v387_v1 = vpack.c.bf16 %v369_v57, %v368_v56  ;;  %v3943_v2 = vld [vmem:[#allocation8 + $0x68] sm:$0xff]   ;;  %v388_v3 = vpack.c.bf16 %v371_v60, %v370_v59 }
  0x98   : > { %3685 = vmatpush3.bf16.msra.mxu0 %v3924_v7  ;;  %3832 = vmatpush3.bf16.msra.mxu1 %v3924_v7  ;;  %v3941_v63 = vld [vmem:[#allocation8 + $0x20] sm:$0xff]   ;;  %v356_v4 = vld [vmem:[%s4491_s20 + $0x70] sm:$0xff]  ;;  %v357_v5 = vld [vmem:[%s4491_s20 + $0x78] sm:$0xff] }
  0x99   : > { %3686 = vmatprep.subr.bf16.mxu0 %v3925_v11  ;;  %3825 = vmatprep.subr.bf16.mxu1 %v3925_v11  ;;  %v372_v6 = vld [vmem:[%s4491_s20 + $0xf0] sm:$0xff]  ;;  %v373_v7 = vld [vmem:[%s4491_s20 + $0xf8] sm:$0xff]  ;;  %v3945_v8 = vld [vmem:[#allocation8 + $0x28] sm:$0xff]   ;;  %v381_v9 = vpack.c.bf16 %v357_v5, %v356_v4 }
  0x9a   : > { %v389_v10 = vpack.c.bf16 %v373_v7, %v372_v6  ;;  %v3949_v14 = vld [vmem:[#allocation8 + $0x30] sm:$0xff]   ;;  %v3950_v15 = vld [vmem:[#allocation8 + $0xe0] sm:$0xff]   ;;  %v3951_v16 = vld [vmem:[#allocation8 + $0x78] sm:$0xff]  }
  0x9b   : > { %v3952_v17 = vld [vmem:[#allocation8 + $0xa0] sm:$0xff]   ;;  %v3953_v18 = vld [vmem:[#allocation8 + $0x38] sm:$0xff]   ;;  %v3963_v33 = vld [vmem:[#allocation8 + $0x108] sm:$0xff]  }
  0x9c   : > { %3687 = vmatpush3.bf16.msra.mxu0 %v3925_v11  ;;  %3833 = vmatpush3.bf16.msra.mxu1 %v3925_v11  ;;  %v4239_v11 = vmov 0.0   ;;  %v3960_v30 = vld [vmem:[#allocation8 + $0xf8] sm:$0xff]   ;;  %v3964_v34 = vld [vmem:[#allocation8 + $0x150] sm:$0xff]   ;;  %v3970_v39 = vld [vmem:[#allocation8 + $0x160] sm:$0xff]  }
  0x9d   : > { %3688 = vmatprep.subr.bf16.mxu0 %v3926_v12  ;;  %3826 = vmatprep.subr.bf16.mxu1 %v3926_v12  ;;  %654 = vst [vmem:[#allocation2] sm:$0xff] %v4239_v11  ;;  %655 = vst [vmem:[#allocation2 + $0x8] sm:$0xff] %v4239_v11  ;;  %v3961_v31 = vld [vmem:[#allocation8 + $0xb8] sm:$0xff]   ;;  %v3965_v35 = vld [vmem:[#allocation8 + $0x110] sm:$0xff]  }
  0x9e   : > { %656 = vst [vmem:[#allocation2 + $0x10] sm:$0x3] %v4239_v11  ;;  %658 = vst [vmem:[#allocation2 + $0x198] sm:$0xff] %v4239_v11  ;;  %v3966_v36 = vld [vmem:[#allocation8 + $0x158] sm:$0xff]   ;;  %v3971_v40 = vld [vmem:[#allocation8 + $0x120] sm:$0xff]  }
  0x9f   : > { %659 = vst [vmem:[#allocation2 + $0x1a0] sm:$0xff] %v4239_v11  ;;  %660 = vst [vmem:[#allocation2 + $0x1a8] sm:$0x3] %v4239_v11 }
  0xa0   : > { %3689 = vmatpush3.bf16.msra.mxu0 %v3926_v12  ;;  %3834 = vmatpush3.bf16.msra.mxu1 %v3926_v12  ;;  %662 = vst [vmem:[#allocation2 + $0x18] sm:$0x1] %v4239_v11  ;;  %663 = vst [vmem:[#allocation2 + $0x30] sm:$0x1] %v4239_v11  ;;  %v3947_v12 = vld [vmem:[#allocation8 + $0x70] sm:$0xff]  }
  0xa1   : > { %3690 = vmatprep.subr.bf16.mxu0 %v3927_v13  ;;  %3827 = vmatprep.subr.bf16.mxu1 %v3927_v13  ;;  %664 = vst [vmem:[#allocation2 + $0x48] sm:$0x1] %v4239_v11  ;;  %665 = vst [vmem:[#allocation2 + $0x60] sm:$0x1] %v4239_v11 }
  0xa2   : > { %666 = vst [vmem:[#allocation2 + $0x78] sm:$0x1] %v4239_v11  ;;  %667 = vst [vmem:[#allocation2 + $0x90] sm:$0x1] %v4239_v11 }
  0xa3   : > { %668 = vst [vmem:[#allocation2 + $0xa8] sm:$0x1] %v4239_v11  ;;  %669 = vst [vmem:[#allocation2 + $0xc0] sm:$0x1] %v4239_v11 }
  0xa4   : > { %3691 = vmatpush3.bf16.msra.mxu0 %v3927_v13  ;;  %3835 = vmatpush3.bf16.msra.mxu1 %v3927_v13  ;;  %670 = vst [vmem:[#allocation2 + $0xd8] sm:$0x1] %v4239_v11  ;;  %671 = vst [vmem:[#allocation2 + $0xf0] sm:$0x1] %v4239_v11  ;;  %v3948_v13 = vld [vmem:[#allocation8 + $0x98] sm:$0xff]  }
  0xa5   : > { %3292 = vmatprep.subr.bf16.mxu0 %v3934_v22  ;;  %3180 = vmatprep.subr.bf16.mxu1 %v3928_v23  ;;  %672 = vst [vmem:[#allocation2 + $0x108] sm:$0x1] %v4239_v11  ;;  %673 = vst [vmem:[#allocation2 + $0x120] sm:$0x1] %v4239_v11  ;;  %v778_v19 = vld [vmem:[#allocation2 + $0x1] sm:$0xff]  ;;  %v779_v20 = vld [vmem:[#allocation2 + $0x9] sm:$0xff] }
  0xa6   : > { %674 = vst [vmem:[#allocation2 + $0x138] sm:$0x1] %v4239_v11  ;;  %675 = vst [vmem:[#allocation2 + $0x150] sm:$0x1] %v4239_v11  ;;  %v810_v21 = vpack.c.bf16 %v779_v20, %v778_v19  ;;  %v3954_v23 = vld [vmem:[#allocation8 + $0xe8] sm:$0xff]  }
  0xa7   : > { %3693 = vmatmul.mubr.bf16.vlgmr.msra.gmra.mrb[0].mxu0 %v375_v24  ;;  %3709 = vmatmul.mubr.bf16.vlgmr.msra.gmra.mrb[0].mxu1 %v383_v26  ;;  %676 = vst [vmem:[#allocation2 + $0x168] sm:$0x1] %v4239_v11  ;;  %677 = vst [vmem:[#allocation2 + $0x180] sm:$0x1] %v4239_v11  ;;  %v3956_v26 = vld [vmem:[#allocation8 + $0x140] sm:$0xff]  }
  0xa8   : > { %3696 = vmatprep.mubr.bf16.mxu0 %v376_v25  ;;  %3712 = vmatprep.mubr.bf16.mxu1 %v384_v28  ;;  %680 = vst [vmem:[#allocation2 + $0x29] sm:$0x1] %v4239_v11  ;;  %681 = vst [vmem:[#allocation2 + $0x41] sm:$0x1] %v4239_v11  ;;  %v3955_v25 = vld [vmem:[#allocation8 + $0xa8] sm:$0xff]   ;;  %v3958_v28 = vld [vmem:[#allocation8 + $0x100] sm:$0xff]  }
  0xa9   : > { %3181 = vmatpush3.bf16.msra.mxu1 %v3929_v27  ;;  %3293 = vmatpush3.bf16.msra.mxu0 %v3936_v32  ;;  %682 = vst [vmem:[#allocation2 + $0x59] sm:$0x1] %v4239_v11  ;;  %683 = vst [vmem:[#allocation2 + $0x71] sm:$0x1] %v4239_v11  ;;  %v3957_v27 = vld [vmem:[#allocation8 + $0xf0] sm:$0xff]   ;;  %v3962_v32 = vld [vmem:[#allocation8 + $0x148] sm:$0xff]  }
  0xaa   : > { %3182 = vmatprep.subr.bf16.mxu1 %v3930_v29  ;;  %3294 = vmatprep.subr.bf16.mxu0 %v3938_v38  ;;  %684 = vst [vmem:[#allocation2 + $0x89] sm:$0x1] %v4239_v11  ;;  %685 = vst [vmem:[#allocation2 + $0xa1] sm:$0x1] %v4239_v11  ;;  %v3959_v29 = vld [vmem:[#allocation8 + $0xb0] sm:$0xff]   ;;  %v3968_v38 = vld [vmem:[#allocation8 + $0x1c0] sm:$0xff]  }
  0xab   : > { %686 = vst [vmem:[#allocation2 + $0xb9] sm:$0x1] %v4239_v11  ;;  %687 = vst [vmem:[#allocation2 + $0xd1] sm:$0x1] %v4239_v11 }
  0xac   : > { %688 = vst [vmem:[#allocation2 + $0xe9] sm:$0x1] %v4239_v11  ;;  %689 = vst [vmem:[#allocation2 + $0x101] sm:$0x1] %v4239_v11 }
  0xad   : > { %3183 = vmatpush3.bf16.msra.mxu1 %v3931_v37  ;;  %3295 = vmatpush3.bf16.msra.mxu0 %v3940_v42  ;;  %690 = vst [vmem:[#allocation2 + $0x119] sm:$0x1] %v4239_v11  ;;  %691 = vst [vmem:[#allocation2 + $0x131] sm:$0x1] %v4239_v11  ;;  %v3967_v37 = vld [vmem:[#allocation8 + $0x118] sm:$0xff]   ;;  %v3975_v42 = vld [vmem:[#allocation8 + $0x128] sm:$0xff]  }
  0xae   : > { %3184 = vmatprep.subr.bf16.mxu1 %v3932_v41  ;;  %3296 = vmatprep.subr.bf16.mxu0 %v3942_v43  ;;  %692 = vst [vmem:[#allocation2 + $0x149] sm:$0x1] %v4239_v11  ;;  %693 = vst [vmem:[#allocation2 + $0x161] sm:$0x1] %v4239_v11  ;;  %v3974_v41 = vld [vmem:[#allocation8 + $0x168] sm:$0xff]   ;;  %v3978_v43 = vld [vmem:[#allocation8 + $0x170] sm:$0xff]  }
  0xaf   : > { %3697 = vmatmul.mubr.bf16.gmra.mrb[4].mxu0 %v377_v44  ;;  %3713 = vmatmul.mubr.bf16.gmra.mrb[4].mxu1 %v385_v47  ;;  %694 = vst [vmem:[#allocation2 + $0x179] sm:$0x1] %v4239_v11  ;;  %695 = vst [vmem:[#allocation2 + $0x191] sm:$0x1] %v4239_v11  ;;  %v3979_v44 = vld [vmem:[#allocation8 + $0x130] sm:$0xff]  }
  0xb0   : > { %3700 = vmatprep.mubr.bf16.mxu0 %v378_v46  ;;  %3716 = vmatprep.mubr.bf16.mxu1 %v386_v50  ;;  %661 = vst [vmem:[#allocation2] sm:$0x1] %v4239_v11  ;;  %679 = vst [vmem:[#allocation2 + $0x11] sm:$0x1] %v4239_v11  ;;  %v3983_v46 = vld [vmem:[#allocation8 + $0x138] sm:$0xff]  }
  0xb1   : > { %3185 = vmatpush3.bf16.msra.mxu1 %v3933_v45  ;;  %3297 = vmatpush3.bf16.msra.mxu0 %v3944_v49  ;;  %678 = vst [vmem:[#allocation2 + $0x198] sm:$0x1] %v4239_v11  ;;  %696 = vst [vmem:[#allocation2 + $0x1a9] sm:$0x1] %v4239_v11  ;;  %v3982_v45 = vld [vmem:[#allocation8 + $0x178] sm:$0xff]  }
  0xb2   : > { %3186 = vmatprep.subr.bf16.mxu1 %v3935_v48  ;;  %3298 = vmatprep.subr.bf16.mxu0 %v3946_v51  ;;  %v4540_v47 = vld [vmem:[%s5188_s4] ss:$0 sm:$0xff] }
  0xb5   : > { %3187 = vmatpush3.bf16.msra.mxu1 %v3937_v58  ;;  %3299 = vmatpush3.bf16.msra.mxu0 %v3948_v13 }
  0xb6   : > { %3188 = vmatprep.subr.bf16.mxu1 %v3939_v61  ;;  %3300 = vmatprep.subr.bf16.mxu0 %v3950_v15 }
  0xb7   : > { %3701 = vmatmul.mubr.bf16.gmra.mrb[8].mxu0 %v379_v62  ;;  %3717 = vmatmul.mubr.bf16.gmra.mrb[8].mxu1 %v387_v1  ;;  %v730_v22 = vld [vmem:[#allocation2] sm:$0xff] }
  0xb8   : > { %3704 = vmatprep.mubr.bf16.mxu0 %v380_v0  ;;  %3720 = vmatprep.mubr.bf16.mxu1 %v388_v3  ;;  %v762_v24 = vpack.c.bf16 %v4239_v11, %v730_v22 }
  0xb9   : > { %3189 = vmatpush3.bf16.msra.mxu1 %v3941_v63  ;;  %3301 = vmatpush3.bf16.msra.mxu0 %v3952_v17 }
  0xba   : > { %3190 = vmatprep.subr.bf16.mxu1 %v3943_v2  ;;  %3302 = vmatprep.subr.bf16.mxu0 %v3954_v23  ;;  %v4549_v2 = vld [vmem:[#allocation8 + $0x200] sm:$0xff]  }
  0xbd   : > { %3191 = vmatpush3.bf16.msra.mxu1 %v3945_v8  ;;  %3303 = vmatpush3.bf16.msra.mxu0 %v3955_v25 }
  0xbe   : > { %3192 = vmatprep.subr.bf16.mxu1 %v3947_v12  ;;  %3304 = vmatprep.subr.bf16.mxu0 %v3957_v27 }
  0xbf   : > { %3705 = vmatmul.mubr.bf16.gmra.mrb[12].mxu0 %v381_v9  ;;  %3721 = vmatmul.mubr.bf16.gmra.mrb[12].mxu1 %v389_v10 }
  0xc0   : > { %1778 = vmatprep.mubr.bf16.mxu1 %v810_v21 }
  0xc1   : > { %3193 = vmatpush3.bf16.msra.mxu1 %v3949_v14  ;;  %3305 = vmatpush3.bf16.msra.mxu0 %v3959_v29  ;;  %v827_v29 = vld [vmem:[#allocation2 + $0xa] sm:$0xff] }
  0xc2   : > { %3194 = vmatprep.subr.bf16.mxu1 %v3951_v16  ;;  %3306 = vmatprep.subr.bf16.mxu0 %v3960_v30 }
  0xc5   : > { %3195 = vmatpush3.bf16.msra.mxu1 %v3953_v18  ;;  %3307 = vmatpush3.bf16.msra.mxu0 %v3961_v31 }
  0xc6   : > { %3404 = vmatprep.subr.bf16.mxu1 %v3956_v26  ;;  %3516 = vmatprep.subr.bf16.mxu0 %v3968_v38 }
  0xc8   : > { %1779 = vmatmul.mubr.bf16.vlgmr.msra.gmra.mrb[16].mxu1 %v762_v24 }
  0xc9   : > { %3405 = vmatpush3.bf16.msra.mxu1 %v3958_v28  ;;  %v826_v28 = vld [vmem:[#allocation2 + $0x2] sm:$0xff] }
  0xca   : > { %3406 = vmatprep.subr.bf16.mxu1 %v3962_v32 }
  0xcd   : > { %3407 = vmatpush3.bf16.msra.mxu1 %v3963_v33 }
  0xce   : > { %3408 = vmatprep.subr.bf16.mxu1 %v3964_v34 }
  0xd1   : > { %3409 = vmatpush3.bf16.msra.mxu1 %v3965_v35 }
  0xd2   : > { %3410 = vmatprep.subr.bf16.mxu1 %v3966_v36 }
  0xd5   : > { %3411 = vmatpush3.bf16.msra.mxu1 %v3967_v37 }
  0xd6   : > { %3412 = vmatprep.subr.bf16.mxu1 %v3970_v39 }
  0xd9   : > { %3413 = vmatpush3.bf16.msra.mxu1 %v3971_v40  ;;  %v858_v40 = vpack.c.bf16 %v827_v29, %v826_v28 }
  0xda   : > { %3414 = vmatprep.subr.bf16.mxu1 %v3974_v41 }
  0xdd   : > { %3415 = vmatpush3.bf16.msra.mxu1 %v3975_v42 }
  0xde   : > { %3416 = vmatprep.subr.bf16.mxu1 %v3978_v43 }
  0xe1   : > { %3417 = vmatpush3.bf16.msra.mxu1 %v3979_v44 }
  0xe2   : > { %3418 = vmatprep.subr.bf16.mxu1 %v3982_v45 }
  0xe5   : > { %3419 = vmatpush3.bf16.msra.mxu1 %v3983_v46 }
  0xe6   : > { %3724 = vmatprep.subr.bf16.mxu1 %v4549_v2 }
 0x17a   : > { %v3694_v48 = vpop.f32.mrb[0].mxu0  ;;  %v3710_v51 = vpop.f32.mrb[0].mxu1 }
 0x17b   : > { %v504_v49 = vadd.f32 %v3694_v48, %v4540_v47  ;;  %v495_v50 = vpop.f32.mrb[1].mxu0  ;;  %v568_v54 = vadd.f32 %v3710_v51, %v4540_v47  ;;  %v559_v55 = vpop.f32.mrb[1].mxu1  ;;  %v3969_v48 = vld [vmem:[#allocation8 + $0x180] sm:$0xff]  }
 0x17c   : > { %v496_v52 = vadd.f32 %v4540_v47, %v495_v50  ;;  %v3695_v53 = vpop.f32.mrb[2].mxu0  ;;  %v560_v59 = vadd.f32 %v4540_v47, %v559_v55  ;;  %v3711_v60 = vpop.f32.mrb[2].mxu1 }
 0x17d   : > { %v624_v56 = vmax.f32 %v504_v49, 0.0  ;;  %v507_v57 = vadd.f32 %v3695_v53, %v4540_v47  ;;  %v498_v58 = vpop.f32.mrb[3].mxu0  ;;  %v640_v63 = vmax.f32 %v568_v54, 0.0  ;;  %v571_v0 = vadd.f32 %v3711_v60, %v4540_v47  ;;  %v562_v1 = vpop.f32.mrb[3].mxu1  ;;  %v3972_v53 = vld [vmem:[#allocation8 + $0x1c8] sm:$0xff]  }
 0x17e   : > { %v622_v61 = vmax.f32 %v496_v52, 0.0  ;;  %v499_v62 = vadd.f32 %v4540_v47, %v498_v58  ;;  %v638_v4 = vmax.f32 %v560_v59, 0.0  ;;  %v563_v5 = vadd.f32 %v4540_v47, %v562_v1 }
 0x17f   : > { %700 = vst [vmem:[#allocation2 + $0x31] sm:$0xff] %v624_v56  ;;  %v625_v3 = vmax.f32 %v507_v57, 0.0  ;;  %716 = vst [vmem:[#allocation2 + $0xf1] sm:$0xff] %v640_v63  ;;  %v641_v7 = vmax.f32 %v571_v0, 0.0 }
 0x180   : > { %698 = vst [vmem:[#allocation2 + $0x19] sm:$0xff] %v622_v61  ;;  %v623_v6 = vmax.f32 %v499_v62, 0.0  ;;  %714 = vst [vmem:[#allocation2 + $0xd9] sm:$0xff] %v638_v4  ;;  %v639_v9 = vmax.f32 %v563_v5, 0.0  ;;  %v3973_v5 = vld [vmem:[#allocation8 + $0x188] sm:$0xff]  }
 0x181   : > { %701 = vst [vmem:[#allocation2 + $0x39] sm:$0xff] %v625_v3  ;;  %v4553_v8 = vpack.c.bf16 %v625_v3, %v624_v56  ;;  %717 = vst [vmem:[#allocation2 + $0xf9] sm:$0xff] %v641_v7  ;;  %v4555_v12 = vpack.c.bf16 %v641_v7, %v640_v63 }
 0x182   : > { %699 = vst [vmem:[#allocation2 + $0x21] sm:$0xff] %v623_v6  ;;  %v3698_v10 = vpop.f32.mrb[4].mxu0  ;;  %v811_v11 = vpack.c.bf16 %v623_v6, %v622_v61  ;;  %715 = vst [vmem:[#allocation2 + $0xe1] sm:$0xff] %v639_v9  ;;  %v3714_v15 = vpop.f32.mrb[4].mxu1  ;;  %v4558_v16 = vpack.c.bf16 %v639_v9, %v638_v4 }
 0x183   : > { %v520_v13 = vadd.f32 %v3698_v10, %v4540_v47  ;;  %v511_v14 = vpop.f32.mrb[5].mxu0  ;;  %v584_v19 = vadd.f32 %v3714_v15, %v4540_v47  ;;  %v575_v20 = vpop.f32.mrb[5].mxu1 }
 0x184   : > { %v512_v17 = vadd.f32 %v4540_v47, %v511_v14  ;;  %v3699_v18 = vpop.f32.mrb[6].mxu0  ;;  %1786 = vmatprep.mubr.bf16.mxu1 %v811_v11  ;;  %v576_v24 = vadd.f32 %v4540_v47, %v575_v20  ;;  %v3715_v25 = vpop.f32.mrb[6].mxu1  ;;  %v3976_v14 = vld [vmem:[#allocation8 + $0x1d0] sm:$0xff]  }
 0x185   : > { %v628_v21 = vmax.f32 %v520_v13, 0.0  ;;  %v523_v22 = vadd.f32 %v3699_v18, %v4540_v47  ;;  %v514_v23 = vpop.f32.mrb[7].mxu0  ;;  %v644_v30 = vmax.f32 %v584_v19, 0.0  ;;  %v587_v31 = vadd.f32 %v3715_v25, %v4540_v47  ;;  %v578_v32 = vpop.f32.mrb[7].mxu1 }
 0x186   : > { %v626_v26 = vmax.f32 %v512_v17, 0.0  ;;  %v515_v27 = vadd.f32 %v4540_v47, %v514_v23  ;;  %v642_v34 = vmax.f32 %v576_v24, 0.0  ;;  %v579_v35 = vadd.f32 %v4540_v47, %v578_v32  ;;  %v876_v50 = vld [vmem:[#allocation2 + $0x30] sm:$0xff] }
 0x187   : > { %704 = vst [vmem:[#allocation2 + $0x61] sm:$0xff] %v628_v21  ;;  %v629_v33 = vmax.f32 %v523_v22, 0.0  ;;  %720 = vst [vmem:[#allocation2 + $0x121] sm:$0xff] %v644_v30  ;;  %v645_v37 = vmax.f32 %v587_v31, 0.0  ;;  %v874_v38 = vld [vmem:[#allocation2 + $0x18] sm:$0xff] }
 0x188   : > { %702 = vst [vmem:[#allocation2 + $0x49] sm:$0xff] %v626_v26  ;;  %v4567_v36 = vmax.f32 %v515_v27, 0.0  ;;  %v877_v41 = vld [vmem:[#allocation2 + $0x38] sm:$0xff]  ;;  %718 = vst [vmem:[#allocation2 + $0x109] sm:$0xff] %v642_v34  ;;  %v643_v43 = vmax.f32 %v579_v35, 0.0 }
 0x189   : > { %705 = vst [vmem:[#allocation2 + $0x69] sm:$0xff] %v629_v33  ;;  %v875_v39 = vld [vmem:[#allocation2 + $0x20] sm:$0xff]  ;;  %v4569_v42 = vpack.c.bf16 %v629_v33, %v628_v21  ;;  %721 = vst [vmem:[#allocation2 + $0x129] sm:$0xff] %v645_v37  ;;  %v4575_v49 = vpack.c.bf16 %v645_v37, %v644_v30  ;;  %v4580_v56 = vpack.c.bf16 %v877_v41, %v876_v50  ;;  %v3980_v33 = vld [vmem:[#allocation8 + $0x1d8] sm:$0xff]  }
 0x18a   : > { %703 = vst [vmem:[#allocation2 + $0x51] sm:$0xff] %v4567_v36  ;;  %v906_v44 = vpack.c.bf16 %v875_v39, %v874_v38  ;;  %v3702_v45 = vpop.f32.mrb[8].mxu0  ;;  %v4573_v46 = vpack.c.bf16 %v4567_v36, %v626_v26  ;;  %719 = vst [vmem:[#allocation2 + $0x111] sm:$0xff] %v643_v43  ;;  %v3718_v54 = vpop.f32.mrb[8].mxu1  ;;  %v4578_v55 = vpack.c.bf16 %v643_v43, %v642_v34  ;;  %v828_v15 = vld [vmem:[#allocation2 + $0x1a] sm:$0xff]  ;;  %v829_v17 = vld [vmem:[#allocation2 + $0x22] sm:$0xff] }
 0x18b   : > { %v536_v51 = vadd.f32 %v3702_v45, %v4540_v47  ;;  %v527_v52 = vpop.f32.mrb[9].mxu0  ;;  %v600_v59 = vadd.f32 %v3718_v54, %v4540_v47  ;;  %v591_v60 = vpop.f32.mrb[9].mxu1  ;;  %v3977_v26 = vld [vmem:[#allocation8 + $0x190] sm:$0xff]   ;;  %v4603_v28 = vpack.c.bf16 %v829_v17, %v828_v15 }
 0x18c   : > { %1939 = vmatprep.mubr.bf16.mxu0 %v906_v44  ;;  %1787 = vmatmul.mubr.bf16.gmra.mrb[20].mxu1 %v906_v44  ;;  %v528_v57 = vadd.f32 %v4540_v47, %v527_v52  ;;  %v3703_v58 = vpop.f32.mrb[10].mxu0  ;;  %v592_v0 = vadd.f32 %v4540_v47, %v591_v60  ;;  %v3719_v1 = vpop.f32.mrb[10].mxu1  ;;  %v831_v60 = vld [vmem:[#allocation2 + $0x3a] sm:$0xff] }
 0x18d   : > { %1940 = vmatmul.mubr.bf16.vlgmr.msra.gmra.mrb[16].mxu0 %v858_v40  ;;  %1794 = vmatprep.mubr.bf16.mxu1 %v4553_v8  ;;  %v632_v61 = vmax.f32 %v536_v51, 0.0  ;;  %v539_v62 = vadd.f32 %v3703_v58, %v4540_v47  ;;  %v530_v63 = vpop.f32.mrb[11].mxu0  ;;  %v648_v6 = vmax.f32 %v600_v59, 0.0  ;;  %v603_v7 = vadd.f32 %v3719_v1, %v4540_v47  ;;  %v594_v9 = vpop.f32.mrb[11].mxu1  ;;  %v3984_v58 = vld [vmem:[#allocation8 + $0x1e0] sm:$0xff]   ;;  %v3989_v15 = vld [vmem:[#allocation8 + $0x1f0] sm:$0xff]  }
 0x18e   : > { %1947 = vmatprep.mubr.bf16.mxu0 %v4580_v56  ;;  %v630_v3 = vmax.f32 %v528_v57, 0.0  ;;  %v531_v4 = vadd.f32 %v4540_v47, %v530_v63  ;;  %3517 = vmatpush3.bf16.msra.mxu0 %v3969_v48  ;;  %v646_v11 = vmax.f32 %v592_v0, 0.0  ;;  %v595_v13 = vadd.f32 %v4540_v47, %v594_v9  ;;  %v830_v59 = vld [vmem:[#allocation2 + $0x32] sm:$0xff]  ;;  %v880_v63 = vld [vmem:[#allocation2 + $0x60] sm:$0xff] }
 0x18f   : > { %708 = vst [vmem:[#allocation2 + $0x91] sm:$0xff] %v632_v61  ;;  %v4590_v8 = vmax.f32 %v539_v62, 0.0  ;;  %v878_v10 = vld [vmem:[#allocation2 + $0x48] sm:$0xff]  ;;  %3518 = vmatprep.subr.bf16.mxu0 %v3972_v53  ;;  %724 = vst [vmem:[#allocation2 + $0x151] sm:$0xff] %v648_v6  ;;  %v649_v19 = vmax.f32 %v603_v7, 0.0  ;;  %v3986_v9 = vld [vmem:[#allocation8 + $0x1e8] sm:$0xff]  }
 0x190   : > { %706 = vst [vmem:[#allocation2 + $0x79] sm:$0xff] %v630_v3  ;;  %v631_v18 = vmax.f32 %v531_v4, 0.0  ;;  %722 = vst [vmem:[#allocation2 + $0x139] sm:$0xff] %v646_v11  ;;  %v647_v22 = vmax.f32 %v595_v13, 0.0  ;;  %v3981_v53 = vld [vmem:[#allocation8 + $0x198] sm:$0xff]  }
 0x191   : > { %709 = vst [vmem:[#allocation2 + $0x99] sm:$0xff] %v4590_v8  ;;  %v879_v20 = vld [vmem:[#allocation2 + $0x50] sm:$0xff]  ;;  %v4595_v21 = vpack.c.bf16 %v4590_v8, %v632_v61  ;;  %725 = vst [vmem:[#allocation2 + $0x159] sm:$0xff] %v649_v19  ;;  %v4601_v27 = vpack.c.bf16 %v649_v19, %v648_v6  ;;  %v881_v0 = vld [vmem:[#allocation2 + $0x68] sm:$0xff]  ;;  %v4625_v6 = vpack.c.bf16 %v831_v60, %v830_v59 }
 0x192   : > { %v4597_v23 = vpack.c.bf16 %v879_v20, %v878_v10  ;;  %707 = vst [vmem:[#allocation2 + $0x81] sm:$0xff] %v631_v18  ;;  %v3706_v24 = vpop.f32.mrb[12].mxu0  ;;  %v4599_v25 = vpack.c.bf16 %v631_v18, %v630_v3  ;;  %3519 = vmatpush3.bf16.msra.mxu0 %v3973_v5  ;;  %723 = vst [vmem:[#allocation2 + $0x141] sm:$0xff] %v647_v22  ;;  %v3722_v31 = vpop.f32.mrb[12].mxu1  ;;  %v4606_v32 = vpack.c.bf16 %v647_v22, %v646_v11  ;;  %v3987_v11 = vld [vmem:[#allocation8 + $0x1a8] sm:$0xff]   ;;  %v832_v17 = vld [vmem:[#allocation2 + $0x4a] sm:$0xff] }
 0x193   : > { %v552_v29 = vadd.f32 %v3706_v24, %v4540_v47  ;;  %v543_v30 = vpop.f32.mrb[13].mxu0  ;;  %3520 = vmatprep.subr.bf16.mxu0 %v3976_v14  ;;  %v616_v37 = vadd.f32 %v3722_v31, %v4540_v47  ;;  %v607_v38 = vpop.f32.mrb[13].mxu1  ;;  %v4630_v10 = vpack.c.bf16 %v881_v0, %v880_v63  ;;  %v833_v18 = vld [vmem:[#allocation2 + $0x52] sm:$0xff]  ;;  %v3990_v20 = vld [vmem:[#allocation8 + $0x1b0] sm:$0xff]   ;;  %v3991_v24 = vld [vmem:[#allocation8 + $0x1f8] sm:$0xff]  }
 0x194   : > { %1795 = vmatmul.mubr.bf16.gmra.mrb[24].mxu1 %v4580_v56  ;;  %v544_v34 = vadd.f32 %v4540_v47, %v543_v30  ;;  %v3707_v35 = vpop.f32.mrb[14].mxu0  ;;  %v608_v43 = vadd.f32 %v4540_v47, %v607_v38  ;;  %v3723_v44 = vpop.f32.mrb[14].mxu1  ;;  %v4637_v22 = vpack.c.bf16 %v833_v18, %v832_v17 }
 0x195   : > { %1948 = vmatmul.mubr.bf16.gmra.mrb[20].mxu0 %v4603_v28  ;;  %1802 = vmatprep.mubr.bf16.mxu1 %v4573_v46  ;;  %v636_v39 = vmax.f32 %v552_v29, 0.0  ;;  %v555_v40 = vadd.f32 %v3707_v35, %v4540_v47  ;;  %v546_v41 = vpop.f32.mrb[15].mxu0  ;;  %v652_v50 = vmax.f32 %v616_v37, 0.0  ;;  %v619_v51 = vadd.f32 %v3723_v44, %v4540_v47  ;;  %v610_v52 = vpop.f32.mrb[15].mxu1  ;;  %v835_v29 = vld [vmem:[#allocation2 + $0x6a] sm:$0xff] }
 0x196   : > { %1955 = vmatprep.mubr.bf16.mxu0 %v4597_v23  ;;  %v634_v45 = vmax.f32 %v544_v34, 0.0  ;;  %v547_v48 = vadd.f32 %v4540_v47, %v546_v41  ;;  %3521 = vmatpush3.bf16.msra.mxu0 %v3977_v26  ;;  %v650_v54 = vmax.f32 %v608_v43, 0.0  ;;  %v611_v57 = vadd.f32 %v4540_v47, %v610_v52  ;;  %v3985_v47 = vld [vmem:[#allocation8 + $0x1a0] sm:$0xff]   ;;  %v834_v26 = vld [vmem:[#allocation2 + $0x62] sm:$0xff]  ;;  %v890_v52 = vld [vmem:[#allocation2 + $0xd8] sm:$0xff] }
 0x197   : > { %712 = vst [vmem:[#allocation2 + $0xc1] sm:$0xff] %v636_v39  ;;  %v637_v46 = vmax.f32 %v555_v40, 0.0  ;;  %3522 = vmatprep.subr.bf16.mxu0 %v3980_v33  ;;  %728 = vst [vmem:[#allocation2 + $0x181] sm:$0xff] %v652_v50  ;;  %v653_v62 = vmax.f32 %v619_v51, 0.0  ;;  %v882_v13 = vld [vmem:[#allocation2 + $0x78] sm:$0xff]  ;;  %v884_v30 = vld [vmem:[#allocation2 + $0x90] sm:$0xff]  ;;  %v4643_v33 = vpack.c.bf16 %v835_v29, %v834_v26 }
 0x198   : > { %710 = vst [vmem:[#allocation2 + $0xa9] sm:$0xff] %v634_v45  ;;  %v635_v61 = vmax.f32 %v547_v48, 0.0  ;;  %726 = vst [vmem:[#allocation2 + $0x169] sm:$0xff] %v650_v54  ;;  %v651_v3 = vmax.f32 %v611_v57, 0.0  ;;  %v885_v31 = vld [vmem:[#allocation2 + $0x98] sm:$0xff] }
 0x199   : > { %713 = vst [vmem:[#allocation2 + $0xc9] sm:$0xff] %v637_v46  ;;  %v4619_v1 = vpack.c.bf16 %v637_v46, %v636_v39  ;;  %729 = vst [vmem:[#allocation2 + $0x189] sm:$0xff] %v653_v62  ;;  %v4623_v5 = vpack.c.bf16 %v653_v62, %v652_v50  ;;  %v883_v14 = vld [vmem:[#allocation2 + $0x80] sm:$0xff]  ;;  %v4646_v34 = vpack.c.bf16 %v885_v31, %v884_v30  ;;  %v838_v43 = vld [vmem:[#allocation2 + $0x92] sm:$0xff] }
 0x19a   : > { %711 = vst [vmem:[#allocation2 + $0xb1] sm:$0xff] %v635_v61  ;;  %v4621_v4 = vpack.c.bf16 %v635_v61, %v634_v45  ;;  %3523 = vmatpush3.bf16.msra.mxu0 %v3981_v53  ;;  %727 = vst [vmem:[#allocation2 + $0x171] sm:$0xff] %v651_v3  ;;  %v4627_v7 = vpack.c.bf16 %v651_v3, %v650_v54  ;;  %v4635_v19 = vpack.c.bf16 %v883_v14, %v882_v13  ;;  %v836_v38 = vld [vmem:[#allocation2 + $0x7a] sm:$0xff]  ;;  %v837_v39 = vld [vmem:[#allocation2 + $0x82] sm:$0xff] }
 0x19b   : > { %3524 = vmatprep.subr.bf16.mxu0 %v3984_v58  ;;  %v4653_v41 = vpack.c.bf16 %v837_v39, %v836_v38  ;;  %v839_v44 = vld [vmem:[#allocation2 + $0x9a] sm:$0xff]  ;;  %v892_v61 = vld [vmem:[#allocation2 + $0xf0] sm:$0xff]  ;;  %v894_v3 = vld [vmem:[#allocation2 + $0x108] sm:$0xff] }
 0x19c   : > { %1803 = vmatmul.mubr.bf16.gmra.mrb[28].mxu1 %v4597_v23  ;;  %v4659_v50 = vpack.c.bf16 %v839_v44, %v838_v43  ;;  %v891_v53 = vld [vmem:[#allocation2 + $0xe0] sm:$0xff]  ;;  %v893_v62 = vld [vmem:[#allocation2 + $0xf8] sm:$0xff]  ;;  %v897_v31 = vld [vmem:[#allocation2 + $0x128] sm:$0xff] }
 0x19d   : > { %1956 = vmatmul.mubr.bf16.gmra.mrb[24].mxu0 %v4625_v6  ;;  %1810 = vmatprep.mubr.bf16.mxu1 %v4569_v42  ;;  %v3992_v42 = vld [vmem:[#allocation8 + $0x1b8] sm:$0xff]   ;;  %v4667_v57 = vpack.c.bf16 %v891_v53, %v890_v52  ;;  %v4678_v0 = vpack.c.bf16 %v893_v62, %v892_v61  ;;  %v847_v26 = vld [vmem:[#allocation2 + $0xfa] sm:$0xff]  ;;  %v849_v44 = vld [vmem:[#allocation2 + $0x112] sm:$0xff] }
 0x19e   : > { %1963 = vmatprep.mubr.bf16.mxu0 %v4630_v10  ;;  %3525 = vmatpush3.bf16.msra.mxu0 %v3985_v47  ;;  %v888_v45 = vld [vmem:[#allocation2 + $0xc0] sm:$0xff]  ;;  %v895_v47 = vld [vmem:[#allocation2 + $0x110] sm:$0xff]  ;;  %v898_v38 = vld [vmem:[#allocation2 + $0x138] sm:$0xff] }
 0x19f   : > { %3526 = vmatprep.subr.bf16.mxu0 %v3986_v9  ;;  %v886_v35 = vld [vmem:[#allocation2 + $0xa8] sm:$0xff]  ;;  %v844_v9 = vld [vmem:[#allocation2 + $0xda] sm:$0xff]  ;;  %v4683_v13 = vpack.c.bf16 %v895_v47, %v894_v3 }
 0x1a0   : > { %v889_v48 = vld [vmem:[#allocation2 + $0xc8] sm:$0xff]  ;;  %v896_v30 = vld [vmem:[#allocation2 + $0x120] sm:$0xff] }
 0x1a1   : > { %v887_v37 = vld [vmem:[#allocation2 + $0xb0] sm:$0xff]  ;;  %v4662_v51 = vpack.c.bf16 %v889_v48, %v888_v45  ;;  %v842_v59 = vld [vmem:[#allocation2 + $0xc2] sm:$0xff]  ;;  %v852_v3 = vld [vmem:[#allocation2 + $0x13a] sm:$0xff] }
 0x1a2   : > { %3527 = vmatpush3.bf16.msra.mxu0 %v3987_v11  ;;  %v4651_v40 = vpack.c.bf16 %v887_v37, %v886_v35  ;;  %v840_v46 = vld [vmem:[#allocation2 + $0xaa] sm:$0xff]  ;;  %v841_v54 = vld [vmem:[#allocation2 + $0xb2] sm:$0xff]  ;;  %v845_v11 = vld [vmem:[#allocation2 + $0xe2] sm:$0xff]  ;;  %v4698_v37 = vpack.c.bf16 %v897_v31, %v896_v30 }
 0x1a3   : > { %3528 = vmatprep.subr.bf16.mxu0 %v3989_v15  ;;  %v4669_v58 = vpack.c.bf16 %v841_v54, %v840_v46  ;;  %v843_v60 = vld [vmem:[#allocation2 + $0xca] sm:$0xff]  ;;  %v4685_v14 = vpack.c.bf16 %v845_v11, %v844_v9  ;;  %v3196_v15 = vpop.f32.mrb[16].mxu1  ;;  %v899_v39 = vld [vmem:[#allocation2 + $0x140] sm:$0xff]  ;;  %v901_v54 = vld [vmem:[#allocation2 + $0x158] sm:$0xff] }
 0x1a4   : > { %1811 = vmatmul.mubr.bf16.gmra.mrb[32].mxu1 %v4630_v10  ;;  %v4675_v63 = vpack.c.bf16 %v843_v60, %v842_v59  ;;  %v3197_v17 = vpop.f32.mrb[17].mxu1  ;;  %v848_v43 = vld [vmem:[#allocation2 + $0x10a] sm:$0xff]  ;;  %v4703_v45 = vpack.c.bf16 %v899_v39, %v898_v38  ;;  %v850_v52 = vld [vmem:[#allocation2 + $0x122] sm:$0xff]  ;;  %v857_v38 = vld [vmem:[#allocation2 + $0x172] sm:$0xff] }
 0x1a5   : > { %1964 = vmatmul.mubr.bf16.gmra.mrb[28].mxu0 %v4637_v22  ;;  %1818 = vmatprep.mubr.bf16.mxu1 %v4599_v25  ;;  %v4691_v18 = vadd.f32 %v3197_v17, %v3196_v15  ;;  %v4705_v48 = vpack.c.bf16 %v849_v44, %v848_v43  ;;  %v851_v53 = vld [vmem:[#allocation2 + $0x12a] sm:$0xff]  ;;  %v853_v47 = vld [vmem:[#allocation2 + $0x142] sm:$0xff]  ;;  %v854_v15 = vld [vmem:[#allocation2 + $0x152] sm:$0xff] }
 0x1a6   : > { %1971 = vmatprep.mubr.bf16.mxu0 %v4635_v19  ;;  %3529 = vmatpush3.bf16.msra.mxu0 %v3990_v20  ;;  %v3199_v20 = vpop.f32.mrb[18].mxu1  ;;  %v900_v46 = vld [vmem:[#allocation2 + $0x150] sm:$0xff]  ;;  %v4711_v59 = vpack.c.bf16 %v851_v53, %v850_v52  ;;  %v902_v61 = vld [vmem:[#allocation2 + $0x168] sm:$0xff]  ;;  %v4721_v11 = vpack.c.bf16 %v853_v47, %v852_v3  ;;  %v855_v17 = vld [vmem:[#allocation2 + $0x15a] sm:$0xff] }
 0x1a7   : > { %3530 = vmatprep.subr.bf16.mxu0 %v3991_v24  ;;  %v3200_v24 = vpop.f32.mrb[19].mxu1  ;;  %v4714_v60 = vpack.c.bf16 %v901_v54, %v900_v46  ;;  %v903_v62 = vld [vmem:[#allocation2 + $0x170] sm:$0xff]  ;;  %v923_v30 = vld [vmem:[#allocation2 + $0x21] sm:$0xff]  ;;  %v922_v39 = vld [vmem:[#allocation2 + $0x19] sm:$0xff] }
 0x1a8   : > { %v4693_v29 = vadd.f32 %v3200_v24, %v3199_v20  ;;  %v4719_v9 = vpack.c.bf16 %v903_v62, %v902_v61  ;;  %v904_v20 = vld [vmem:[#allocation2 + $0x180] sm:$0xff]  ;;  %v905_v24 = vld [vmem:[#allocation2 + $0x188] sm:$0xff]  ;;  %v954_v44 = vpack.c.bf16 %v923_v30, %v922_v39  ;;  %v1067_v53 = vld [vmem:[#allocation2 + $0x31] sm:$0xff] }
 0x1a9   : > { %v856_v31 = vld [vmem:[#allocation2 + $0x16a] sm:$0xff]  ;;  %v1068_v43 = vld [vmem:[#allocation2 + $0x39] sm:$0xff]  ;;  %v1071_v47 = vld [vmem:[#allocation2 + $0x61] sm:$0xff] }
 0x1aa   : > { %3531 = vmatpush3.bf16.msra.mxu0 %v3992_v42  ;;  %v846_v42 = vld [vmem:[#allocation2 + $0xf2] sm:$0xff]  ;;  %v4735_v52 = vpack.c.bf16 %v857_v38, %v856_v31  ;;  %v1099_v54 = vpack.c.bf16 %v1068_v43, %v1067_v53  ;;  %v1069_v61 = vld [vmem:[#allocation2 + $0x49] sm:$0xff] }
 0x1ab   : > { %v4695_v35 = vpack.c.bf16 %v847_v26, %v846_v42  ;;  %v4727_v42 = vpack.c.bf16 %v855_v17, %v854_v15  ;;  %v4730_v26 = vpack.c.bf16 %v905_v24, %v904_v20  ;;  %v3993_v46 = vld [vmem:[#allocation8 + $0x208] sm:$0xff]   ;;  %v3995_v62 = vld [vmem:[#allocation8 + $0x218] sm:$0xff]   ;;  %v1100_v3 = vpack.c.bf16 %v4567_v36, %v1069_v61  ;;  %v3998_v36 = vld [vmem:[#allocation8 + $0x230] sm:$0xff]  }
 0x1ac   : > { %1819 = vmatmul.mubr.bf16.gmra.mrb[36].mxu1 %v4635_v19  ;;  %v3997_v15 = vld [vmem:[#allocation8 + $0x228] sm:$0xff]   ;;  %v1000_v38 = vld [vmem:[#allocation2 + $0x182] sm:$0xff]  ;;  %v1001_v39 = vld [vmem:[#allocation2 + $0x18a] sm:$0xff] }
 0x1ad   : > { %1972 = vmatmul.mubr.bf16.gmra.mrb[32].mxu0 %v4643_v33  ;;  %1826 = vmatprep.mubr.bf16.mxu1 %v4595_v21 }
 0x1ae   : > { %1979 = vmatprep.mubr.bf16.mxu0 %v4646_v34 }
 0x1b4   : > { %1827 = vmatmul.mubr.bf16.gmra.mrb[40].mxu1 %v4646_v34 }
 0x1b5   : > { %1980 = vmatmul.mubr.bf16.gmra.mrb[36].mxu0 %v4653_v41  ;;  %1834 = vmatprep.mubr.bf16.mxu1 %v4621_v4 }
 0x1b6   : > { %1987 = vmatprep.mubr.bf16.mxu0 %v4651_v40 }
 0x1bc   : > { %1835 = vmatmul.mubr.bf16.gmra.mrb[44].mxu1 %v4651_v40 }
 0x1bd   : > { %1988 = vmatmul.mubr.bf16.gmra.mrb[40].mxu0 %v4659_v50  ;;  %1842 = vmatprep.mubr.bf16.mxu1 %v4619_v1 }
 0x1be   : > { %1995 = vmatprep.mubr.bf16.mxu0 %v4662_v51 }
 0x1c4   : > { %1843 = vmatmul.mubr.bf16.gmra.mrb[48].mxu1 %v4662_v51 }
 0x1c5   : > { %1996 = vmatmul.mubr.bf16.gmra.mrb[44].mxu0 %v4669_v58  ;;  %1850 = vmatprep.mubr.bf16.mxu1 %v4558_v16 }
 0x1c6   : > { %2003 = vmatprep.mubr.bf16.mxu0 %v4667_v57 }
 0x1cc   : > { %1851 = vmatmul.mubr.bf16.gmra.mrb[52].mxu1 %v4667_v57 }
 0x1cd   : > { %2004 = vmatmul.mubr.bf16.gmra.mrb[48].mxu0 %v4675_v63  ;;  %1858 = vmatprep.mubr.bf16.mxu1 %v4555_v12 }
 0x1ce   : > { %2011 = vmatprep.mubr.bf16.mxu0 %v4678_v0 }
 0x1d4   : > { %1859 = vmatmul.mubr.bf16.gmra.mrb[56].mxu1 %v4678_v0 }
 0x1d5   : > { %2012 = vmatmul.mubr.bf16.gmra.mrb[52].mxu0 %v4685_v14  ;;  %1866 = vmatprep.mubr.bf16.mxu1 %v4578_v55 }
 0x1d6   : > { %2019 = vmatprep.mubr.bf16.mxu0 %v4683_v13 }
 0x1dc   : > { %1867 = vmatmul.mubr.bf16.gmra.mrb[60].mxu1 %v4683_v13 }
 0x1dd   : > { %2020 = vmatmul.mubr.bf16.gmra.mrb[56].mxu0 %v4695_v35  ;;  %1874 = vmatprep.mubr.bf16.mxu1 %v4575_v49 }
 0x1de   : > { %2027 = vmatprep.mubr.bf16.mxu0 %v4698_v37 }
 0x1e4   : > { %1875 = vmatmul.mubr.bf16.gmra.mrb[64].mxu1 %v4698_v37 }
 0x1e5   : > { %2028 = vmatmul.mubr.bf16.gmra.mrb[60].mxu0 %v4705_v48  ;;  %1882 = vmatprep.mubr.bf16.mxu1 %v4606_v32 }
 0x1e6   : > { %2035 = vmatprep.mubr.bf16.mxu0 %v4703_v45 }
 0x1ec   : > { %1883 = vmatmul.mubr.bf16.gmra.mrb[68].mxu1 %v4703_v45 }
 0x1ed   : > { %2036 = vmatmul.mubr.bf16.gmra.mrb[64].mxu0 %v4711_v59  ;;  %1890 = vmatprep.mubr.bf16.mxu1 %v4601_v27 }
 0x1ee   : > { %2043 = vmatprep.mubr.bf16.mxu0 %v4714_v60 }
 0x1f4   : > { %1891 = vmatmul.mubr.bf16.gmra.mrb[72].mxu1 %v4714_v60 }
 0x1f5   : > { %2044 = vmatmul.mubr.bf16.gmra.mrb[68].mxu0 %v4721_v11  ;;  %1898 = vmatprep.mubr.bf16.mxu1 %v4627_v7 }
 0x1f6   : > { %2051 = vmatprep.mubr.bf16.mxu0 %v4719_v9 }
 0x1fc   : > { %1899 = vmatmul.mubr.bf16.gmra.mrb[76].mxu1 %v4719_v9 }
 0x1fd   : > { %2052 = vmatmul.mubr.bf16.gmra.mrb[72].mxu0 %v4727_v42  ;;  %2100 = vmatprep.mubr.bf16.mxu1 %v4603_v28  ;;  %v3994_v28 = vld [vmem:[#allocation8 + $0x210] sm:$0xff]  }
 0x1fe   : > { %2059 = vmatprep.mubr.bf16.mxu0 %v4730_v26 }
 0x204   : > { %2101 = vmatmul.mubr.bf16.vlgmr.msra.gmra.mrb[80].mxu1 %v954_v44 }
 0x205   : > { %2060 = vmatmul.mubr.bf16.gmra.mrb[76].mxu0 %v4735_v52  ;;  %3725 = vmatpush3.bf16.msra.mxu1 %v4549_v2  ;;  %v3996_v2 = vld [vmem:[#allocation8 + $0x220] sm:$0xff]  }
 0x206   : > { %2108 = vmatprep.mubr.bf16.mxu1 %v4625_v6  ;;  %2261 = vmatprep.mubr.bf16.mxu0 %v1099_v54  ;;  %v1072_v6 = vld [vmem:[#allocation2 + $0x69] sm:$0xff] }
 0x207   : > { %3726 = vmatprep.subr.bf16.mxu1 %v3993_v46  ;;  %v1101_v17 = vpack.c.bf16 %v1072_v6, %v1071_v47 }
 0x209   : > { %3727 = vmatpush3.bf16.msra.mxu1 %v3993_v46 }
 0x20a   : > { %3728 = vmatprep.subr.bf16.mxu1 %v3994_v28 }
 0x20c   : > { %2109 = vmatmul.mubr.bf16.gmra.mrb[84].mxu1 %v1099_v54 }
 0x20d   : > { %2262 = vmatmul.mubr.bf16.vlgmr.msra.gmra.mrb[80].mxu0 %v4580_v56  ;;  %2116 = vmatprep.mubr.bf16.mxu1 %v4637_v22  ;;  %v3999_v56 = vld [vmem:[#allocation8 + $0x238] sm:$0xff]  }
 0x20e   : > { %2269 = vmatprep.mubr.bf16.mxu0 %v1100_v3  ;;  %3729 = vmatpush3.bf16.msra.mxu1 %v3994_v28 }
 0x20f   : > { %3730 = vmatprep.subr.bf16.mxu1 %v3995_v62 }
 0x212   : > { %3731 = vmatpush3.bf16.msra.mxu1 %v3995_v62  ;;  %v4001_v62 = vld [vmem:[#allocation9 + $0x8] sm:$0xff]  }
 0x213   : > { %3732 = vmatprep.subr.bf16.mxu1 %v3996_v2 }
 0x214   : > { %2117 = vmatmul.mubr.bf16.gmra.mrb[88].mxu1 %v1100_v3 }
 0x215   : > { %2270 = vmatmul.mubr.bf16.gmra.mrb[84].mxu0 %v4597_v23  ;;  %2124 = vmatprep.mubr.bf16.mxu1 %v4643_v33  ;;  %v932_v23 = vld [vmem:[#allocation2 + $0x91] sm:$0xff] }
 0x216   : > { %2277 = vmatprep.mubr.bf16.mxu0 %v1101_v17  ;;  %3733 = vmatpush3.bf16.msra.mxu1 %v3996_v2  ;;  %v959_v22 = vpack.c.bf16 %v4590_v8, %v932_v23 }
 0x217   : > { %3734 = vmatprep.subr.bf16.mxu1 %v3997_v15 }
 0x21a   : > { %3735 = vmatpush3.bf16.msra.mxu1 %v3997_v15 }
 0x21b   : > { %3736 = vmatprep.subr.bf16.mxu1 %v3998_v36 }
 0x21c   : > { %2125 = vmatmul.mubr.bf16.gmra.mrb[92].mxu1 %v1101_v17  ;;  %v1097_v17 = vld [vmem:[#allocation2 + $0x199] sm:$0xff] }
 0x21d   : > { %2278 = vmatmul.mubr.bf16.gmra.mrb[88].mxu0 %v4630_v10  ;;  %2132 = vmatprep.mubr.bf16.mxu1 %v4653_v41 }
 0x21e   : > { %2285 = vmatprep.mubr.bf16.mxu0 %v4599_v25  ;;  %3737 = vmatpush3.bf16.msra.mxu1 %v3998_v36  ;;  %v1098_v36 = vld [vmem:[#allocation2 + $0x1a1] sm:$0xff] }
 0x21f   : > { %3738 = vmatprep.subr.bf16.mxu1 %v3999_v56 }
 0x222   : > { %3739 = vmatpush3.bf16.msra.mxu1 %v3999_v56 }
 0x224   : > { %2133 = vmatmul.mubr.bf16.gmra.mrb[96].mxu1 %v4599_v25 }
 0x225   : > { %2286 = vmatmul.mubr.bf16.gmra.mrb[92].mxu0 %v4635_v19  ;;  %2140 = vmatprep.mubr.bf16.mxu1 %v4659_v50 }
 0x226   : > { %2293 = vmatprep.mubr.bf16.mxu0 %v4595_v21 }
 0x22c   : > { %2141 = vmatmul.mubr.bf16.gmra.mrb[100].mxu1 %v959_v22  ;;  %v1115_v22 = vld [vmem:[#allocation2 + $0x32] sm:$0xff] }
 0x22d   : > { %2294 = vmatmul.mubr.bf16.gmra.mrb[96].mxu0 %v4646_v34  ;;  %2148 = vmatprep.mubr.bf16.mxu1 %v4669_v58 }
 0x22e   : > { %2301 = vmatprep.mubr.bf16.mxu0 %v4621_v4 }
 0x234   : > { %2149 = vmatmul.mubr.bf16.gmra.mrb[104].mxu1 %v4621_v4 }
 0x235   : > { %2302 = vmatmul.mubr.bf16.gmra.mrb[100].mxu0 %v4651_v40  ;;  %2156 = vmatprep.mubr.bf16.mxu1 %v4675_v63  ;;  %v4000_v40 = vld [vmem:[#allocation9] sm:$0xff]  }
 0x236   : > { %2309 = vmatprep.mubr.bf16.mxu0 %v4619_v1  ;;  %3772 = vmatprep.subr.bf16.mxu0 %v4000_v40 }
 0x237   : > { %3773 = vmatpush3.bf16.msra.mxu0 %v4000_v40 }
 0x238   : > { %3774 = vmatprep.subr.bf16.mxu0 %v4001_v62 }
 0x23b   : > { %3775 = vmatpush3.bf16.msra.mxu0 %v4001_v62  ;;  %v1123_v62 = vld [vmem:[#allocation2 + $0x92] sm:$0xff] }
 0x23c   : > { %2157 = vmatmul.mubr.bf16.gmra.mrb[108].mxu1 %v4619_v1 }
 0x23d   : > { %2310 = vmatmul.mubr.bf16.gmra.mrb[104].mxu0 %v4662_v51  ;;  %2164 = vmatprep.mubr.bf16.mxu1 %v4685_v14 }
 0x23e   : > { %2317 = vmatprep.mubr.bf16.mxu0 %v4558_v16 }
 0x244   : > { %2165 = vmatmul.mubr.bf16.gmra.mrb[112].mxu1 %v4558_v16 }
 0x245   : > { %2318 = vmatmul.mubr.bf16.gmra.mrb[108].mxu0 %v4667_v57  ;;  %2172 = vmatprep.mubr.bf16.mxu1 %v4695_v35 }
 0x246   : > { %2325 = vmatprep.mubr.bf16.mxu0 %v4555_v12 }
 0x24c   : > { %2173 = vmatmul.mubr.bf16.gmra.mrb[116].mxu1 %v4555_v12  ;;  %v4783_v12 = vld [vmem:[%s5189_s5] ss:$0 sm:$0xff] }
 0x24d   : > { %2326 = vmatmul.mubr.bf16.gmra.mrb[112].mxu0 %v4678_v0  ;;  %2180 = vmatprep.mubr.bf16.mxu1 %v4705_v48  ;;  %v1784_v41 = vadd.f32 %v4693_v29, %v4783_v12 }
 0x24e   : > { %2333 = vmatprep.mubr.bf16.mxu0 %v4578_v55 }
 0x254   : > { %2181 = vmatmul.mubr.bf16.gmra.mrb[120].mxu1 %v4578_v55 }
 0x255   : > { %2334 = vmatmul.mubr.bf16.gmra.mrb[116].mxu0 %v4683_v13  ;;  %2188 = vmatprep.mubr.bf16.mxu1 %v4711_v59 }
 0x256   : > { %2341 = vmatprep.mubr.bf16.mxu0 %v4575_v49 }
 0x25c   : > { %2189 = vmatmul.mubr.bf16.gmra.mrb[124].mxu1 %v4575_v49  ;;  %v1781_v49 = vadd.f32 %v4691_v18, %v4783_v12 }
 0x25d   : > { %2342 = vmatmul.mubr.bf16.gmra.mrb[120].mxu0 %v4698_v37  ;;  %2196 = vmatprep.mubr.bf16.mxu1 %v4721_v11 }
 0x25e   : > { %2349 = vmatprep.mubr.bf16.mxu0 %v4606_v32 }
 0x25f   : > { %v3202_v16 = vpop.f32.mrb[20].mxu1 }
 0x260   : > { %v3308_v55 = vpop.f32.mrb[16].mxu0  ;;  %v3203_v8 = vpop.f32.mrb[21].mxu1 }
 0x261   : > { %v3204_v21 = vadd.f32 %v3203_v8, %v3202_v16  ;;  %v3309_v25 = vpop.f32.mrb[17].mxu0  ;;  %v3205_v1 = vpop.f32.mrb[22].mxu1  ;;  %v1116_v16 = vld [vmem:[#allocation2 + $0x3a] sm:$0xff] }
 0x262   : > { %v3310_v4 = vadd.f32 %v3309_v25, %v3308_v55  ;;  %v3311_v10 = vpop.f32.mrb[18].mxu0  ;;  %v3206_v19 = vpop.f32.mrb[23].mxu1 }
 0x263   : > { %v3207_v33 = vadd.f32 %v3206_v19, %v3205_v1  ;;  %v3312_v34 = vpop.f32.mrb[19].mxu0  ;;  %v1789_v29 = vadd.f32 %v3204_v21, %v4783_v12  ;;  %v1147_v19 = vpack.c.bf16 %v1116_v16, %v1115_v22 }
 0x264   : > { %v4789_v50 = vadd.f32 %v3310_v4, %v1781_v49  ;;  %v3313_v51 = vadd.f32 %v3312_v34, %v3311_v10  ;;  %2197 = vmatmul.mubr.bf16.gmra.mrb[128].mxu1 %v4606_v32  ;;  %v1114_v49 = vpack.c.bf16 %v1098_v36, %v1097_v17 }
 0x265   : > { %2350 = vmatmul.mubr.bf16.gmra.mrb[124].mxu0 %v4703_v45  ;;  %2204 = vmatprep.mubr.bf16.mxu1 %v4727_v42  ;;  %v1792_v59 = vadd.f32 %v3207_v33, %v4783_v12 }
 0x266   : > { %v4794_v57 = vadd.f32 %v3313_v51, %v1784_v41  ;;  %2357 = vmatprep.mubr.bf16.mxu0 %v4601_v27  ;;  %v1049_v51 = vld [vmem:[#allocation2 + $0x198] sm:$0xff] }
 0x267   : > { %v3208_v58 = vpop.f32.mrb[24].mxu1 }
 0x268   : > { %v3314_v63 = vpop.f32.mrb[20].mxu0  ;;  %v3209_v0 = vpop.f32.mrb[25].mxu1 }
 0x269   : > { %v3210_v13 = vadd.f32 %v3209_v0, %v3208_v58  ;;  %v3315_v14 = vpop.f32.mrb[21].mxu0  ;;  %v3211_v18 = vpop.f32.mrb[26].mxu1  ;;  %v1118_v0 = vld [vmem:[#allocation2 + $0x52] sm:$0xff] }
 0x26a   : > { %v3316_v35 = vadd.f32 %v3315_v14, %v3314_v63  ;;  %v3317_v32 = vpop.f32.mrb[22].mxu0  ;;  %v3212_v37 = vpop.f32.mrb[27].mxu1  ;;  %v1117_v63 = vld [vmem:[#allocation2 + $0x4a] sm:$0xff] }
 0x26b   : > { %v3213_v45 = vadd.f32 %v3212_v37, %v3211_v18  ;;  %v3318_v48 = vpop.f32.mrb[23].mxu0  ;;  %v1797_v46 = vadd.f32 %v3210_v13, %v4783_v12  ;;  %v1119_v18 = vld [vmem:[#allocation2 + $0x62] sm:$0xff] }
 0x26c   : > { %v4799_v11 = vadd.f32 %v3316_v35, %v1789_v29  ;;  %v3319_v20 = vadd.f32 %v3318_v48, %v3317_v32  ;;  %2205 = vmatmul.mubr.bf16.gmra.mrb[132].mxu1 %v4601_v27  ;;  %v1120_v29 = vld [vmem:[#allocation2 + $0x6a] sm:$0xff] }
 0x26d   : > { %2358 = vmatmul.mubr.bf16.gmra.mrb[128].mxu0 %v4714_v60  ;;  %2212 = vmatprep.mubr.bf16.mxu1 %v4735_v52  ;;  %v4808_v52 = vpack.c.bf16 %v1001_v39, %v1000_v38  ;;  %v1800_v3 = vadd.f32 %v3213_v45, %v4783_v12  ;;  %v4008_v45 = vld [vmem:[#allocation2 + $0x8] sm:$0xff]  ;;  %v1149_v38 = vpack.c.bf16 %v1120_v29, %v1119_v18  ;;  %v4002_v39 = vld [vmem:[#allocation9 + $0x10] sm:$0xff]  }
 0x26e   : > { %v4804_v24 = vadd.f32 %v3319_v20, %v1792_v59  ;;  %2365 = vmatprep.mubr.bf16.mxu0 %v4627_v7  ;;  %v1066_v48 = vpack.c.bf16 %v4008_v45, %v1049_v51  ;;  %3776 = vmatprep.subr.bf16.mxu0 %v4002_v39  ;;  %v1128_v51 = vld [vmem:[#allocation2 + $0xca] sm:$0xff] }
 0x26f   : > { %v3214_v42 = vpop.f32.mrb[28].mxu1  ;;  %3777 = vmatpush3.bf16.msra.mxu0 %v4002_v39 }
 0x270   : > { %v3320_v30 = vpop.f32.mrb[24].mxu0  ;;  %v3215_v31 = vpop.f32.mrb[29].mxu1 }
 0x271   : > { %v3216_v43 = vadd.f32 %v3215_v31, %v3214_v42  ;;  %v3321_v44 = vpop.f32.mrb[25].mxu0  ;;  %v3217_v53 = vpop.f32.mrb[30].mxu1  ;;  %v1148_v42 = vpack.c.bf16 %v1118_v0, %v1117_v63 }
 0x272   : > { %v3322_v54 = vadd.f32 %v3321_v44, %v3320_v30  ;;  %v3323_v27 = vpop.f32.mrb[26].mxu0  ;;  %v3218_v28 = vpop.f32.mrb[31].mxu1 }
 0x273   : > { %v3219_v60 = vadd.f32 %v3218_v28, %v3217_v53  ;;  %v3324_v61 = vpop.f32.mrb[27].mxu0  ;;  %v1122_v28 = vld [vmem:[#allocation2 + $0x82] sm:$0xff] }
 0x274   : > { %v4811_v2 = vadd.f32 %v3322_v54, %v1797_v46  ;;  %v3325_v47 = vadd.f32 %v3324_v61, %v3323_v27  ;;  %2213 = vmatmul.mubr.bf16.gmra.mrb[136].mxu1 %v4627_v7  ;;  %v1121_v27 = vld [vmem:[#allocation2 + $0x7a] sm:$0xff] }
 0x275   : > { %2366 = vmatmul.mubr.bf16.gmra.mrb[132].mxu0 %v4719_v9  ;;  %2220 = vmatprep.mubr.bf16.mxu1 %v4808_v52  ;;  %v1805_v9 = vadd.f32 %v3216_v43, %v4783_v12  ;;  %v1808_v33 = vadd.f32 %v3219_v60, %v4783_v12  ;;  %v1150_v16 = vpack.c.bf16 %v1122_v28, %v1121_v27 }
 0x276   : > { %v4816_v6 = vadd.f32 %v3325_v47, %v1800_v3  ;;  %2373 = vmatprep.mubr.bf16.mxu0 %v4623_v5  ;;  %v1124_v3 = vld [vmem:[#allocation2 + $0x9a] sm:$0xff] }
 0x277   : > { %v3220_v15 = vpop.f32.mrb[32].mxu1 }
 0x278   : > { %v3326_v56 = vpop.f32.mrb[28].mxu0  ;;  %v3221_v23 = vpop.f32.mrb[33].mxu1 }
 0x279   : > { %v3222_v55 = vadd.f32 %v3221_v23, %v3220_v15  ;;  %v3327_v8 = vpop.f32.mrb[29].mxu0  ;;  %v3223_v7 = vpop.f32.mrb[34].mxu1 }
 0x27a   : > { %v3328_v21 = vadd.f32 %v3327_v8, %v3326_v56  ;;  %v3329_v25 = vpop.f32.mrb[30].mxu0  ;;  %v3224_v1 = vpop.f32.mrb[35].mxu1 }
 0x27b   : > { %v3225_v4 = vadd.f32 %v3224_v1, %v3223_v7  ;;  %v3330_v10 = vpop.f32.mrb[31].mxu0  ;;  %v1151_v7 = vpack.c.bf16 %v1124_v3, %v1123_v62 }
 0x27c   : > { %v4821_v34 = vadd.f32 %v3328_v21, %v1805_v9  ;;  %v3331_v40 = vadd.f32 %v3330_v10, %v3329_v25  ;;  %2221 = vmatmul.mubr.bf16.gmra.mrb[140].mxu1 %v4623_v5  ;;  %v1813_v5 = vadd.f32 %v3222_v55, %v4783_v12  ;;  %v1126_v10 = vld [vmem:[#allocation2 + $0xb2] sm:$0xff] }
 0x27d   : > { %2374 = vmatmul.mubr.bf16.gmra.mrb[136].mxu0 %v4730_v26  ;;  %3740 = vmatprep.mubr.bf16.mxu1 %v1147_v19  ;;  %v1816_v43 = vadd.f32 %v3225_v4, %v4783_v12  ;;  %v1125_v4 = vld [vmem:[#allocation2 + $0xaa] sm:$0xff] }
 0x27e   : > { %v4825_v41 = vadd.f32 %v3331_v40, %v1808_v33  ;;  %2381 = vmatprep.mubr.bf16.mxu0 %v1114_v49  ;;  %v1127_v40 = vld [vmem:[#allocation2 + $0xc2] sm:$0xff] }
 0x27f   : > { %v3226_v58 = vpop.f32.mrb[36].mxu1  ;;  %v1153_v45 = vpack.c.bf16 %v1128_v51, %v1127_v40 }
 0x280   : > { %v3332_v13 = vpop.f32.mrb[32].mxu0  ;;  %v3227_v14 = vpop.f32.mrb[37].mxu1 }
 0x281   : > { %v3228_v35 = vadd.f32 %v3227_v14, %v3226_v58  ;;  %v3333_v32 = vpop.f32.mrb[33].mxu0  ;;  %v3229_v37 = vpop.f32.mrb[38].mxu1 }
 0x282   : > { %v3334_v26 = vadd.f32 %v3333_v32, %v3332_v13  ;;  %v3335_v59 = vpop.f32.mrb[34].mxu0  ;;  %v3230_v20 = vpop.f32.mrb[39].mxu1 }
 0x283   : > { %v3231_v30 = vadd.f32 %v3230_v20, %v3229_v37  ;;  %v3336_v31 = vpop.f32.mrb[35].mxu0  ;;  %v1821_v36 = vadd.f32 %v3228_v35, %v4783_v12  ;;  %v1152_v35 = vpack.c.bf16 %v1126_v10, %v1125_v4  ;;  %v1136_v4 = vld [vmem:[#allocation2 + $0x12a] sm:$0xff] }
 0x284   : > { %v4829_v44 = vadd.f32 %v3334_v26, %v1813_v5  ;;  %v3337_v53 = vadd.f32 %v3336_v31, %v3335_v59  ;;  %3741 = vmatmul.mubr.bf16.vlgmr.msra.gmra.mrb[144].mxu1 %v1148_v42  ;;  %v1130_v31 = vld [vmem:[#allocation2 + $0xe2] sm:$0xff] }
 0x285   : > { %2382 = vmatmul.mubr.bf16.gmra.mrb[140].mxu0 %v1066_v48  ;;  %3744 = vmatprep.mubr.bf16.mxu1 %v1149_v38  ;;  %v1824_v9 = vadd.f32 %v3231_v30, %v4783_v12  ;;  %v4003_v48 = vld [vmem:[#allocation9 + $0x18] sm:$0xff]   ;;  %v1129_v30 = vld [vmem:[#allocation2 + $0xda] sm:$0xff] }
 0x286   : > { %v4831_v46 = vadd.f32 %v3337_v53, %v1816_v43  ;;  %3778 = vmatprep.subr.bf16.mxu0 %v4003_v48  ;;  %v1131_v43 = vld [vmem:[#allocation2 + $0xf2] sm:$0xff]  ;;  %v1132_v53 = vld [vmem:[#allocation2 + $0xfa] sm:$0xff] }
 0x287   : > { %v3232_v54 = vpop.f32.mrb[40].mxu1  ;;  %3779 = vmatpush3.bf16.msra.mxu0 %v4003_v48 }
 0x288   : > { %v3338_v60 = vpop.f32.mrb[36].mxu0  ;;  %v3233_v61 = vpop.f32.mrb[41].mxu1 }
 0x289   : > { %v3234_v47 = vadd.f32 %v3233_v61, %v3232_v54  ;;  %v3339_v15 = vpop.f32.mrb[37].mxu0  ;;  %v3235_v17 = vpop.f32.mrb[42].mxu1 }
 0x28a   : > { %v3340_v56 = vadd.f32 %v3339_v15, %v3338_v60  ;;  %v3341_v23 = vpop.f32.mrb[38].mxu0  ;;  %v3236_v22 = vpop.f32.mrb[43].mxu1 }
 0x28b   : > { %v3237_v55 = vadd.f32 %v3236_v22, %v3235_v17  ;;  %v3342_v8 = vpop.f32.mrb[39].mxu0  ;;  %v1829_v13 = vadd.f32 %v3234_v47, %v4783_v12  ;;  %v1154_v47 = vpack.c.bf16 %v1130_v31, %v1129_v30  ;;  %v1139_v31 = vld [vmem:[#allocation2 + $0x152] sm:$0xff] }
 0x28c   : > { %v4835_v21 = vadd.f32 %v3340_v56, %v1821_v36  ;;  %v3343_v25 = vadd.f32 %v3342_v8, %v3341_v23  ;;  %3745 = vmatmul.mubr.bf16.gmra.mrb[148].mxu1 %v1150_v16  ;;  %v1155_v36 = vpack.c.bf16 %v1132_v53, %v1131_v43  ;;  %v1133_v8 = vld [vmem:[#allocation2 + $0x10a] sm:$0xff] }
 0x28d   : > { %3748 = vmatprep.mubr.bf16.mxu1 %v1151_v7  ;;  %v1832_v5 = vadd.f32 %v3237_v55, %v4783_v12  ;;  %v1134_v7 = vld [vmem:[#allocation2 + $0x112] sm:$0xff] }
 0x28e   : > { %v4837_v1 = vadd.f32 %v3343_v25, %v1824_v9 }
 0x28f   : > { %v3238_v49 = vpop.f32.mrb[44].mxu1 }
 0x290   : > { %v3344_v19 = vpop.f32.mrb[40].mxu0  ;;  %v3239_v33 = vpop.f32.mrb[45].mxu1 }
 0x291   : > { %v3240_v58 = vadd.f32 %v3239_v33, %v3238_v49  ;;  %v3345_v63 = vpop.f32.mrb[41].mxu0  ;;  %v3241_v0 = vpop.f32.mrb[46].mxu1  ;;  %v1135_v49 = vld [vmem:[#allocation2 + $0x122] sm:$0xff] }
 0x292   : > { %v3346_v14 = vadd.f32 %v3345_v63, %v3344_v19  ;;  %v3347_v18 = vpop.f32.mrb[42].mxu0  ;;  %v3242_v29 = vpop.f32.mrb[47].mxu1 }
 0x293   : > { %v3243_v32 = vadd.f32 %v3242_v29, %v3241_v0  ;;  %v3348_v37 = vpop.f32.mrb[43].mxu0  ;;  %v1837_v60 = vadd.f32 %v3240_v58, %v4783_v12  ;;  %v1156_v0 = vpack.c.bf16 %v1134_v7, %v1133_v8  ;;  %v4004_v29 = vld [vmem:[#allocation9 + $0x20] sm:$0xff]  }
 0x294   : > { %v4841_v26 = vadd.f32 %v3346_v14, %v1829_v13  ;;  %v3349_v59 = vadd.f32 %v3348_v37, %v3347_v18  ;;  %3749 = vmatmul.mubr.bf16.gmra.mrb[152].mxu1 %v1152_v35  ;;  %v1157_v18 = vpack.c.bf16 %v1136_v4, %v1135_v49  ;;  %3780 = vmatprep.subr.bf16.mxu0 %v4004_v29  ;;  %v1142_v8 = vld [vmem:[#allocation2 + $0x172] sm:$0xff] }
 0x295   : > { %3752 = vmatprep.mubr.bf16.mxu1 %v1153_v45  ;;  %v1840_v56 = vadd.f32 %v3243_v32, %v4783_v12  ;;  %3781 = vmatpush3.bf16.msra.mxu0 %v4004_v29  ;;  %v1145_v29 = vld [vmem:[#allocation2 + $0x19a] sm:$0xff] }
 0x296   : > { %v4843_v20 = vadd.f32 %v3349_v59, %v1832_v5  ;;  %v1137_v5 = vld [vmem:[#allocation2 + $0x13a] sm:$0xff]  ;;  %v1138_v59 = vld [vmem:[#allocation2 + $0x142] sm:$0xff] }
 0x297   : > { %v3244_v42 = vpop.f32.mrb[48].mxu1 }
 0x298   : > { %v3350_v38 = vpop.f32.mrb[44].mxu0  ;;  %v3245_v39 = vpop.f32.mrb[49].mxu1 }
 0x299   : > { %v3246_v54 = vadd.f32 %v3245_v39, %v3244_v42  ;;  %v3351_v27 = vpop.f32.mrb[45].mxu0  ;;  %v3247_v28 = vpop.f32.mrb[50].mxu1 }
 0x29a   : > { %v3352_v61 = vadd.f32 %v3351_v27, %v3350_v38  ;;  %v3353_v62 = vpop.f32.mrb[46].mxu0  ;;  %v3248_v3 = vpop.f32.mrb[51].mxu1  ;;  %v1140_v38 = vld [vmem:[#allocation2 + $0x15a] sm:$0xff] }
 0x29b   : > { %v3249_v15 = vadd.f32 %v3248_v3, %v3247_v28  ;;  %v3354_v17 = vpop.f32.mrb[47].mxu0  ;;  %v1845_v40 = vadd.f32 %v3246_v54, %v4783_v12 }
 0x29c   : > { %v4847_v23 = vadd.f32 %v3352_v61, %v1837_v60  ;;  %v3355_v22 = vadd.f32 %v3354_v17, %v3353_v62  ;;  %3753 = vmatmul.mubr.bf16.gmra.mrb[156].mxu1 %v1154_v47  ;;  %v1158_v61 = vpack.c.bf16 %v1138_v59, %v1137_v5  ;;  %v1159_v47 = vpack.c.bf16 %v1140_v38, %v1139_v31 }
 0x29d   : > { %3756 = vmatprep.mubr.bf16.mxu1 %v1155_v36  ;;  %v1848_v35 = vadd.f32 %v3249_v15, %v4783_v12 }
 0x29e   : > { %v4849_v16 = vadd.f32 %v3355_v22, %v1840_v56 }
 0x29f   : > { %v3250_v55 = vpop.f32.mrb[52].mxu1 }
 0x2a0   : > { %v3356_v9 = vpop.f32.mrb[48].mxu0  ;;  %v3251_v25 = vpop.f32.mrb[53].mxu1 }
 0x2a1   : > { %v3252_v10 = vadd.f32 %v3251_v25, %v3250_v55  ;;  %v3357_v19 = vpop.f32.mrb[49].mxu0  ;;  %v3253_v33 = vpop.f32.mrb[54].mxu1  ;;  %v1141_v55 = vld [vmem:[#allocation2 + $0x16a] sm:$0xff] }
 0x2a2   : > { %v3358_v51 = vadd.f32 %v3357_v19, %v3356_v9  ;;  %v3359_v58 = vpop.f32.mrb[50].mxu0  ;;  %v3254_v63 = vpop.f32.mrb[55].mxu1 }
 0x2a3   : > { %v3255_v13 = vadd.f32 %v3254_v63, %v3253_v33  ;;  %v3360_v14 = vpop.f32.mrb[51].mxu0  ;;  %v1853_v54 = vadd.f32 %v3252_v10, %v4783_v12 }
 0x2a4   : > { %v4853_v32 = vadd.f32 %v3358_v51, %v1845_v40  ;;  %v3361_v37 = vadd.f32 %v3360_v14, %v3359_v58  ;;  %3757 = vmatmul.mubr.bf16.gmra.mrb[160].mxu1 %v1156_v0  ;;  %v1160_v51 = vpack.c.bf16 %v1142_v8, %v1141_v55  ;;  %v4005_v0 = vld [vmem:[#allocation9 + $0x28] sm:$0xff]  }
 0x2a5   : > { %3760 = vmatprep.mubr.bf16.mxu1 %v1157_v18  ;;  %v1856_v15 = vadd.f32 %v3255_v13, %v4783_v12  ;;  %3782 = vmatprep.subr.bf16.mxu0 %v4005_v0 }
 0x2a6   : > { %v4855_v45 = vadd.f32 %v3361_v37, %v1848_v35  ;;  %v1146_v35 = vld [vmem:[#allocation2 + $0x1a2] sm:$0xff]  ;;  %3783 = vmatpush3.bf16.msra.mxu0 %v4005_v0 }
 0x2a7   : > { %v3256_v48 = vpop.f32.mrb[56].mxu1 }
 0x2a8   : > { %v3362_v42 = vpop.f32.mrb[52].mxu0  ;;  %v3257_v30 = vpop.f32.mrb[57].mxu1 }
 0x2a9   : > { %v3258_v39 = vadd.f32 %v3257_v30, %v3256_v48  ;;  %v3363_v43 = vpop.f32.mrb[53].mxu0  ;;  %v3259_v53 = vpop.f32.mrb[58].mxu1 }
 0x2aa   : > { %v3364_v27 = vadd.f32 %v3363_v43, %v3362_v42  ;;  %v3365_v28 = vpop.f32.mrb[54].mxu0  ;;  %v3260_v60 = vpop.f32.mrb[59].mxu1  ;;  %v1162_v42 = vpack.c.bf16 %v1146_v35, %v1145_v29 }
 0x2ab   : > { %v3261_v62 = vadd.f32 %v3260_v60, %v3259_v53  ;;  %v3366_v3 = vpop.f32.mrb[55].mxu0  ;;  %v1861_v10 = vadd.f32 %v3258_v39, %v4783_v12 }
 0x2ac   : > { %v4859_v17 = vadd.f32 %v3364_v27, %v1853_v54  ;;  %v3367_v36 = vadd.f32 %v3366_v3, %v3365_v28  ;;  %3761 = vmatmul.mubr.bf16.gmra.mrb[164].mxu1 %v1158_v61 }
 0x2ad   : > { %3764 = vmatprep.mubr.bf16.mxu1 %v1159_v47  ;;  %v1864_v13 = vadd.f32 %v3261_v62, %v4783_v12 }
 0x2ae   : > { %v4861_v56 = vadd.f32 %v3367_v36, %v1856_v15 }
 0x2af   : > { %v3262_v22 = vpop.f32.mrb[60].mxu1 }
 0x2b0   : > { %v3368_v7 = vpop.f32.mrb[56].mxu0  ;;  %v3263_v9 = vpop.f32.mrb[61].mxu1 }
 0x2b1   : > { %v3264_v25 = vadd.f32 %v3263_v9, %v3262_v22  ;;  %v3369_v49 = vpop.f32.mrb[57].mxu0  ;;  %v3265_v4 = vpop.f32.mrb[62].mxu1 }
 0x2b2   : > { %v3370_v19 = vadd.f32 %v3369_v49, %v3368_v7  ;;  %v3371_v33 = vpop.f32.mrb[58].mxu0  ;;  %v3266_v40 = vpop.f32.mrb[63].mxu1 }
 0x2b3   : > { %v3267_v58 = vadd.f32 %v3266_v40, %v3265_v4  ;;  %v3372_v63 = vpop.f32.mrb[59].mxu0  ;;  %v1869_v39 = vadd.f32 %v3264_v25, %v4783_v12 }
 0x2b4   : > { %v4865_v14 = vadd.f32 %v3370_v19, %v1861_v10  ;;  %v3373_v18 = vadd.f32 %v3372_v63, %v3371_v33  ;;  %3765 = vmatmul.mubr.bf16.gmra.mrb[168].mxu1 %v1160_v51  ;;  %v4006_v10 = vld [vmem:[#allocation9 + $0x30] sm:$0xff]  }
 0x2b5   : > { %3768 = vmatprep.mubr.bf16.mxu1 %v4808_v52  ;;  %v1872_v28 = vadd.f32 %v3267_v58, %v4783_v12  ;;  %3784 = vmatprep.subr.bf16.mxu0 %v4006_v10 }
 0x2b6   : > { %v4868_v37 = vadd.f32 %v3373_v18, %v1864_v13  ;;  %3785 = vmatpush3.bf16.msra.mxu0 %v4006_v10 }
 0x2b7   : > { %v3268_v48 = vpop.f32.mrb[64].mxu1 }
 0x2b8   : > { %v3374_v5 = vpop.f32.mrb[60].mxu0  ;;  %v3269_v59 = vpop.f32.mrb[65].mxu1 }
 0x2b9   : > { %v3270_v30 = vadd.f32 %v3269_v59, %v3268_v48  ;;  %v3375_v31 = vpop.f32.mrb[61].mxu0  ;;  %v3271_v38 = vpop.f32.mrb[66].mxu1 }
 0x2ba   : > { %v3376_v43 = vadd.f32 %v3375_v31, %v3374_v5  ;;  %v3377_v53 = vpop.f32.mrb[62].mxu0  ;;  %v3272_v54 = vpop.f32.mrb[67].mxu1 }
 0x2bb   : > { %v3273_v27 = vadd.f32 %v3272_v54, %v3271_v38  ;;  %v3378_v52 = vpop.f32.mrb[63].mxu0  ;;  %v1877_v8 = vadd.f32 %v3270_v30, %v4783_v12 }
 0x2bc   : > { %v4872_v60 = vadd.f32 %v3376_v43, %v1869_v39  ;;  %v3379_v61 = vadd.f32 %v3378_v52, %v3377_v53  ;;  %3769 = vmatmul.mubr.bf16.gmra.mrb[172].mxu1 %v1162_v42 }
 0x2bd   : > { %v1880_v19 = vadd.f32 %v3273_v27, %v4783_v12 }
 0x2be   : > { %v4874_v62 = vadd.f32 %v3379_v61, %v1872_v28 }
 0x2bf   : > { %v3274_v3 = vpop.f32.mrb[68].mxu1 }
 0x2c0   : > { %v3380_v47 = vpop.f32.mrb[64].mxu0  ;;  %v3275_v15 = vpop.f32.mrb[69].mxu1 }
 0x2c1   : > { %v3276_v36 = vadd.f32 %v3275_v15, %v3274_v3  ;;  %v3381_v22 = vpop.f32.mrb[65].mxu0  ;;  %v3277_v55 = vpop.f32.mrb[70].mxu1 }
 0x2c2   : > { %v3382_v7 = vadd.f32 %v3381_v22, %v3380_v47  ;;  %v3383_v9 = vpop.f32.mrb[66].mxu0  ;;  %v3278_v25 = vpop.f32.mrb[71].mxu1 }
 0x2c3   : > { %v3279_v49 = vadd.f32 %v3278_v25, %v3277_v55  ;;  %v3384_v4 = vpop.f32.mrb[67].mxu0  ;;  %v1885_v35 = vadd.f32 %v3276_v36, %v4783_v12 }
 0x2c4   : > { %v4878_v33 = vadd.f32 %v3382_v7, %v1877_v8  ;;  %v3385_v40 = vadd.f32 %v3384_v4, %v3383_v9  ;;  %v4007_v8 = vld [vmem:[#allocation9 + $0x38] sm:$0xff]  }
 0x2c5   : > { %v1888_v31 = vadd.f32 %v3279_v49, %v4783_v12  ;;  %3786 = vmatprep.subr.bf16.mxu0 %v4007_v8 }
 0x2c6   : > { %v4880_v51 = vadd.f32 %v3385_v40, %v1880_v19  ;;  %3787 = vmatpush3.bf16.msra.mxu0 %v4007_v8 }
 0x2c7   : > { %v3280_v58 = vpop.f32.mrb[72].mxu1 }
 0x2c8   : > { %v3386_v63 = vpop.f32.mrb[68].mxu0  ;;  %v3281_v0 = vpop.f32.mrb[73].mxu1 }
 0x2c9   : > { %v3282_v13 = vadd.f32 %v3281_v0, %v3280_v58  ;;  %v3387_v18 = vpop.f32.mrb[69].mxu0  ;;  %v3283_v29 = vpop.f32.mrb[74].mxu1 }
 0x2ca   : > { %v3388_v48 = vadd.f32 %v3387_v18, %v3386_v63  ;;  %v3389_v5 = vpop.f32.mrb[70].mxu0  ;;  %v3284_v59 = vpop.f32.mrb[75].mxu1 }
 0x2cb   : > { %v3285_v42 = vadd.f32 %v3284_v59, %v3283_v29  ;;  %v3390_v30 = vpop.f32.mrb[71].mxu0  ;;  %v1893_v3 = vadd.f32 %v3282_v13, %v4783_v12 }
 0x2cc   : > { %v4884_v38 = vadd.f32 %v3388_v48, %v1885_v35  ;;  %v3391_v39 = vadd.f32 %v3390_v30, %v3389_v5 }
 0x2cd   : > { %v1896_v7 = vadd.f32 %v3285_v42, %v4783_v12 }
 0x2ce   : > { %v4886_v43 = vadd.f32 %v3391_v39, %v1888_v31 }
 0x2cf   : > { %v3286_v53 = vpop.f32.mrb[76].mxu1 }
 0x2d0   : > { %v3392_v54 = vpop.f32.mrb[72].mxu0  ;;  %v3287_v27 = vpop.f32.mrb[77].mxu1 }
 0x2d1   : > { %v3288_v52 = vadd.f32 %v3287_v27, %v3286_v53  ;;  %v3393_v28 = vpop.f32.mrb[73].mxu0  ;;  %v3289_v61 = vpop.f32.mrb[78].mxu1 }
 0x2d2   : > { %v3394_v47 = vadd.f32 %v3393_v28, %v3392_v54  ;;  %v3395_v15 = vpop.f32.mrb[74].mxu0  ;;  %v3290_v36 = vpop.f32.mrb[79].mxu1 }
 0x2d3   : > { %v3291_v22 = vadd.f32 %v3290_v36, %v3289_v61  ;;  %v3396_v55 = vpop.f32.mrb[75].mxu0  ;;  %v1901_v0 = vadd.f32 %v3288_v52, %v4783_v12 }
 0x2d4   : > { %v4890_v9 = vadd.f32 %v3394_v47, %v1893_v3  ;;  %v3397_v25 = vadd.f32 %v3396_v55, %v3395_v15 }
 0x2d5   : > { %v1904_v59 = vadd.f32 %v3291_v22, %v4783_v12 }
 0x2d6   : > { %v4892_v49 = vadd.f32 %v3397_v25, %v1896_v7 }
 0x2d7   : > { %v3420_v4 = vpop.f32.mrb[80].mxu1 }
 0x2d8   : > { %v3398_v10 = vpop.f32.mrb[76].mxu0  ;;  %v3421_v19 = vpop.f32.mrb[81].mxu1 }
 0x2d9   : > { %v3399_v40 = vpop.f32.mrb[77].mxu0  ;;  %v3422_v58 = vadd.f32 %v3421_v19, %v3420_v4  ;;  %v3423_v63 = vpop.f32.mrb[82].mxu1 }
 0x2da   : > { %v3400_v13 = vadd.f32 %v3399_v40, %v3398_v10  ;;  %v3401_v18 = vpop.f32.mrb[78].mxu0  ;;  %v3424_v29 = vpop.f32.mrb[83].mxu1 }
 0x2db   : > { %v2103_v35 = vadd.f32 %v3422_v58, %v4789_v50  ;;  %v3402_v48 = vpop.f32.mrb[79].mxu0  ;;  %v3425_v5 = vadd.f32 %v3424_v29, %v3423_v63 }
 0x2dc   : > { %v4897_v42 = vadd.f32 %v3400_v13, %v1901_v0  ;;  %v3403_v30 = vadd.f32 %v3402_v48, %v3401_v18 }
 0x2dd   : > { %v2106_v31 = vadd.f32 %v3425_v5, %v4794_v57 }
 0x2de   : > { %v4900_v39 = vadd.f32 %v3403_v30, %v1904_v59 }
 0x2df   : > { %v3426_v53 = vpop.f32.mrb[84].mxu1 }
 0x2e0   : > { %v3532_v54 = vpop.f32.mrb[80].mxu0  ;;  %v3427_v27 = vpop.f32.mrb[85].mxu1 }
 0x2e1   : > { %v3428_v52 = vadd.f32 %v3427_v27, %v3426_v53  ;;  %v3533_v28 = vpop.f32.mrb[81].mxu0  ;;  %v3429_v61 = vpop.f32.mrb[86].mxu1 }
 0x2e2   : > { %v3534_v3 = vadd.f32 %v3533_v28, %v3532_v54  ;;  %v3535_v47 = vpop.f32.mrb[82].mxu0  ;;  %v3430_v50 = vpop.f32.mrb[87].mxu1 }
 0x2e3   : > { %v2111_v15 = vadd.f32 %v3428_v52, %v4799_v11  ;;  %v3431_v36 = vadd.f32 %v3430_v50, %v3429_v61  ;;  %v3536_v12 = vpop.f32.mrb[83].mxu0 }
 0x2e4   : > { %v3537_v22 = vadd.f32 %v3536_v12, %v3535_v47  ;;  %v4903_v55 = vadd.f32 %v3534_v3, %v2103_v35 }
 0x2e5   : > { %v2114_v57 = vadd.f32 %v3431_v36, %v4804_v24 }
 0x2e6   : > { %v4906_v8 = vadd.f32 %v3537_v22, %v2106_v31 }
 0x2e7   : > { %v3432_v7 = vpop.f32.mrb[88].mxu1 }
 0x2e8   : > { %v3538_v25 = vpop.f32.mrb[84].mxu0  ;;  %v3433_v4 = vpop.f32.mrb[89].mxu1 }
 0x2e9   : > { %v3434_v10 = vadd.f32 %v3433_v4, %v3432_v7  ;;  %v3539_v19 = vpop.f32.mrb[85].mxu0  ;;  %v3435_v40 = vpop.f32.mrb[90].mxu1 }
 0x2ea   : > { %v3540_v58 = vadd.f32 %v3539_v19, %v3538_v25  ;;  %v3541_v63 = vpop.f32.mrb[86].mxu0  ;;  %v3436_v0 = vpop.f32.mrb[91].mxu1 }
 0x2eb   : > { %v2119_v11 = vadd.f32 %v3434_v10, %v4811_v2  ;;  %v3437_v13 = vadd.f32 %v3436_v0, %v3435_v40  ;;  %v3542_v18 = vpop.f32.mrb[87].mxu0 }
 0x2ec   : > { %v3543_v29 = vadd.f32 %v3542_v18, %v3541_v63  ;;  %v4909_v35 = vadd.f32 %v3540_v58, %v2111_v15 }
 0x2ed   : > { %v2122_v24 = vadd.f32 %v3437_v13, %v4816_v6 }
 0x2ee   : > { %v4912_v48 = vadd.f32 %v3543_v29, %v2114_v57 }
 0x2ef   : > { %v3438_v5 = vpop.f32.mrb[92].mxu1 }
 0x2f0   : > { %v3544_v59 = vpop.f32.mrb[88].mxu0  ;;  %v3439_v30 = vpop.f32.mrb[93].mxu1 }
 0x2f1   : > { %v3440_v31 = vadd.f32 %v3439_v30, %v3438_v5  ;;  %v3545_v53 = vpop.f32.mrb[89].mxu0  ;;  %v3441_v54 = vpop.f32.mrb[94].mxu1 }
 0x2f2   : > { %v3546_v27 = vadd.f32 %v3545_v53, %v3544_v59  ;;  %v3547_v52 = vpop.f32.mrb[90].mxu0  ;;  %v3442_v28 = vpop.f32.mrb[95].mxu1 }
 0x2f3   : > { %v2127_v2 = vadd.f32 %v3440_v31, %v4821_v34  ;;  %v3443_v61 = vadd.f32 %v3442_v28, %v3441_v54  ;;  %v3548_v3 = vpop.f32.mrb[91].mxu0 }
 0x2f4   : > { %v3549_v47 = vadd.f32 %v3548_v3, %v3547_v52  ;;  %v4915_v50 = vadd.f32 %v3546_v27, %v2119_v11 }
 0x2f5   : > { %v2130_v6 = vadd.f32 %v3443_v61, %v4825_v41 }
 0x2f6   : > { %v4918_v15 = vadd.f32 %v3549_v47, %v2122_v24 }
 0x2f7   : > { %v3444_v36 = vpop.f32.mrb[96].mxu1 }
 0x2f8   : > { %v3550_v12 = vpop.f32.mrb[92].mxu0  ;;  %v3445_v22 = vpop.f32.mrb[97].mxu1 }
 0x2f9   : > { %v3446_v57 = vadd.f32 %v3445_v22, %v3444_v36  ;;  %v3551_v7 = vpop.f32.mrb[93].mxu0  ;;  %v3447_v25 = vpop.f32.mrb[98].mxu1 }
 0x2fa   : > { %v3552_v4 = vadd.f32 %v3551_v7, %v3550_v12  ;;  %v3553_v10 = vpop.f32.mrb[94].mxu0  ;;  %v3448_v19 = vpop.f32.mrb[99].mxu1 }
 0x2fb   : > { %v2135_v34 = vadd.f32 %v3446_v57, %v4829_v44  ;;  %v3449_v40 = vadd.f32 %v3448_v19, %v3447_v25  ;;  %v3554_v58 = vpop.f32.mrb[95].mxu0 }
 0x2fc   : > { %v3555_v63 = vadd.f32 %v3554_v58, %v3553_v10  ;;  %v4921_v0 = vadd.f32 %v3552_v4, %v2127_v2 }
 0x2fd   : > { %v2138_v41 = vadd.f32 %v3449_v40, %v4831_v46 }
 0x2fe   : > { %v4924_v11 = vadd.f32 %v3555_v63, %v2130_v6 }
 0x2ff   : > { %v3450_v13 = vpop.f32.mrb[100].mxu1 }
 0x300   : > { %v3556_v18 = vpop.f32.mrb[96].mxu0  ;;  %v3451_v29 = vpop.f32.mrb[101].mxu1 }
 0x301   : > { %v3452_v24 = vadd.f32 %v3451_v29, %v3450_v13  ;;  %v3557_v5 = vpop.f32.mrb[97].mxu0  ;;  %v3453_v59 = vpop.f32.mrb[102].mxu1 }
 0x302   : > { %v3558_v30 = vadd.f32 %v3557_v5, %v3556_v18  ;;  %v3559_v31 = vpop.f32.mrb[98].mxu0  ;;  %v3454_v53 = vpop.f32.mrb[103].mxu1 }
 0x303   : > { %v2143_v44 = vadd.f32 %v3452_v24, %v4835_v21  ;;  %v3455_v54 = vadd.f32 %v3454_v53, %v3453_v59  ;;  %v3560_v27 = vpop.f32.mrb[99].mxu0 }
 0x304   : > { %v3561_v52 = vadd.f32 %v3560_v27, %v3559_v31  ;;  %v4927_v28 = vadd.f32 %v3558_v30, %v2135_v34 }
 0x305   : > { %v2146_v46 = vadd.f32 %v3455_v54, %v4837_v1 }
 0x306   : > { %v4930_v2 = vadd.f32 %v3561_v52, %v2138_v41 }
 0x307   : > { %v3456_v61 = vpop.f32.mrb[104].mxu1 }
 0x308   : > { %v3562_v3 = vpop.f32.mrb[100].mxu0  ;;  %v3457_v47 = vpop.f32.mrb[105].mxu1 }
 0x309   : > { %v3458_v6 = vadd.f32 %v3457_v47, %v3456_v61  ;;  %v3563_v36 = vpop.f32.mrb[101].mxu0  ;;  %v3459_v12 = vpop.f32.mrb[106].mxu1 }
 0x30a   : > { %v3564_v22 = vadd.f32 %v3563_v36, %v3562_v3  ;;  %v3565_v57 = vpop.f32.mrb[102].mxu0  ;;  %v3460_v7 = vpop.f32.mrb[107].mxu1 }
 0x30b   : > { %v2151_v21 = vadd.f32 %v3458_v6, %v4841_v26  ;;  %v3461_v25 = vadd.f32 %v3460_v7, %v3459_v12  ;;  %v3566_v4 = vpop.f32.mrb[103].mxu0 }
 0x30c   : > { %v3567_v10 = vadd.f32 %v3566_v4, %v3565_v57  ;;  %v4933_v19 = vadd.f32 %v3564_v22, %v2143_v44 }
 0x30d   : > { %v2154_v1 = vadd.f32 %v3461_v25, %v4843_v20 }
 0x30e   : > { %v4936_v34 = vadd.f32 %v3567_v10, %v2146_v46 }
 0x30f   : > { %v3462_v40 = vpop.f32.mrb[108].mxu1 }
 0x310   : > { %v3568_v58 = vpop.f32.mrb[104].mxu0  ;;  %v3463_v63 = vpop.f32.mrb[109].mxu1 }
 0x311   : > { %v3464_v41 = vadd.f32 %v3463_v63, %v3462_v40  ;;  %v3569_v13 = vpop.f32.mrb[105].mxu0  ;;  %v3465_v18 = vpop.f32.mrb[110].mxu1 }
 0x312   : > { %v3570_v29 = vadd.f32 %v3569_v13, %v3568_v58  ;;  %v3571_v24 = vpop.f32.mrb[106].mxu0  ;;  %v3466_v5 = vpop.f32.mrb[111].mxu1 }
 0x313   : > { %v2159_v26 = vadd.f32 %v3464_v41, %v4847_v23  ;;  %v3467_v59 = vadd.f32 %v3466_v5, %v3465_v18  ;;  %v3572_v30 = vpop.f32.mrb[107].mxu0 }
 0x314   : > { %v3573_v31 = vadd.f32 %v3572_v30, %v3571_v24  ;;  %v4939_v53 = vadd.f32 %v3570_v29, %v2151_v21 }
 0x315   : > { %v2162_v20 = vadd.f32 %v3467_v59, %v4849_v16 }
 0x316   : > { %v4942_v44 = vadd.f32 %v3573_v31, %v2154_v1 }
 0x317   : > { %v3468_v54 = vpop.f32.mrb[112].mxu1 }
 0x318   : > { %v3574_v27 = vpop.f32.mrb[108].mxu0  ;;  %v3469_v52 = vpop.f32.mrb[113].mxu1 }
 0x319   : > { %v3470_v46 = vadd.f32 %v3469_v52, %v3468_v54  ;;  %v3575_v61 = vpop.f32.mrb[109].mxu0  ;;  %v3471_v3 = vpop.f32.mrb[114].mxu1 }
 0x31a   : > { %v3576_v47 = vadd.f32 %v3575_v61, %v3574_v27  ;;  %v3577_v6 = vpop.f32.mrb[110].mxu0  ;;  %v3472_v36 = vpop.f32.mrb[115].mxu1 }
 0x31b   : > { %v2167_v23 = vadd.f32 %v3470_v46, %v4853_v32  ;;  %v3473_v12 = vadd.f32 %v3472_v36, %v3471_v3  ;;  %v3578_v22 = vpop.f32.mrb[111].mxu0 }
 0x31c   : > { %v3579_v57 = vadd.f32 %v3578_v22, %v3577_v6  ;;  %v4945_v7 = vadd.f32 %v3576_v47, %v2159_v26 }
 0x31d   : > { %v2170_v16 = vadd.f32 %v3473_v12, %v4855_v45 }
 0x31e   : > { %v4948_v21 = vadd.f32 %v3579_v57, %v2162_v20 }
 0x31f   : > { %v3474_v25 = vpop.f32.mrb[116].mxu1 }
 0x320   : > { %v3580_v4 = vpop.f32.mrb[112].mxu0  ;;  %v3475_v10 = vpop.f32.mrb[117].mxu1 }
 0x321   : > { %v3476_v1 = vadd.f32 %v3475_v10, %v3474_v25  ;;  %v3581_v40 = vpop.f32.mrb[113].mxu0  ;;  %v3477_v58 = vpop.f32.mrb[118].mxu1 }
 0x322   : > { %v3582_v63 = vadd.f32 %v3581_v40, %v3580_v4  ;;  %v3583_v41 = vpop.f32.mrb[114].mxu0  ;;  %v3478_v13 = vpop.f32.mrb[119].mxu1 }
 0x323   : > { %v2175_v32 = vadd.f32 %v3476_v1, %v4859_v17  ;;  %v3479_v18 = vadd.f32 %v3478_v13, %v3477_v58  ;;  %v3584_v29 = vpop.f32.mrb[115].mxu0 }
 0x324   : > { %v3585_v24 = vadd.f32 %v3584_v29, %v3583_v41  ;;  %v4951_v5 = vadd.f32 %v3582_v63, %v2167_v23 }
 0x325   : > { %v2178_v45 = vadd.f32 %v3479_v18, %v4861_v56 }
 0x326   : > { %v4954_v26 = vadd.f32 %v3585_v24, %v2170_v16 }
 0x327   : > { %v3480_v59 = vpop.f32.mrb[120].mxu1 }
 0x328   : > { %v3586_v30 = vpop.f32.mrb[116].mxu0  ;;  %v3481_v31 = vpop.f32.mrb[121].mxu1 }
 0x329   : > { %v3482_v20 = vadd.f32 %v3481_v31, %v3480_v59  ;;  %v3587_v54 = vpop.f32.mrb[117].mxu0  ;;  %v3483_v27 = vpop.f32.mrb[122].mxu1 }
 0x32a   : > { %v3588_v52 = vadd.f32 %v3587_v54, %v3586_v30  ;;  %v3589_v46 = vpop.f32.mrb[118].mxu0  ;;  %v3484_v61 = vpop.f32.mrb[123].mxu1 }
 0x32b   : > { %v2183_v17 = vadd.f32 %v3482_v20, %v4865_v14  ;;  %v3485_v3 = vadd.f32 %v3484_v61, %v3483_v27  ;;  %v3590_v47 = vpop.f32.mrb[119].mxu0 }
 0x32c   : > { %v3591_v6 = vadd.f32 %v3590_v47, %v3589_v46  ;;  %v4957_v36 = vadd.f32 %v3588_v52, %v2175_v32 }
 0x32d   : > { %v2186_v56 = vadd.f32 %v3485_v3, %v4868_v37 }
 0x32e   : > { %v4960_v23 = vadd.f32 %v3591_v6, %v2178_v45 }
 0x32f   : > { %v3486_v12 = vpop.f32.mrb[124].mxu1 }
 0x330   : > { %v3592_v22 = vpop.f32.mrb[120].mxu0  ;;  %v3487_v57 = vpop.f32.mrb[125].mxu1 }
 0x331   : > { %v3488_v16 = vadd.f32 %v3487_v57, %v3486_v12  ;;  %v3593_v25 = vpop.f32.mrb[121].mxu0  ;;  %v3489_v4 = vpop.f32.mrb[126].mxu1 }
 0x332   : > { %v3594_v10 = vadd.f32 %v3593_v25, %v3592_v22  ;;  %v3595_v1 = vpop.f32.mrb[122].mxu0  ;;  %v3490_v40 = vpop.f32.mrb[127].mxu1 }
 0x333   : > { %v2191_v14 = vadd.f32 %v3488_v16, %v4872_v60  ;;  %v3491_v58 = vadd.f32 %v3490_v40, %v3489_v4  ;;  %v3596_v63 = vpop.f32.mrb[123].mxu0 }
 0x334   : > { %v3597_v41 = vadd.f32 %v3596_v63, %v3595_v1  ;;  %v4963_v13 = vadd.f32 %v3594_v10, %v2183_v17 }
 0x335   : > { %v2194_v37 = vadd.f32 %v3491_v58, %v4874_v62 }
 0x336   : > { %v4966_v32 = vadd.f32 %v3597_v41, %v2186_v56 }
 0x337   : > { %v3492_v18 = vpop.f32.mrb[128].mxu1 }
 0x338   : > { %v3598_v29 = vpop.f32.mrb[124].mxu0  ;;  %v3493_v24 = vpop.f32.mrb[129].mxu1 }
 0x339   : > { %v3494_v45 = vadd.f32 %v3493_v24, %v3492_v18  ;;  %v3599_v59 = vpop.f32.mrb[125].mxu0  ;;  %v3495_v30 = vpop.f32.mrb[130].mxu1 }
 0x33a   : > { %v3600_v31 = vadd.f32 %v3599_v59, %v3598_v29  ;;  %v3601_v20 = vpop.f32.mrb[126].mxu0  ;;  %v3496_v54 = vpop.f32.mrb[131].mxu1 }
 0x33b   : > { %v2199_v60 = vadd.f32 %v3494_v45, %v4878_v33  ;;  %v3497_v27 = vadd.f32 %v3496_v54, %v3495_v30  ;;  %v3602_v52 = vpop.f32.mrb[127].mxu0 }
 0x33c   : > { %v3603_v46 = vadd.f32 %v3602_v52, %v3601_v20  ;;  %v4969_v61 = vadd.f32 %v3600_v31, %v2191_v14 }
 0x33d   : > { %v2202_v62 = vadd.f32 %v3497_v27, %v4880_v51 }
 0x33e   : > { %v4972_v17 = vadd.f32 %v3603_v46, %v2194_v37 }
 0x33f   : > { %v3498_v3 = vpop.f32.mrb[132].mxu1 }
 0x340   : > { %v3604_v47 = vpop.f32.mrb[128].mxu0  ;;  %v3499_v6 = vpop.f32.mrb[133].mxu1 }
 0x341   : > { %v3500_v56 = vadd.f32 %v3499_v6, %v3498_v3  ;;  %v3605_v12 = vpop.f32.mrb[129].mxu0  ;;  %v3501_v22 = vpop.f32.mrb[134].mxu1 }
 0x342   : > { %v3606_v57 = vadd.f32 %v3605_v12, %v3604_v47  ;;  %v3607_v16 = vpop.f32.mrb[130].mxu0  ;;  %v3502_v25 = vpop.f32.mrb[135].mxu1 }
 0x343   : > { %v2207_v33 = vadd.f32 %v3500_v56, %v4884_v38  ;;  %v3503_v4 = vadd.f32 %v3502_v25, %v3501_v22  ;;  %v3608_v10 = vpop.f32.mrb[131].mxu0 }
 0x344   : > { %v3609_v1 = vadd.f32 %v3608_v10, %v3607_v16  ;;  %v4975_v40 = vadd.f32 %v3606_v57, %v2199_v60 }
 0x345   : > { %v2210_v51 = vadd.f32 %v3503_v4, %v4886_v43 }
 0x346   : > { %v4978_v14 = vadd.f32 %v3609_v1, %v2202_v62 }
 0x347   : > { %v3504_v58 = vpop.f32.mrb[136].mxu1 }
 0x348   : > { %v3610_v63 = vpop.f32.mrb[132].mxu0  ;;  %v3505_v41 = vpop.f32.mrb[137].mxu1 }
 0x349   : > { %v3506_v37 = vadd.f32 %v3505_v41, %v3504_v58  ;;  %v3611_v18 = vpop.f32.mrb[133].mxu0  ;;  %v3507_v29 = vpop.f32.mrb[138].mxu1 }
 0x34a   : > { %v3612_v24 = vadd.f32 %v3611_v18, %v3610_v63  ;;  %v3613_v45 = vpop.f32.mrb[134].mxu0  ;;  %v3508_v59 = vpop.f32.mrb[139].mxu1 }
 0x34b   : > { %v2215_v38 = vadd.f32 %v3506_v37, %v4890_v9  ;;  %v3509_v30 = vadd.f32 %v3508_v59, %v3507_v29  ;;  %v3614_v31 = vpop.f32.mrb[135].mxu0 }
 0x34c   : > { %v3615_v20 = vadd.f32 %v3614_v31, %v3613_v45  ;;  %v4981_v54 = vadd.f32 %v3612_v24, %v2207_v33 }
 0x34d   : > { %v2218_v43 = vadd.f32 %v3509_v30, %v4892_v49 }
 0x34e   : > { %v4984_v60 = vadd.f32 %v3615_v20, %v2210_v51 }
 0x34f   : > { %v3510_v27 = vpop.f32.mrb[140].mxu1 }
 0x350   : > { %v3616_v52 = vpop.f32.mrb[136].mxu0  ;;  %v3511_v46 = vpop.f32.mrb[141].mxu1 }
 0x351   : > { %v3512_v62 = vadd.f32 %v3511_v46, %v3510_v27  ;;  %v3617_v3 = vpop.f32.mrb[137].mxu0  ;;  %v3513_v47 = vpop.f32.mrb[142].mxu1 }
 0x352   : > { %v3618_v6 = vadd.f32 %v3617_v3, %v3616_v52  ;;  %v3619_v56 = vpop.f32.mrb[138].mxu0  ;;  %v3514_v12 = vpop.f32.mrb[143].mxu1 }
 0x353   : > { %v2223_v9 = vadd.f32 %v3512_v62, %v4897_v42  ;;  %v3515_v22 = vadd.f32 %v3514_v12, %v3513_v47  ;;  %v3620_v57 = vpop.f32.mrb[139].mxu0 }
 0x354   : > { %v3621_v16 = vadd.f32 %v3620_v57, %v3619_v56  ;;  %v4987_v25 = vadd.f32 %v3618_v6, %v2215_v38 }
 0x355   : > { %v2226_v49 = vadd.f32 %v3515_v22, %v4900_v39 }
 0x356   : > { %v4990_v33 = vadd.f32 %v3621_v16, %v2218_v43 }
 0x357   : > { %v3742_v4 = vpop.f32.mrb[144].mxu1 }
 0x358   : > { %v3622_v10 = vpop.f32.mrb[140].mxu0  ;;  %v2433_v1 = vadd.f32 %v3742_v4, %v4909_v35  ;;  %v2424_v51 = vpop.f32.mrb[145].mxu1 }
 0x359   : > { %v3623_v58 = vpop.f32.mrb[141].mxu0  ;;  %v2425_v63 = vadd.f32 %v2424_v51, %v4903_v55  ;;  %v3743_v41 = vpop.f32.mrb[146].mxu1 }
 0x35a   : > { %v3624_v37 = vadd.f32 %v3623_v58, %v3622_v10  ;;  %v3625_v42 = vpop.f32.mrb[142].mxu0  ;;  %v2436_v18 = vadd.f32 %v3743_v41, %v4912_v48  ;;  %v2427_v29 = vpop.f32.mrb[147].mxu1  ;;  %v2553_v39 = vmax.f32 %v2433_v1, 0.0 }
 0x35b   : > { %v3626_v24 = vpop.f32.mrb[143].mxu0  ;;  %v2428_v45 = vadd.f32 %v2427_v29, %v4906_v8  ;;  %v2551_v31 = vmax.f32 %v2425_v63, 0.0 }
 0x35c   : > { %v2554_v59 = vmax.f32 %v2436_v18, 0.0  ;;  %v3627_v38 = vadd.f32 %v3626_v24, %v3625_v42  ;;  %v4996_v30 = vadd.f32 %v3624_v37, %v2223_v9 }
 0x35d   : > { %v2552_v35 = vmax.f32 %v2428_v45, 0.0 }
 0x35e   : > { %v2584_v20 = vpack.c.bf16 %v2554_v59, %v2553_v39  ;;  %v4998_v43 = vadd.f32 %v3627_v38, %v2226_v49 }
 0x35f   : > { %v2583_v55 = vpack.c.bf16 %v2552_v35, %v2551_v31  ;;  %v3746_v27 = vpop.f32.mrb[148].mxu1 }
 0x360   : > { %v2449_v52 = vadd.f32 %v3746_v27, %v4921_v0  ;;  %v2440_v46 = vpop.f32.mrb[149].mxu1 }
 0x361   : > { %v2441_v48 = vadd.f32 %v2440_v46, %v4915_v50  ;;  %v3747_v62 = vpop.f32.mrb[150].mxu1  ;;  %3788 = vmatprep.mubr.bf16.mxu0 %v2583_v55 }
 0x362   : > { %v2452_v8 = vadd.f32 %v3747_v62, %v4924_v11  ;;  %v2443_v3 = vpop.f32.mrb[151].mxu1  ;;  %3789 = vmatmul.mubr.bf16.vlgmr.msra.gmra.mrb[144].mxu0 %v2584_v20  ;;  %v2557_v6 = vmax.f32 %v2449_v52, 0.0 }
 0x363   : > { %v2444_v47 = vadd.f32 %v2443_v3, %v4918_v15  ;;  %v2555_v12 = vmax.f32 %v2441_v48, 0.0 }
 0x364   : > { %v2558_v56 = vmax.f32 %v2452_v8, 0.0 }
 0x365   : > { %v2556_v9 = vmax.f32 %v2444_v47, 0.0 }
 0x366   : > { %v2586_v22 = vpack.c.bf16 %v2558_v56, %v2557_v6 }
 0x367   : > { %v2585_v57 = vpack.c.bf16 %v2556_v9, %v2555_v12  ;;  %v3750_v16 = vpop.f32.mrb[152].mxu1 }
 0x368   : > { %v2465_v0 = vadd.f32 %v3750_v16, %v4933_v19  ;;  %v2456_v49 = vpop.f32.mrb[153].mxu1 }
 0x369   : > { %v2457_v50 = vadd.f32 %v2456_v49, %v4927_v28  ;;  %v3751_v4 = vpop.f32.mrb[154].mxu1  ;;  %3792 = vmatprep.mubr.bf16.mxu0 %v2585_v57 }
 0x36a   : > { %v2468_v11 = vadd.f32 %v3751_v4, %v4936_v34  ;;  %v2459_v10 = vpop.f32.mrb[155].mxu1  ;;  %3793 = vmatmul.mubr.bf16.gmra.mrb[148].mxu0 %v2586_v22  ;;  %v2561_v1 = vmax.f32 %v2465_v0, 0.0 }
 0x36b   : > { %v2460_v15 = vadd.f32 %v2459_v10, %v4930_v2  ;;  %v2559_v58 = vmax.f32 %v2457_v50, 0.0 }
 0x36c   : > { %v2562_v51 = vmax.f32 %v2468_v11, 0.0 }
 0x36d   : > { %v2560_v63 = vmax.f32 %v2460_v15, 0.0 }
 0x36e   : > { %v2588_v41 = vpack.c.bf16 %v2562_v51, %v2561_v1 }
 0x36f   : > { %v2587_v37 = vpack.c.bf16 %v2560_v63, %v2559_v58  ;;  %v3754_v42 = vpop.f32.mrb[156].mxu1 }
 0x370   : > { %v2481_v19 = vadd.f32 %v3754_v42, %v4945_v7  ;;  %v2472_v18 = vpop.f32.mrb[157].mxu1 }
 0x371   : > { %v2473_v28 = vadd.f32 %v2472_v18, %v4939_v53  ;;  %v3755_v29 = vpop.f32.mrb[158].mxu1  ;;  %3796 = vmatprep.mubr.bf16.mxu0 %v2587_v37 }
 0x372   : > { %v2484_v34 = vadd.f32 %v3755_v29, %v4948_v21  ;;  %v2475_v24 = vpop.f32.mrb[159].mxu1  ;;  %3797 = vmatmul.mubr.bf16.gmra.mrb[152].mxu0 %v2588_v41  ;;  %v2565_v45 = vmax.f32 %v2481_v19, 0.0 }
 0x373   : > { %v2476_v2 = vadd.f32 %v2475_v24, %v4942_v44  ;;  %v2563_v59 = vmax.f32 %v2473_v28, 0.0 }
 0x374   : > { %v2566_v39 = vmax.f32 %v2484_v34, 0.0 }
 0x375   : > { %v2564_v38 = vmax.f32 %v2476_v2, 0.0 }
 0x376   : > { %v2590_v31 = vpack.c.bf16 %v2566_v39, %v2565_v45 }
 0x377   : > { %v2589_v35 = vpack.c.bf16 %v2564_v38, %v2563_v59  ;;  %v3758_v20 = vpop.f32.mrb[160].mxu1 }
 0x378   : > { %v2497_v7 = vadd.f32 %v3758_v20, %v4957_v36  ;;  %v2488_v55 = vpop.f32.mrb[161].mxu1 }
 0x379   : > { %v2489_v53 = vadd.f32 %v2488_v55, %v4951_v5  ;;  %v3759_v27 = vpop.f32.mrb[162].mxu1  ;;  %3800 = vmatprep.mubr.bf16.mxu0 %v2589_v35  ;;  %v4010_v55 = vld [vmem:[%s4491_s20] sm:$0xff] }
 0x37a   : > { %v2500_v21 = vadd.f32 %v3759_v27, %v4960_v23  ;;  %v2491_v52 = vpop.f32.mrb[163].mxu1  ;;  %3801 = vmatmul.mubr.bf16.gmra.mrb[156].mxu0 %v2590_v31  ;;  %v2569_v46 = vmax.f32 %v2497_v7, 0.0  ;;  %v4009_v31 = vld [vmem:[%s4491_s20 + $0x10] sm:$0xff] }
 0x37b   : > { %v2492_v44 = vadd.f32 %v2491_v52, %v4954_v26  ;;  %v2567_v62 = vmax.f32 %v2489_v53, 0.0  ;;  %v4011_v52 = vld [vmem:[%s4491_s20 + $0x18] sm:$0xff] }
 0x37c   : > { %v2570_v48 = vmax.f32 %v2500_v21, 0.0 }
 0x37d   : > { %v2568_v8 = vmax.f32 %v2492_v44, 0.0 }
 0x37e   : > { %v2592_v3 = vpack.c.bf16 %v2570_v48, %v2569_v46  ;;  %v4012_v48 = vld [vmem:[%s4491_s20 + $0x8] sm:$0xff] }
 0x37f   : > { %v2591_v47 = vpack.c.bf16 %v2568_v8, %v2567_v62  ;;  %v3762_v6 = vpop.f32.mrb[164].mxu1 }
 0x380   : > { %v2513_v36 = vadd.f32 %v3762_v6, %v4969_v61  ;;  %v2504_v56 = vpop.f32.mrb[165].mxu1 }
 0x381   : > { %v2505_v5 = vadd.f32 %v2504_v56, %v4963_v13  ;;  %v3763_v12 = vpop.f32.mrb[166].mxu1  ;;  %3804 = vmatprep.mubr.bf16.mxu0 %v2591_v47 }
 0x382   : > { %v2516_v23 = vadd.f32 %v3763_v12, %v4972_v17  ;;  %v2507_v9 = vpop.f32.mrb[167].mxu1  ;;  %3805 = vmatmul.mubr.bf16.gmra.mrb[160].mxu0 %v2592_v3  ;;  %v2573_v22 = vmax.f32 %v2513_v36, 0.0  ;;  %v4013_v12 = vld [vmem:[%s4491_s20 + $0x30] sm:$0xff] }
 0x383   : > { %v2508_v26 = vadd.f32 %v2507_v9, %v4966_v32  ;;  %v2571_v16 = vmax.f32 %v2505_v5, 0.0 }
 0x384   : > { %v2574_v57 = vmax.f32 %v2516_v23, 0.0 }
 0x385   : > { %v2572_v0 = vmax.f32 %v2508_v26, 0.0 }
 0x386   : > { %v2594_v49 = vpack.c.bf16 %v2574_v57, %v2573_v22  ;;  %v4014_v22 = vld [vmem:[%s4491_s20 + $0x20] sm:$0xff] }
 0x387   : > { %v2593_v50 = vpack.c.bf16 %v2572_v0, %v2571_v16  ;;  %v3766_v4 = vpop.f32.mrb[168].mxu1 }
 0x388   : > { %v2529_v61 = vadd.f32 %v3766_v4, %v4981_v54  ;;  %v2520_v11 = vpop.f32.mrb[169].mxu1 }
 0x389   : > { %v2521_v13 = vadd.f32 %v2520_v11, %v4975_v40  ;;  %v3767_v10 = vpop.f32.mrb[170].mxu1  ;;  %3808 = vmatprep.mubr.bf16.mxu0 %v2593_v50 }
 0x38a   : > { %v2532_v17 = vadd.f32 %v3767_v10, %v4984_v60  ;;  %v2523_v15 = vpop.f32.mrb[171].mxu1  ;;  %3809 = vmatmul.mubr.bf16.gmra.mrb[164].mxu0 %v2594_v49  ;;  %v2577_v1 = vmax.f32 %v2529_v61, 0.0  ;;  %v4015_v49 = vld [vmem:[%s4491_s20 + $0x38] sm:$0xff]  ;;  %v4016_v61 = vld [vmem:[%s4491_s20 + $0x28] sm:$0xff] }
 0x38b   : > { %v2524_v32 = vadd.f32 %v2523_v15, %v4978_v14  ;;  %v2575_v58 = vmax.f32 %v2521_v13, 0.0 }
 0x38c   : > { %v2578_v51 = vmax.f32 %v2532_v17, 0.0 }
 0x38d   : > { %v2576_v63 = vmax.f32 %v2524_v32, 0.0 }
 0x38e   : > { %v2596_v41 = vpack.c.bf16 %v2578_v51, %v2577_v1 }
 0x38f   : > { %v2595_v37 = vpack.c.bf16 %v2576_v63, %v2575_v58  ;;  %v3770_v42 = vpop.f32.mrb[172].mxu1  ;;  %v4017_v58 = vld [vmem:[%s4491_s20 + $0x50] sm:$0xff] }
 0x390   : > { %v2545_v54 = vadd.f32 %v3770_v42, %v4996_v30  ;;  %v2536_v19 = vpop.f32.mrb[173].mxu1  ;;  %v4018_v42 = vld [vmem:[%s4491_s20 + $0x40] sm:$0xff] }
 0x391   : > { %v2537_v40 = vadd.f32 %v2536_v19, %v4987_v25  ;;  %v3771_v18 = vpop.f32.mrb[174].mxu1  ;;  %3812 = vmatprep.mubr.bf16.mxu0 %v2595_v37  ;;  %v5031_v25 = vld [vmem:[%s5190_s6] ss:$0 sm:$0xff] }
 0x392   : > { %v2548_v60 = vadd.f32 %v3771_v18, %v4998_v43  ;;  %v2539_v28 = vpop.f32.mrb[175].mxu1  ;;  %3813 = vmatmul.mubr.bf16.gmra.mrb[168].mxu0 %v2596_v41  ;;  %v2581_v29 = vmax.f32 %v2545_v54, 0.0  ;;  %v4019_v18 = vld [vmem:[%s4491_s20 + $0x58] sm:$0xff] }
 0x393   : > { %v2540_v14 = vadd.f32 %v2539_v28, %v4990_v33  ;;  %v2579_v24 = vmax.f32 %v2537_v40, 0.0 }
 0x394   : > { %v2582_v34 = vmax.f32 %v2548_v60, 0.0 }
 0x395   : > { %v2580_v2 = vmax.f32 %v2540_v14, 0.0  ;;  %v4020_v14 = vld [vmem:[%s4491_s20 + $0x48] sm:$0xff] }
 0x396   : > { %v2598_v45 = vpack.c.bf16 %v2582_v34, %v2581_v29 }
 0x397   : > { %v2597_v39 = vpack.c.bf16 %v2580_v2, %v2579_v24 }
 0x399   : > { %3816 = vmatprep.mubr.bf16.mxu0 %v2597_v39 }
 0x39a   : > { %3817 = vmatmul.mubr.bf16.gmra.mrb[172].mxu0 %v2598_v45 }
 0x435   : > { %v3790_v30 = vpop.f32.mrb[144].mxu0 }
 0x436   : > { %v2713_v43 = vadd.f32 %v3790_v30, %v5031_v25  ;;  %v2704_v33 = vpop.f32.mrb[145].mxu0 }
 0x437   : > { %v2705_v59 = vadd.f32 %v5031_v25, %v2704_v33  ;;  %v3791_v38 = vpop.f32.mrb[146].mxu0  ;;  %v4021_v33 = vld [vmem:[%s4491_s20 + $0x70] sm:$0xff] }
 0x438   : > { %v2833_v35 = vadd.f32 %v4009_v31, %v2713_v43  ;;  %v2716_v20 = vadd.f32 %v3791_v38, %v5031_v25  ;;  %v2707_v7 = vpop.f32.mrb[147].mxu0 }
 0x439   : > { %v2831_v53 = vadd.f32 %v4010_v55, %v2705_v59  ;;  %v2708_v27 = vadd.f32 %v5031_v25, %v2707_v7 }
 0x43a   : > { %v2865_v21 = vmax.f32 %v2833_v35, 0.0  ;;  %v2834_v44 = vadd.f32 %v4011_v52, %v2716_v20  ;;  %v4022_v35 = vld [vmem:[%s4491_s20 + $0x60] sm:$0xff]  ;;  %v4024_v52 = vld [vmem:[%s4491_s20 + $0x68] sm:$0xff] }
 0x43b   : > { %v2863_v46 = vmax.f32 %v2831_v53, 0.0  ;;  %v2832_v62 = vadd.f32 %v4012_v48, %v2708_v27  ;;  %v4023_v53 = vld [vmem:[%s4491_s20 + $0x78] sm:$0xff] }
 0x43c   : > { %2897 = vst [vmem:[%s5043_s15 + $0x10] sm:$0xff] %v2865_v21  ;;  %v2866_v8 = vmax.f32 %v2834_v44, 0.0 }
 0x43d   : > { %2895 = vst [vmem:[%s5043_s15] sm:$0xff] %v2863_v46  ;;  %v2864_v3 = vmax.f32 %v2832_v62, 0.0  ;;  %v3794_v47 = vpop.f32.mrb[148].mxu0 }
 0x43e   : > { %2898 = vst [vmem:[%s5043_s15 + $0x18] sm:$0xff] %v2866_v8  ;;  %v2729_v6 = vadd.f32 %v3794_v47, %v5031_v25  ;;  %v2720_v36 = vpop.f32.mrb[149].mxu0 }
 0x43f   : > { %2896 = vst [vmem:[%s5043_s15 + $0x8] sm:$0xff] %v2864_v3  ;;  %v2721_v56 = vadd.f32 %v5031_v25, %v2720_v36  ;;  %v3795_v5 = vpop.f32.mrb[150].mxu0  ;;  %v4025_v36 = vld [vmem:[%s4491_s20 + $0x90] sm:$0xff] }
 0x440   : > { %v2837_v23 = vadd.f32 %v4013_v12, %v2729_v6  ;;  %v2732_v9 = vadd.f32 %v3795_v5, %v5031_v25  ;;  %v2723_v26 = vpop.f32.mrb[151].mxu0 }
 0x441   : > { %v2835_v57 = vadd.f32 %v4014_v22, %v2721_v56  ;;  %v2724_v16 = vadd.f32 %v5031_v25, %v2723_v26 }
 0x442   : > { %v2869_v0 = vmax.f32 %v2837_v23, 0.0  ;;  %v2838_v50 = vadd.f32 %v4015_v49, %v2732_v9  ;;  %v4026_v23 = vld [vmem:[%s4491_s20 + $0x80] sm:$0xff]  ;;  %v4028_v49 = vld [vmem:[%s4491_s20 + $0x88] sm:$0xff] }
 0x443   : > { %v2867_v4 = vmax.f32 %v2835_v57, 0.0  ;;  %v2836_v11 = vadd.f32 %v4016_v61, %v2724_v16  ;;  %v4027_v57 = vld [vmem:[%s4491_s20 + $0x98] sm:$0xff] }
 0x444   : > { %2901 = vst [vmem:[%s5043_s15 + $0x30] sm:$0xff] %v2869_v0  ;;  %v2870_v13 = vmax.f32 %v2838_v50, 0.0 }
 0x445   : > { %2899 = vst [vmem:[%s5043_s15 + $0x20] sm:$0xff] %v2867_v4  ;;  %v2868_v10 = vmax.f32 %v2836_v11, 0.0  ;;  %v3798_v17 = vpop.f32.mrb[152].mxu0 }
 0x446   : > { %2902 = vst [vmem:[%s5043_s15 + $0x38] sm:$0xff] %v2870_v13  ;;  %v2745_v15 = vadd.f32 %v3798_v17, %v5031_v25  ;;  %v2736_v32 = vpop.f32.mrb[153].mxu0 }
 0x447   : > { %2900 = vst [vmem:[%s5043_s15 + $0x28] sm:$0xff] %v2868_v10  ;;  %v2737_v1 = vadd.f32 %v5031_v25, %v2736_v32  ;;  %v3799_v51 = vpop.f32.mrb[154].mxu0  ;;  %v4029_v32 = vld [vmem:[%s4491_s20 + $0xb0] sm:$0xff] }
 0x448   : > { %v2841_v63 = vadd.f32 %v4017_v58, %v2745_v15  ;;  %v2748_v41 = vadd.f32 %v3799_v51, %v5031_v25  ;;  %v2739_v37 = vpop.f32.mrb[155].mxu0 }
 0x449   : > { %v2839_v54 = vadd.f32 %v4018_v42, %v2737_v1  ;;  %v2740_v19 = vadd.f32 %v5031_v25, %v2739_v37 }
 0x44a   : > { %v2873_v40 = vmax.f32 %v2841_v63, 0.0  ;;  %v2842_v60 = vadd.f32 %v4019_v18, %v2748_v41  ;;  %v4030_v63 = vld [vmem:[%s4491_s20 + $0xa0] sm:$0xff]  ;;  %v4032_v18 = vld [vmem:[%s4491_s20 + $0xa8] sm:$0xff] }
 0x44b   : > { %v2871_v28 = vmax.f32 %v2839_v54, 0.0  ;;  %v2840_v29 = vadd.f32 %v4020_v14, %v2740_v19  ;;  %v4031_v54 = vld [vmem:[%s4491_s20 + $0xb8] sm:$0xff] }
 0x44c   : > { %2905 = vst [vmem:[%s5043_s15 + $0x50] sm:$0xff] %v2873_v40  ;;  %v2874_v34 = vmax.f32 %v2842_v60, 0.0 }
 0x44d   : > { %2903 = vst [vmem:[%s5043_s15 + $0x40] sm:$0xff] %v2871_v28  ;;  %v2872_v24 = vmax.f32 %v2840_v29, 0.0  ;;  %v3802_v2 = vpop.f32.mrb[156].mxu0 }
 0x44e   : > { %2906 = vst [vmem:[%s5043_s15 + $0x58] sm:$0xff] %v2874_v34  ;;  %v2761_v45 = vadd.f32 %v3802_v2, %v5031_v25  ;;  %v2752_v39 = vpop.f32.mrb[157].mxu0 }
 0x44f   : > { %2904 = vst [vmem:[%s5043_s15 + $0x48] sm:$0xff] %v2872_v24  ;;  %v2753_v30 = vadd.f32 %v5031_v25, %v2752_v39  ;;  %v3803_v43 = vpop.f32.mrb[158].mxu0  ;;  %v4033_v39 = vld [vmem:[%s4491_s20 + $0xd0] sm:$0xff] }
 0x450   : > { %v2845_v59 = vadd.f32 %v4021_v33, %v2761_v45  ;;  %v2764_v38 = vadd.f32 %v3803_v43, %v5031_v25  ;;  %v2755_v31 = vpop.f32.mrb[159].mxu0 }
 0x451   : > { %v2843_v20 = vadd.f32 %v4022_v35, %v2753_v30  ;;  %v2756_v7 = vadd.f32 %v5031_v25, %v2755_v31 }
 0x452   : > { %v2877_v55 = vmax.f32 %v2845_v59, 0.0  ;;  %v2846_v27 = vadd.f32 %v4023_v53, %v2764_v38  ;;  %v4034_v59 = vld [vmem:[%s4491_s20 + $0xc0] sm:$0xff]  ;;  %v4036_v53 = vld [vmem:[%s4491_s20 + $0xc8] sm:$0xff] }
 0x453   : > { %v2875_v21 = vmax.f32 %v2843_v20, 0.0  ;;  %v2844_v44 = vadd.f32 %v4024_v52, %v2756_v7  ;;  %v4035_v20 = vld [vmem:[%s4491_s20 + $0xd8] sm:$0xff] }
 0x454   : > { %2909 = vst [vmem:[%s5043_s15 + $0x70] sm:$0xff] %v2877_v55  ;;  %v2878_v46 = vmax.f32 %v2846_v27, 0.0 }
 0x455   : > { %2907 = vst [vmem:[%s5043_s15 + $0x60] sm:$0xff] %v2875_v21  ;;  %v2876_v48 = vmax.f32 %v2844_v44, 0.0  ;;  %v3806_v62 = vpop.f32.mrb[160].mxu0 }
 0x456   : > { %2910 = vst [vmem:[%s5043_s15 + $0x78] sm:$0xff] %v2878_v46  ;;  %v2777_v8 = vadd.f32 %v3806_v62, %v5031_v25  ;;  %v2768_v3 = vpop.f32.mrb[161].mxu0 }
 0x457   : > { %2908 = vst [vmem:[%s5043_s15 + $0x68] sm:$0xff] %v2876_v48  ;;  %v2769_v47 = vadd.f32 %v5031_v25, %v2768_v3  ;;  %v3807_v6 = vpop.f32.mrb[162].mxu0  ;;  %v4037_v3 = vld [vmem:[%s4491_s20 + $0xf0] sm:$0xff] }
 0x458   : > { %v2849_v56 = vadd.f32 %v4025_v36, %v2777_v8  ;;  %v2780_v5 = vadd.f32 %v3807_v6, %v5031_v25  ;;  %v2771_v12 = vpop.f32.mrb[163].mxu0 }
 0x459   : > { %v2847_v9 = vadd.f32 %v4026_v23, %v2769_v47  ;;  %v2772_v26 = vadd.f32 %v5031_v25, %v2771_v12 }
 0x45a   : > { %v2881_v22 = vmax.f32 %v2849_v56, 0.0  ;;  %v2850_v16 = vadd.f32 %v4027_v57, %v2780_v5  ;;  %v4038_v56 = vld [vmem:[%s4491_s20 + $0xe0] sm:$0xff]  ;;  %v4040_v57 = vld [vmem:[%s4491_s20 + $0xe8] sm:$0xff] }
 0x45b   : > { %v2879_v0 = vmax.f32 %v2847_v9, 0.0  ;;  %v2848_v50 = vadd.f32 %v4028_v49, %v2772_v26  ;;  %v4039_v9 = vld [vmem:[%s4491_s20 + $0xf8] sm:$0xff]  ;;  %s4240_s20 = smov [#allocation11]  }
 0x45c   : > { %2913 = vst [vmem:[%s5043_s15 + $0x90] sm:$0xff] %v2881_v22  ;;  %v2882_v4 = vmax.f32 %v2850_v16, 0.0  ;;  %s4159_s30 = sshll.u32 %s4240_s20, 4  ;;  %s4160_s30 = int_to_ptr.vmem [resolvable:$false] %s4159_s30 }
 0x45d   : > { %2911 = vst [vmem:[%s5043_s15 + $0x80] sm:$0xff] %v2879_v0  ;;  %v2880_v61 = vmax.f32 %v2848_v50, 0.0  ;;  %v3810_v11 = vpop.f32.mrb[164].mxu0  ;;  %s4161_s9 = scalar_lea.vmem %s4160_s30, 8192  ;;  %p4162_p12 = scmp.lt.s32.totalorder %s5137_s12, %s4160_s30 }
 0x45e   : > { %2914 = vst [vmem:[%s5043_s15 + $0x98] sm:$0xff] %v2882_v4  ;;  %v2793_v13 = vadd.f32 %v3810_v11, %v5031_v25  ;;  %v2784_v10 = vpop.f32.mrb[165].mxu0  ;;  %p4163_p1 = scmp.lt.s32.totalorder %s4161_s9, %s4155_s13 }
 0x45f   : > { %2912 = vst [vmem:[%s5043_s15 + $0x88] sm:$0xff] %v2880_v61  ;;  %v2785_v17 = vadd.f32 %v5031_v25, %v2784_v10  ;;  %v3811_v15 = vpop.f32.mrb[166].mxu0 }
 0x460   : > { %v2853_v1 = vadd.f32 %v4029_v32, %v2793_v13  ;;  %v2796_v51 = vadd.f32 %v3811_v15, %v5031_v25  ;;  %v2787_v58 = vpop.f32.mrb[167].mxu0  ;;  %p4164_p2 = por %p4163_p1, %p4162_p12 }
 0x461   : > { %v2851_v41 = vadd.f32 %v4030_v63, %v2785_v17  ;;  %v2788_v37 = vadd.f32 %v5031_v25, %v2787_v58 }
 0x462   : > { %v2885_v42 = vmax.f32 %v2853_v1, 0.0  ;;  %v2854_v19 = vadd.f32 %v4031_v54, %v2796_v51  ;;  %p4165_p4 = pnand %p4164_p2, %p4158_p7 }
 0x463   : > { %v2883_v40 = vmax.f32 %v2851_v41, 0.0  ;;  %v2852_v60 = vadd.f32 %v4032_v18, %v2788_v37 }
 0x464   : > { %2917 = vst [vmem:[%s5043_s15 + $0xb0] sm:$0xff] %v2885_v42  ;;  %v2886_v28 = vmax.f32 %v2854_v19, 0.0 }
 0x465   : > { %2915 = vst [vmem:[%s5043_s15 + $0xa0] sm:$0xff] %v2883_v40  ;;  %v2884_v14 = vmax.f32 %v2852_v60, 0.0  ;;  %v3814_v29 = vpop.f32.mrb[168].mxu0 }
 0x466   : > { %2918 = vst [vmem:[%s5043_s15 + $0xb8] sm:$0xff] %v2886_v28  ;;  %v2809_v34 = vadd.f32 %v3814_v29, %v5031_v25  ;;  %v2800_v24 = vpop.f32.mrb[169].mxu0 }
 0x467   : > { %2916 = vst [vmem:[%s5043_s15 + $0xa8] sm:$0xff] %v2884_v14  ;;  %v2801_v2 = vadd.f32 %v5031_v25, %v2800_v24  ;;  %v3815_v45 = vpop.f32.mrb[170].mxu0 }
 0x468   : > { %v2857_v30 = vadd.f32 %v4033_v39, %v2809_v34  ;;  %v2812_v43 = vadd.f32 %v3815_v45, %v5031_v25  ;;  %v2803_v33 = vpop.f32.mrb[171].mxu0 }
 0x469   : > { %v2855_v38 = vadd.f32 %v4034_v59, %v2801_v2  ;;  %v2804_v31 = vadd.f32 %v5031_v25, %v2803_v33 }
 0x46a   : > { %v2889_v35 = vmax.f32 %v2857_v30, 0.0  ;;  %v2858_v7 = vadd.f32 %v4035_v20, %v2812_v43 }
 0x46b   : > { %v2887_v55 = vmax.f32 %v2855_v38, 0.0  ;;  %v2856_v27 = vadd.f32 %v4036_v53, %v2804_v31 }
 0x46c   : > { %2921 = vst [vmem:[%s5043_s15 + $0xd0] sm:$0xff] %v2889_v35  ;;  %v2890_v21 = vmax.f32 %v2858_v7, 0.0 }
 0x46d   : > { %2919 = vst [vmem:[%s5043_s15 + $0xc0] sm:$0xff] %v2887_v55  ;;  %v2888_v52 = vmax.f32 %v2856_v27, 0.0  ;;  %v3818_v44 = vpop.f32.mrb[172].mxu0 }
 0x46e   : > { %2922 = vst [vmem:[%s5043_s15 + $0xd8] sm:$0xff] %v2890_v21  ;;  %v2825_v46 = vadd.f32 %v3818_v44, %v5031_v25  ;;  %v2816_v48 = vpop.f32.mrb[173].mxu0 }
 0x46f   : > { %2920 = vst [vmem:[%s5043_s15 + $0xc8] sm:$0xff] %v2888_v52  ;;  %v2817_v62 = vadd.f32 %v5031_v25, %v2816_v48  ;;  %v3819_v8 = vpop.f32.mrb[174].mxu0 }
 0x470   : > { %v2861_v47 = vadd.f32 %v4037_v3, %v2825_v46  ;;  %v2828_v6 = vadd.f32 %v3819_v8, %v5031_v25  ;;  %v2819_v36 = vpop.f32.mrb[175].mxu0 }
 0x471   : > { %v2859_v5 = vadd.f32 %v4038_v56, %v2817_v62  ;;  %v2820_v12 = vadd.f32 %v5031_v25, %v2819_v36 }
 0x472   : > { %v2893_v23 = vmax.f32 %v2861_v47, 0.0  ;;  %v2862_v26 = vadd.f32 %v4039_v9, %v2828_v6 }
 0x473   : > { %v2891_v22 = vmax.f32 %v2859_v5, 0.0  ;;  %v2860_v16 = vadd.f32 %v4040_v57, %v2820_v12 }
 0x474   : > { %2925 = vst [vmem:[%s5043_s15 + $0xf0] sm:$0xff] %v2893_v23  ;;  %v2894_v0 = vmax.f32 %v2862_v26, 0.0 }
 0x475   : > { %2923 = vst [vmem:[%s5043_s15 + $0xe0] sm:$0xff] %v2891_v22  ;;  %v2892_v25 = vmax.f32 %v2860_v16, 0.0 }
 0x476   : > { %2926 = vst [vmem:[%s5043_s15 + $0xf8] sm:$0xff] %v2894_v0 }
 0x477   : > { %2924 = vst [vmem:[%s5043_s15 + $0xe8] sm:$0xff] %v2892_v25 }
 0x478   : > { %4168 = shalt.err (!%p4165_p4)
}
 0x479   : > { %s4169_s23 = scalar_lea.hbm %s5135_s16, 4096  ;;  %s4173_s14 = scalar_lea.hbm %s5191_s7, 8192 }
 0x47a   : > { %p4170_p9 = scmp.ne.s32.totalorder %s5135_s16, %s4169_s23  ;;  %p4174_p8 = scmp.lt.u32.totalorder %s5135_s16, %s5191_s7 }
 0x47b   : > { %p4175_p13 = scmp.lt.u32.totalorder %s4173_s14, %s4169_s23  ;;  %p4177_p10 = scmp.lt.u32.totalorder %s4169_s23, %s5135_s16 }
 0x47c   : > { %p4171_p0 = pnand %p4170_p9, %p4437_p5 }
 0x47d   : > { %p4176_p6 = por %p4175_p13, %p4174_p8 }
 0x47e   : > { %p4172_p11 = pneg %p4171_p0 }
 0x47f   : > { %p4178_p3 = por %p4177_p10, %p4176_p6 }
 0x481   : > { %p4179_p7 = pnand %p4178_p3, %p4172_p11 }
 0x483   : > { %4182 = shalt.err (!%p4179_p7)
}
 0x484   : > { %s4241_s8 = smov 128   ;;  %s4242_s17 = smov 8  }
 0x485   : > { %3850 = dma.vmem_to_hbm [thread:$0]  (%p4437_p5), %s5137_s12, 4096, %s5135_s16, %s2928_s28, %s4241_s8, %s4241_s8, %s4242_s17  }
 0x486 PF: > { %s5211_s13 = sld [smem:[#allocation16_spill]]  ;;  %s2956_s20 = sand.u32 1, %s4217_s24  }
 0x487   : > { %p5213_p1 = scmp.ge.s32.totalorder %s4229_s27, 2  ;;  %s2957_s30 = scalar_lea.sflag [#allocation5], %s2956_s20 }
 0x48c   : > { %p5212_p12 = scmp.ne.s32.totalorder %s5211_s13, 0 }
 0x48e   : > { %p3867_p2 = pnand %p5213_p1, %p5212_p12 }
 0x490   : > { %4212 = dma.done.wait (!%p3867_p2), %s2957_s30, 4096  }
 0x491   : > { %4214 = vsyncadd (!%p3867_p2), %s2957_s30, 4294963200  ;;  %p22_p4 = scmp.ge.s32.totalorder %s4423_s22, 4   ;;  %s5214_s24 = smov %s4221_s25 }
 0x492   : > { %s5215_s25 = smov %s4225_s26  ;;  %s5216_s26 = smov %s4433_s18 }
 0x493   : > { %s5217_s27 = smov %s4423_s22  ;;  %24 = sbr.rel (!%p22_p4) target bundleno = 7 (0x7), region = 108 }
 0x49a   :  { %2962 = vsyncpa [#allocation4], 1 }
 0x49b   :  { %2964 = vsyncpa [#allocation4 + $0x1], 1 }
 0x49c   :  { %2965 = vsyncpa [#allocation7], 1 }
 0x49d   :  { %2966 = vsyncpa [#allocation10], 1 }
 0x49e   :  { %2967 = vsyncpa [#allocation5], 1 }
 0x49f   :  { %2969 = vsyncpa [#allocation5 + $0x1], 1 }

</bundles_post_ra>
